<compile_context>
chip_gen: v6e
topology: v6e:2x2x1
jax: 0.10.0
libtpu: 0.0.40
codegen_flags: <defaults>
</compile_context>

<pallas_src>
import functools
import math

import jax
import jax.numpy as jnp
from jax.experimental import pallas as pl
from jax.experimental.pallas import tpu as pltpu

DTYPE = jnp.bfloat16   # activation / weight carry dtype (HBM traffic)
ACC = jnp.float32      # accumulation / softmax / sigmoid / tanh dtype


@functools.lru_cache(maxsize=None)
def _vmem_limit_bytes():
    """Hardware-derived scoped-VMEM cap (portable across v5e/v6e/v7x)."""
    try:
        cap = int(pltpu.get_tpu_info().vmem_capacity_bytes)
    except Exception:
        cap = 64 * 2**20          # v7x per-core VMEM, smallest across chips
    return max(32 * 2**20, (cap * 7) // 10)


# ----------------------------------------------------------------------------
# Pallas kernel 1: SAGAN self-attention, one batch element per grid step
# ----------------------------------------------------------------------------
def _attention_kernel(x_ref, w_ref, b_ref, gamma_ref, o_ref, *, c, cq):
    x = x_ref[0]                                              # (N, C) bf16
    w = w_ref[...]                                            # (C, 2*cq + Cp)
    # Fused, lane-dense QKV projection (padded width is a multiple of 128).
    qkv = jnp.dot(x.astype(DTYPE), w,
                  preferred_element_type=ACC) + b_ref[...]    # (N, Wp) f32
    # 128-lane aligned slices (cq == 128): no relayout copies.
    q = qkv[:, :cq].astype(DTYPE)                             # (N, 128)
    k = qkv[:, cq:2 * cq].astype(DTYPE)                       # (N, 128)
    v = qkv[:, 2 * cq:].astype(DTYPE)                         # (N, Cpad)
    # energy[i, j] = <q_i, k_j>; padded columns are zero so they contribute 0.
    energy = jax.lax.dot_general(q, k, (((1,), (1,)), ((), ())),
                                 preferred_element_type=ACC)  # (N, N)
    # Numerically stable softmax (f32), denominator via EUP approx reciprocal.
    energy = energy - jnp.max(energy, axis=-1, keepdims=True)
    p = jnp.exp(energy)
    attn = p * pl.reciprocal(jnp.sum(p, axis=-1, keepdims=True), approx=True)
    out = jnp.dot(attn.astype(DTYPE), v,
                  preferred_element_type=ACC)                 # (N, Cpad)
    gamma = gamma_ref[0]                                      # SMEM scalar
    o_ref[0] = (gamma * out[:, :c] + x.astype(ACC)).astype(o_ref.dtype)


def self_attention_pallas(x_nhwc, p):
    B, H, W, C = x_nhwc.shape
    N = H * W
    wp = p["w"].shape[1]
    cq = p["cq_pad"]
    x_flat = x_nhwc.reshape(B, N, C)
    kernel = functools.partial(_attention_kernel, c=C, cq=cq)
    out = pl.pallas_call(
        kernel,
        out_shape=jax.ShapeDtypeStruct((B, N, C), x_nhwc.dtype),
        grid=(B,),
        in_specs=[
            pl.BlockSpec((1, N, C), lambda b: (b, 0, 0)),           # x
            pl.BlockSpec((C, wp), lambda b: (0, 0)),                # fused W
            pl.BlockSpec((1, wp), lambda b: (0, 0)),                # fused b
            pl.BlockSpec(memory_space=pltpu.MemorySpace.SMEM),      # gamma
        ],
        out_specs=pl.BlockSpec((1, N, C), lambda b: (b, 0, 0)),
        compiler_params=pltpu.CompilerParams(
            dimension_semantics=("parallel",),
            vmem_limit_bytes=_vmem_limit_bytes()),
    )(x_flat, p["w"], p["b"], p["gamma"])
    return out.reshape(B, H, W, C)


# ----------------------------------------------------------------------------
# Pallas kernel 2: Squeeze-and-Excitation (whole batch, single batched MLP)
# ----------------------------------------------------------------------------
def _se_kernel(x_ref, w1_ref, b1_ref, w2_ref, b2_ref, o_ref, *, inv_n):
    bsz = x_ref.shape[0]
    x = x_ref[...].astype(ACC)                                # (B, N, C) f32
    pooled = jnp.concatenate(
        [jnp.sum(x[b], axis=0, keepdims=True) for b in range(bsz)],
        axis=0) * inv_n                                       # (B, C) f32
    h = jnp.dot(pooled, w1_ref[...], preferred_element_type=ACC) + b1_ref[...]
    h = jnp.maximum(h, 0.0)                                   # (B, Cr)
    g = jnp.dot(h, w2_ref[...], preferred_element_type=ACC) + b2_ref[...]
    g = 1.0 / (1.0 + jnp.exp(-g))                             # sigmoid (B, C)
    for b in range(bsz):
        o_ref[b] = (x[b] * g[b:b + 1, :]).astype(o_ref.dtype)


def se_pallas(x_nhwc, p):
    B, H, W, C = x_nhwc.shape
    N = H * W
    x_flat = x_nhwc.reshape(B, N, C)
    kernel = functools.partial(_se_kernel, inv_n=1.0 / N)
    out = pl.pallas_call(
        kernel,
        out_shape=jax.ShapeDtypeStruct((B, N, C), x_nhwc.dtype),
        in_specs=[pl.BlockSpec(memory_space=pltpu.MemorySpace.VMEM)] * 5,
        out_specs=pl.BlockSpec(memory_space=pltpu.MemorySpace.VMEM),
        compiler_params=pltpu.CompilerParams(
            vmem_limit_bytes=_vmem_limit_bytes()),
    )(x_flat, p["w1"], p["b1"], p["w2"], p["b2"])
    return out.reshape(B, H, W, C)


# ----------------------------------------------------------------------------
# Pallas kernel 3: lane-dense Tanh (final decoder activation, C = nc = 1)
# ----------------------------------------------------------------------------
def _tanh_kernel(x_ref, o_ref):
    o_ref[...] = jnp.tanh(x_ref[...].astype(ACC)).astype(o_ref.dtype)


def tanh_pallas(x_nhwc):
    shape = x_nhwc.shape
    total = math.prod(shape)
    # Flatten to a fully lane-dense (rows, 128) slab when possible (the raw
    # NHWC layout has only nc=1 lanes -> masked vst at 1/128 utilisation).
    lanes = 128 if total % 128 == 0 else shape[-1]
    rows = total // lanes
    x2 = x_nhwc.reshape(rows, lanes)
    blk = 512 if (rows > 512 and rows % 512 == 0) else rows
    out = pl.pallas_call(
        _tanh_kernel,
        out_shape=jax.ShapeDtypeStruct((rows, lanes), x_nhwc.dtype),
        grid=(rows // blk,),
        in_specs=[pl.BlockSpec((blk, lanes), lambda i: (i, 0))],
        out_specs=pl.BlockSpec((blk, lanes), lambda i: (i, 0)),
        compiler_params=pltpu.CompilerParams(
            dimension_semantics=("parallel",)),
    )(x2)
    return out.reshape(shape)


# ----------------------------------------------------------------------------
# Convolutions (XLA) + fused bias/activation epilogue (XLA fuses into conv)
# ----------------------------------------------------------------------------
def conv2d_nhwc(x, w, stride, padding):
    return jax.lax.conv_general_dilated(
        x, w, window_strides=(stride, stride),
        padding=[(padding, padding), (padding, padding)],
        dimension_numbers=("NHWC", "HWIO", "NHWC"),
        preferred_element_type=ACC)


def conv_transpose2d_nhwc(x, w, stride, padding):
    # w is already spatially-flipped HWIO (see convt_weight_pt_to_hwio), so
    # this is exactly PyTorch ConvTranspose2d.
    k = w.shape[0]
    pad = k - 1 - padding
    return jax.lax.conv_general_dilated(
        x, w, window_strides=(1, 1),
        padding=[(pad, pad), (pad, pad)],
        lhs_dilation=(stride, stride),
        dimension_numbers=("NHWC", "HWIO", "NHWC"),
        preferred_element_type=ACC)


def bias_act(y, bias, act="none", slope=0.2, residual=None):
    """Folded-BN bias + activation (+ optional residual); y is the f32 conv
    output, result is cast to the bf16 carry dtype. Fused by XLA into the
    conv epilogue."""
    y = y + bias.astype(y.dtype)
    if act == "relu":
        y = jnp.maximum(y, 0.0)
    elif act == "lrelu":
        y = jnp.where(y >= 0.0, y, slope * y)
    if residual is not None:
        y = y + residual.astype(y.dtype)
    return y.astype(DTYPE)


# PyTorch layout conversions -------------------------------------------------
def conv_weight_pt_to_hwio(w):      # (Cout, Cin, kH, kW) -> (kH, kW, Cin, Cout)
    return jnp.transpose(w, (2, 3, 1, 0))


def convt_weight_pt_to_hwio(w):     # (Cin, Cout, kH, kW) -> flipped HWIO
    return jnp.flip(jnp.transpose(w, (2, 3, 0, 1)), axis=(0, 1))


# ----------------------------------------------------------------------------
# Model forward (structure mirrors the PyTorch modules; NHWC, bf16 carry)
# ----------------------------------------------------------------------------
def residual_se_block_fwd(x, p, ops):
    identity = x
    out = ops["se"](x, p["se"])
    out = conv2d_nhwc(out, p["conv1_w"], 1, 1)
    out = bias_act(out, p["conv1_b"], act="relu")
    out = conv2d_nhwc(out, p["conv2_w"], 1, 1)
    out = bias_act(out, p["conv2_b"], act="none", residual=identity)
    return out


def encoder_fwd(x, p, ops):
    h = conv2d_nhwc(x, p["initial_w"], 2, 1)
    h = bias_act(h, p["initial_b"], act="lrelu")
    h = residual_se_block_fwd(h, p["initial_res"], ops)
    for stage in p["pyramid"]:
        h = conv2d_nhwc(h, stage["w"], 2, 1)
        h = bias_act(h, stage["b"], act="lrelu")
        h = residual_se_block_fwd(h, stage["res"], ops)
    if p.get("final_w") is not None:
        h = conv2d_nhwc(h, p["final_w"], 1, 0).astype(DTYPE)   # no BN, no act
    return h


def decoder_fwd(z, p, ops):
    h = conv_transpose2d_nhwc(z, p["initial_w"], 1, 0)
    h = bias_act(h, p["initial_b"], act="relu")
    h = ops["attn"](h, p["initial_attn"])
    for blk in p["up"]:
        h = conv_transpose2d_nhwc(h, blk["w"], 2, 1)
        h = bias_act(h, blk["b"], act="relu")
        h = ops["attn"](h, blk["attn"])
    h = conv_transpose2d_nhwc(h, p["final_w"], 2, 1).astype(DTYPE)
    return ops["tanh"](h)


def netg_fwd(x_nchw, params, ops):
    x = jnp.transpose(x_nchw, (0, 2, 3, 1)).astype(DTYPE)   # boundary relayout
    latent_i = encoder_fwd(x, params["encoder1"], ops)      # (B, 1, 1, nz)
    gen = decoder_fwd(latent_i, params["decoder"], ops)     # (B, isize, isize, nc)
    latent_o = encoder_fwd(gen, params["encoder2"], ops)    # (B, 1, 1, nz)
    gen_nchw = jnp.transpose(gen, (0, 3, 1, 2)).astype(jnp.float32)
    latent_i = jnp.transpose(latent_i, (0, 3, 1, 2)).astype(jnp.float32)
    latent_o = jnp.transpose(latent_o, (0, 3, 1, 2)).astype(jnp.float32)
    return gen_nchw, latent_i, latent_o


# ----------------------------------------------------------------------------
# Op backends: Pallas kernels vs pure-JAX reference (same prepared params)
# ----------------------------------------------------------------------------
def make_pallas_ops():
    return {"attn": self_attention_pallas, "se": se_pallas, "tanh": tanh_pallas}


def make_ref_ops():
    def attn(x, p):
        B, H, W, C = x.shape
        N = H * W
        cq = p["cq_pad"]
        xf = x.reshape(B, N, C)
        qkv = jnp.einsum("bnc,cd->bnd", xf.astype(DTYPE), p["w"],
                         preferred_element_type=ACC) + p["b"]
        q = qkv[..., :cq].astype(DTYPE)
        k = qkv[..., cq:2 * cq].astype(DTYPE)
        v = qkv[..., 2 * cq:].astype(DTYPE)
        e = jnp.einsum("bic,bjc->bij", q, k, preferred_element_type=ACC)
        a = jax.nn.softmax(e, axis=-1)
        out = jnp.einsum("bij,bjc->bic", a.astype(DTYPE), v,
                         preferred_element_type=ACC)
        out = p["gamma"][0] * out[..., :C] + xf.astype(ACC)
        return out.astype(x.dtype).reshape(B, H, W, C)

    def se(x, p):
        pooled = jnp.mean(x.astype(ACC), axis=(1, 2))              # (B, C)
        h = jnp.maximum(pooled @ p["w1"] + p["b1"], 0.0)
        g = jax.nn.sigmoid(h @ p["w2"] + p["b2"])
        return (x.astype(ACC) * g[:, None, None, :]).astype(x.dtype)

    def tanh(x):
        return jnp.tanh(x.astype(ACC)).astype(x.dtype)

    return {"attn": attn, "se": se, "tanh": tanh}


# ----------------------------------------------------------------------------
# Raw parameter construction (PyTorch layouts, mirrors the module structure)
# ----------------------------------------------------------------------------
def _winit(key, shape, fan_in):
    return (0.5 / math.sqrt(fan_in)) * jax.random.normal(key, shape, jnp.float32)


def _bn_init(key, c):
    k1, k2, k3, k4 = jax.random.split(key, 4)
    return {"weight": 1.0 + 0.1 * jax.random.normal(k1, (c,), jnp.float32),
            "bias": 0.1 * jax.random.normal(k2, (c,), jnp.float32),
            "mean": 0.1 * jax.random.normal(k3, (c,), jnp.float32),
            "var": 0.5 + jax.random.uniform(k4, (c,), jnp.float32)}


def _se_init_raw(key, c, reduction=16):
    cr = max(1, c // reduction)
    k1, k2, k3, k4 = jax.random.split(key, 4)
    # nn.Linear weights in PyTorch (out_features, in_features) layout.
    return {"w1": _winit(k1, (cr, c), c),
            "b1": 0.1 * jax.random.normal(k2, (cr,), jnp.float32),
            "w2": _winit(k3, (c, cr), cr),
            "b2": 0.1 * jax.random.normal(k4, (c,), jnp.float32)}


def _res_se_init_raw(key, c):
    k1, k2, k3, k4, k5 = jax.random.split(key, 5)
    # nn.Conv2d weights in PyTorch (Cout, Cin, kH, kW) layout.
    return {"conv1": _winit(k1, (c, c, 3, 3), 9 * c), "bn1": _bn_init(k2, c),
            "conv2": _winit(k3, (c, c, 3, 3), 9 * c), "bn2": _bn_init(k4, c),
            "se": _se_init_raw(k5, c)}


def _attn_init_raw(key, c):
    cqk = max(1, c // 8)
    k1, k2, k3, k4, k5, k6 = jax.random.split(key, 6)
    return {"wq": _winit(k1, (cqk, c), c),
            "bq": 0.1 * jax.random.normal(k2, (cqk,), jnp.float32),
            "wk": _winit(k3, (cqk, c), c),
            "bk": 0.1 * jax.random.normal(k4, (cqk,), jnp.float32),
            "wv": _winit(k5, (c, c), c),
            "bv": 0.1 * jax.random.normal(k6, (c,), jnp.float32),
            # PyTorch initializes gamma = zeros(1); a nonzero value is used so
            # the attention path is actually exercised by the self-test.
            "gamma": jnp.array([0.3], jnp.float32)}


def _encoder_init_raw(key, isize, nz, nc, ngf, add_final_conv=True):
    keys = jax.random.split(key, 24)
    p = {"initial_conv": _winit(keys[0], (ngf, nc, 4, 4), 16 * nc),
         "initial_bn": _bn_init(keys[1], ngf),
         "initial_res": _res_se_init_raw(keys[2], ngf),
         "pyramid": [], "final_conv": None}
    c, csize, ki = ngf, isize // 2, 3
    for _ in range(int(math.log2(csize / 4))):
        cout = min(c * 2, 1024)
        p["pyramid"].append({"conv": _winit(keys[ki], (cout, c, 4, 4), 16 * c),
                             "bn": _bn_init(keys[ki + 1], cout),
                             "res": _res_se_init_raw(keys[ki + 2], cout)})
        ki += 3
        c = cout
        csize //= 2
    if add_final_conv:
        p["final_conv"] = _winit(keys[ki], (nz, c, 4, 4), 16 * c)
    return p


def _encoder_deepest_channels(isize, ngf):
    # mirrors NetG's dummy-encoder probe used to compute ngf_deepest
    c, csize = ngf, isize // 2
    for _ in range(int(math.log2(csize / 4))):
        c = min(c * 2, 1024)
    return c


def _decoder_init_raw(key, isize, nz, nc, ngf_deepest):
    keys = jax.random.split(key, 24)
    # nn.ConvTranspose2d weights in PyTorch (Cin, Cout, kH, kW) layout.
    p = {"initial_convt": _winit(keys[0], (nz, ngf_deepest, 4, 4), 16 * nz),
         "initial_bn": _bn_init(keys[1], ngf_deepest),
         "initial_attn": _attn_init_raw(keys[2], ngf_deepest),
         "up": []}
    c, csize, ki = ngf_deepest, 4, 3
    while csize < isize // 2:
        cout = c // 2
        p["up"].append({"convt": _winit(keys[ki], (c, cout, 4, 4), 16 * c),
                        "bn": _bn_init(keys[ki + 1], cout),
                        "attn": _attn_init_raw(keys[ki + 2], cout)})
        ki += 3
        c = cout
        csize *= 2
    p["final_convt"] = _winit(keys[ki], (c, nc, 4, 4), 16 * c)
    return p


def init_netg_raw(key, isize, nz, nc, ngf):
    k1, k2, k3 = jax.random.split(key, 3)
    ngf_deepest = _encoder_deepest_channels(isize, ngf)
    return {"encoder1": _encoder_init_raw(k1, isize, nz, nc, ngf, True),
            "decoder": _decoder_init_raw(k2, isize, nz, nc, ngf_deepest),
            "encoder2": _encoder_init_raw(k3, isize, nz, nc, ngf, True)}


# ----------------------------------------------------------------------------
# Parameter preparation: fold BN into convs, convert layouts, pad QKV to 128
# ----------------------------------------------------------------------------
def _round_up(x, m):
    return (x + m - 1) // m * m


def _fold_bn(bn, eps=1e-5):
    scale = bn["weight"] * jax.lax.rsqrt(bn["var"] + eps)
    shift = bn["bias"] - bn["mean"] * scale
    return scale, shift


def _prep_conv_bn(w_pt, bn):
    w = conv_weight_pt_to_hwio(w_pt)
    scale, shift = _fold_bn(bn)
    return (w * scale).astype(DTYPE), shift.astype(ACC)


def _prep_convt_bn(w_pt, bn):
    w = convt_weight_pt_to_hwio(w_pt)
    scale, shift = _fold_bn(bn)
    return (w * scale).astype(DTYPE), shift.astype(ACC)


def _prep_se(raw):
    return {"w1": raw["w1"].T.astype(ACC), "b1": raw["b1"].reshape(1, -1),
            "w2": raw["w2"].T.astype(ACC), "b2": raw["b2"].reshape(1, -1)}


def _prep_attn(raw, c):
    cqk = raw["wq"].shape[0]
    cq_pad = 128
    c_pad = _round_up(c, 128)
    wp = 2 * cq_pad + c_pad
    w = jnp.zeros((c, wp), jnp.float32)
    w = w.at[:, :cqk].set(raw["wq"].T)
    w = w.at[:, cq_pad:cq_pad + cqk].set(raw["wk"].T)
    w = w.at[:, 2 * cq_pad:2 * cq_pad + c].set(raw["wv"].T)
    b = jnp.zeros((wp,), jnp.float32)
    b = b.at[:cqk].set(raw["bq"])
    b = b.at[cq_pad:cq_pad + cqk].set(raw["bk"])
    b = b.at[2 * cq_pad:2 * cq_pad + c].set(raw["bv"])
    return {"w": w.astype(DTYPE), "b": b.reshape(1, wp).astype(ACC),
            "gamma": raw["gamma"], "cq_pad": cq_pad}


def _prep_res_se(raw):
    w1, b1 = _prep_conv_bn(raw["conv1"], raw["bn1"])
    w2, b2 = _prep_conv_bn(raw["conv2"], raw["bn2"])
    return {"conv1_w": w1, "conv1_b": b1, "conv2_w": w2, "conv2_b": b2,
            "se": _prep_se(raw["se"])}


def prepare_encoder(raw):
    w0, b0 = _prep_conv_bn(raw["initial_conv"], raw["initial_bn"])
    p = {"initial_w": w0, "initial_b": b0,
         "initial_res": _prep_res_se(raw["initial_res"]),
         "pyramid": [], "final_w": None}
    for st in raw["pyramid"]:
        w, b = _prep_conv_bn(st["conv"], st["bn"])
        p["pyramid"].append({"w": w, "b": b, "res": _prep_res_se(st["res"])})
    if raw["final_conv"] is not None:
        p["final_w"] = conv_weight_pt_to_hwio(raw["final_conv"]).astype(DTYPE)
    return p


def prepare_decoder(raw):
    w0, b0 = _prep_convt_bn(raw["initial_convt"], raw["initial_bn"])
    p = {"initial_w": w0, "initial_b": b0,
         "initial_attn": _prep_attn(raw["initial_attn"],
                                    raw["initial_convt"].shape[1]),
         "up": []}
    for blk in raw["up"]:
        w, b = _prep_convt_bn(blk["convt"], blk["bn"])
        p["up"].append({"w": w, "b": b,
                        "attn": _prep_attn(blk["attn"], blk["convt"].shape[1])})
    p["final_w"] = convt_weight_pt_to_hwio(raw["final_convt"]).astype(DTYPE)
    return p


def prepare_params(raw):
    return {"encoder1": prepare_encoder(raw["encoder1"]),
            "decoder": prepare_decoder(raw["decoder"]),
            "encoder2": prepare_encoder(raw["encoder2"])}


# ----------------------------------------------------------------------------
if __name__ == "__main__":
    B, isize, nc, nz, ngf = 2, 32, 1, 16, 32

    key = jax.random.PRNGKey(0)
    kp, kx = jax.random.split(key)
    raw_params = init_netg_raw(kp, isize, nz, nc, ngf)
    params = prepare_params(raw_params)       # BN folded, layouts converted
    x = jax.random.normal(kx, (B, nc, isize, isize), dtype=jnp.float32)

    pallas_ops = make_pallas_ops()
    ref_ops = make_ref_ops()

    fwd_pallas = jax.jit(functools.partial(netg_fwd, params=params,
                                           ops=pallas_ops))
    fwd_ref = jax.jit(functools.partial(netg_fwd, params=params, ops=ref_ops))

    gen, lat_i, lat_o = jax.block_until_ready(fwd_pallas(x))
    gen_r, lat_i_r, lat_o_r = jax.block_until_ready(fwd_ref(x))

    assert gen.shape == (B, nc, isize, isize)
    assert lat_i.shape == (B, nz, 1, 1) and lat_o.shape == (B, nz, 1, 1)

    # encoder1 differs from the reference only in the SE kernel (f32 internals
    # in both) -> tight; decoder/encoder2 additionally see the bf16 attention
    # matmuls + approx softmax reciprocal -> looser.
    assert jnp.allclose(lat_i, lat_i_r, atol=1e-2, rtol=1e-2), "latent_i mismatch"
    assert jnp.allclose(gen, gen_r, atol=3e-2, rtol=3e-2), "gen_imag mismatch"
    assert jnp.allclose(lat_o, lat_o_r, atol=4e-2, rtol=4e-2), "latent_o mismatch"

    print("KERNEL_OK")
</pallas_src>

<mosaic_0001>
module attributes {stable_mosaic.version = 11 : i64} {
  func.func @_se_kernel(%arg0: memref<2x256x32xbf16, #tpu.memory_space<vmem>>, %arg1: memref<32x2xf32, #tpu.memory_space<vmem>>, %arg2: memref<1x2xf32, #tpu.memory_space<vmem>>, %arg3: memref<2x32xf32, #tpu.memory_space<vmem>>, %arg4: memref<1x32xf32, #tpu.memory_space<vmem>>, %arg5: memref<2x256x32xbf16, #tpu.memory_space<vmem>>) attributes {dimension_semantics = [], scalar_prefetch = 0 : i64, scratch_operands = 0 : i64, tpu.core_type = #tpu.core_type<tc>} {
    %c0 = arith.constant 0 : index
    %c0_0 = arith.constant 0 : index
    %c0_1 = arith.constant 0 : index
    %0 = vector.load %arg0[%c0, %c0_0, %c0_1] : memref<2x256x32xbf16, #tpu.memory_space<vmem>>, vector<2x256x32xbf16>
    %1 = arith.extf %0 : vector<2x256x32xbf16> to vector<2x256x32xf32>
    %2 = vector.extract_strided_slice %1 {offsets = [0, 0, 0], sizes = [1, 256, 32], strides = [1, 1, 1]} : vector<2x256x32xf32> to vector<1x256x32xf32>
    %3 = vector.shape_cast %2 : vector<1x256x32xf32> to vector<256x32xf32>
    %cst = arith.constant dense<0.000000e+00> : vector<32xf32>
    %4 = vector.multi_reduction <add>, %3, %cst [0] : vector<256x32xf32> to vector<32xf32>
    %5 = vector.shape_cast %4 : vector<32xf32> to vector<1x32xf32>
    %6 = vector.extract_strided_slice %1 {offsets = [1, 0, 0], sizes = [1, 256, 32], strides = [1, 1, 1]} : vector<2x256x32xf32> to vector<1x256x32xf32>
    %7 = vector.shape_cast %6 : vector<1x256x32xf32> to vector<256x32xf32>
    %cst_2 = arith.constant dense<0.000000e+00> : vector<32xf32>
    %8 = vector.multi_reduction <add>, %7, %cst_2 [0] : vector<256x32xf32> to vector<32xf32>
    %9 = vector.shape_cast %8 : vector<32xf32> to vector<1x32xf32>
    %10 = tpu.concatenate %5, %9 in 0 : vector<1x32xf32>, vector<1x32xf32> -> vector<2x32xf32>
    %cst_3 = arith.constant 3.906250e-03 : f32
    %11 = vector.broadcast %cst_3 : f32 to vector<2x32xf32>
    %12 = arith.mulf %10, %11 : vector<2x32xf32>
    %c0_4 = arith.constant 0 : index
    %c0_5 = arith.constant 0 : index
    %13 = vector.load %arg1[%c0_4, %c0_5] : memref<32x2xf32, #tpu.memory_space<vmem>>, vector<32x2xf32>
    %cst_6 = arith.constant dense<0.000000e+00> : vector<2x2xf32>
    %14 = tpu.matmul %12, %13, %cst_6 {dimension_numbers = #tpu.dot_dimension_numbers<[1], [0], [0], [1], [0, 0, 1, 1], [], []>} : vector<2x32xf32>, vector<32x2xf32>, vector<2x2xf32> -> vector<2x2xf32>
    %c0_7 = arith.constant 0 : index
    %c0_8 = arith.constant 0 : index
    %15 = vector.load %arg2[%c0_7, %c0_8] : memref<1x2xf32, #tpu.memory_space<vmem>>, vector<1x2xf32>
    %16 = vector.broadcast %15 : vector<1x2xf32> to vector<2x2xf32>
    %17 = arith.addf %14, %16 : vector<2x2xf32>
    %cst_9 = arith.constant 0.000000e+00 : f32
    %18 = vector.broadcast %cst_9 : f32 to vector<2x2xf32>
    %19 = arith.maximumf %17, %18 : vector<2x2xf32>
    %c0_10 = arith.constant 0 : index
    %c0_11 = arith.constant 0 : index
    %20 = vector.load %arg3[%c0_10, %c0_11] : memref<2x32xf32, #tpu.memory_space<vmem>>, vector<2x32xf32>
    %cst_12 = arith.constant dense<0.000000e+00> : vector<2x32xf32>
    %21 = tpu.matmul %19, %20, %cst_12 {dimension_numbers = #tpu.dot_dimension_numbers<[1], [0], [0], [1], [0, 0, 1, 1], [], []>} : vector<2x2xf32>, vector<2x32xf32>, vector<2x32xf32> -> vector<2x32xf32>
    %c0_13 = arith.constant 0 : index
    %c0_14 = arith.constant 0 : index
    %22 = vector.load %arg4[%c0_13, %c0_14] : memref<1x32xf32, #tpu.memory_space<vmem>>, vector<1x32xf32>
    %23 = vector.broadcast %22 : vector<1x32xf32> to vector<2x32xf32>
    %24 = arith.addf %21, %23 : vector<2x32xf32>
    %cst_15 = arith.constant 0.000000e+00 : f32
    %25 = vector.broadcast %cst_15 : f32 to vector<2x32xf32>
    %26 = arith.subf %25, %24 : vector<2x32xf32>
    %27 = math.exp %26 : vector<2x32xf32>
    %cst_16 = arith.constant 1.000000e+00 : f32
    %28 = vector.broadcast %cst_16 : f32 to vector<2x32xf32>
    %29 = arith.addf %28, %27 : vector<2x32xf32>
    %cst_17 = arith.constant 1.000000e+00 : f32
    %30 = vector.broadcast %cst_17 : f32 to vector<2x32xf32>
    %31 = arith.divf %30, %29 : vector<2x32xf32>
    %32 = vector.extract_strided_slice %1 {offsets = [0, 0, 0], sizes = [1, 256, 32], strides = [1, 1, 1]} : vector<2x256x32xf32> to vector<1x256x32xf32>
    %33 = vector.shape_cast %32 : vector<1x256x32xf32> to vector<256x32xf32>
    %34 = vector.extract_strided_slice %31 {offsets = [0, 0], sizes = [1, 32], strides = [1, 1]} : vector<2x32xf32> to vector<1x32xf32>
    %35 = vector.broadcast %34 : vector<1x32xf32> to vector<256x32xf32>
    %36 = arith.mulf %33, %35 : vector<256x32xf32>
    %37 = arith.truncf %36 : vector<256x32xf32> to vector<256x32xbf16>
    %c0_18 = arith.constant 0 : index
    %c0_19 = arith.constant 0 : index
    %c0_20 = arith.constant 0 : index
    %38 = vector.load %arg5[%c0_18, %c0_19, %c0_20] : memref<2x256x32xbf16, #tpu.memory_space<vmem>>, vector<1x256x32xbf16>
    %39 = vector.shape_cast %38 : vector<1x256x32xbf16> to vector<256x32xbf16>
    %40 = vector.shape_cast %37 : vector<256x32xbf16> to vector<1x256x32xbf16>
    tpu.vector_store %arg5[%c0_18, %c0_19, %c0_20], %40 {strides = array<i32>} : memref<2x256x32xbf16, #tpu.memory_space<vmem>>, vector<1x256x32xbf16>,
    %41 = vector.extract_strided_slice %1 {offsets = [1, 0, 0], sizes = [1, 256, 32], strides = [1, 1, 1]} : vector<2x256x32xf32> to vector<1x256x32xf32>
    %42 = vector.shape_cast %41 : vector<1x256x32xf32> to vector<256x32xf32>
    %43 = vector.extract_strided_slice %31 {offsets = [1, 0], sizes = [1, 32], strides = [1, 1]} : vector<2x32xf32> to vector<1x32xf32>
    %44 = vector.broadcast %43 : vector<1x32xf32> to vector<256x32xf32>
    %45 = arith.mulf %42, %44 : vector<256x32xf32>
    %46 = arith.truncf %45 : vector<256x32xf32> to vector<256x32xbf16>
    %c1 = arith.constant 1 : index
    %c0_21 = arith.constant 0 : index
    %c0_22 = arith.constant 0 : index
    %47 = vector.load %arg5[%c1, %c0_21, %c0_22] : memref<2x256x32xbf16, #tpu.memory_space<vmem>>, vector<1x256x32xbf16>
    %48 = vector.shape_cast %47 : vector<1x256x32xbf16> to vector<256x32xbf16>
    %49 = vector.shape_cast %46 : vector<256x32xbf16> to vector<1x256x32xbf16>
    tpu.vector_store %arg5[%c1, %c0_21, %c0_22], %49 {strides = array<i32>} : memref<2x256x32xbf16, #tpu.memory_space<vmem>>, vector<1x256x32xbf16>,
    return
  }
}

module attributes {stable_mosaic.version = 11 : i64} {
  func.func @_se_kernel(%arg0: memref<2x64x64xbf16, #tpu.memory_space<vmem>>, %arg1: memref<64x4xf32, #tpu.memory_space<vmem>>, %arg2: memref<1x4xf32, #tpu.memory_space<vmem>>, %arg3: memref<4x64xf32, #tpu.memory_space<vmem>>, %arg4: memref<1x64xf32, #tpu.memory_space<vmem>>, %arg5: memref<2x64x64xbf16, #tpu.memory_space<vmem>>) attributes {dimension_semantics = [], scalar_prefetch = 0 : i64, scratch_operands = 0 : i64, tpu.core_type = #tpu.core_type<tc>} {
    %c0 = arith.constant 0 : index
    %c0_0 = arith.constant 0 : index
    %c0_1 = arith.constant 0 : index
    %0 = vector.load %arg0[%c0, %c0_0, %c0_1] : memref<2x64x64xbf16, #tpu.memory_space<vmem>>, vector<2x64x64xbf16>
    %1 = arith.extf %0 : vector<2x64x64xbf16> to vector<2x64x64xf32>
    %2 = vector.extract_strided_slice %1 {offsets = [0, 0, 0], sizes = [1, 64, 64], strides = [1, 1, 1]} : vector<2x64x64xf32> to vector<1x64x64xf32>
    %3 = vector.shape_cast %2 : vector<1x64x64xf32> to vector<64x64xf32>
    %cst = arith.constant dense<0.000000e+00> : vector<64xf32>
    %4 = vector.multi_reduction <add>, %3, %cst [0] : vector<64x64xf32> to vector<64xf32>
    %5 = vector.shape_cast %4 : vector<64xf32> to vector<1x64xf32>
    %6 = vector.extract_strided_slice %1 {offsets = [1, 0, 0], sizes = [1, 64, 64], strides = [1, 1, 1]} : vector<2x64x64xf32> to vector<1x64x64xf32>
    %7 = vector.shape_cast %6 : vector<1x64x64xf32> to vector<64x64xf32>
    %cst_2 = arith.constant dense<0.000000e+00> : vector<64xf32>
    %8 = vector.multi_reduction <add>, %7, %cst_2 [0] : vector<64x64xf32> to vector<64xf32>
    %9 = vector.shape_cast %8 : vector<64xf32> to vector<1x64xf32>
    %10 = tpu.concatenate %5, %9 in 0 : vector<1x64xf32>, vector<1x64xf32> -> vector<2x64xf32>
    %cst_3 = arith.constant 1.562500e-02 : f32
    %11 = vector.broadcast %cst_3 : f32 to vector<2x64xf32>
    %12 = arith.mulf %10, %11 : vector<2x64xf32>
    %c0_4 = arith.constant 0 : index
    %c0_5 = arith.constant 0 : index
    %13 = vector.load %arg1[%c0_4, %c0_5] : memref<64x4xf32, #tpu.memory_space<vmem>>, vector<64x4xf32>
    %cst_6 = arith.constant dense<0.000000e+00> : vector<2x4xf32>
    %14 = tpu.matmul %12, %13, %cst_6 {dimension_numbers = #tpu.dot_dimension_numbers<[1], [0], [0], [1], [0, 0, 1, 1], [], []>} : vector<2x64xf32>, vector<64x4xf32>, vector<2x4xf32> -> vector<2x4xf32>
    %c0_7 = arith.constant 0 : index
    %c0_8 = arith.constant 0 : index
    %15 = vector.load %arg2[%c0_7, %c0_8] : memref<1x4xf32, #tpu.memory_space<vmem>>, vector<1x4xf32>
    %16 = vector.broadcast %15 : vector<1x4xf32> to vector<2x4xf32>
    %17 = arith.addf %14, %16 : vector<2x4xf32>
    %cst_9 = arith.constant 0.000000e+00 : f32
    %18 = vector.broadcast %cst_9 : f32 to vector<2x4xf32>
    %19 = arith.maximumf %17, %18 : vector<2x4xf32>
    %c0_10 = arith.constant 0 : index
    %c0_11 = arith.constant 0 : index
    %20 = vector.load %arg3[%c0_10, %c0_11] : memref<4x64xf32, #tpu.memory_space<vmem>>, vector<4x64xf32>
    %cst_12 = arith.constant dense<0.000000e+00> : vector<2x64xf32>
    %21 = tpu.matmul %19, %20, %cst_12 {dimension_numbers = #tpu.dot_dimension_numbers<[1], [0], [0], [1], [0, 0, 1, 1], [], []>} : vector<2x4xf32>, vector<4x64xf32>, vector<2x64xf32> -> vector<2x64xf32>
    %c0_13 = arith.constant 0 : index
    %c0_14 = arith.constant 0 : index
    %22 = vector.load %arg4[%c0_13, %c0_14] : memref<1x64xf32, #tpu.memory_space<vmem>>, vector<1x64xf32>
    %23 = vector.broadcast %22 : vector<1x64xf32> to vector<2x64xf32>
    %24 = arith.addf %21, %23 : vector<2x64xf32>
    %cst_15 = arith.constant 0.000000e+00 : f32
    %25 = vector.broadcast %cst_15 : f32 to vector<2x64xf32>
    %26 = arith.subf %25, %24 : vector<2x64xf32>
    %27 = math.exp %26 : vector<2x64xf32>
    %cst_16 = arith.constant 1.000000e+00 : f32
    %28 = vector.broadcast %cst_16 : f32 to vector<2x64xf32>
    %29 = arith.addf %28, %27 : vector<2x64xf32>
    %cst_17 = arith.constant 1.000000e+00 : f32
    %30 = vector.broadcast %cst_17 : f32 to vector<2x64xf32>
    %31 = arith.divf %30, %29 : vector<2x64xf32>
    %32 = vector.extract_strided_slice %1 {offsets = [0, 0, 0], sizes = [1, 64, 64], strides = [1, 1, 1]} : vector<2x64x64xf32> to vector<1x64x64xf32>
    %33 = vector.shape_cast %32 : vector<1x64x64xf32> to vector<64x64xf32>
    %34 = vector.extract_strided_slice %31 {offsets = [0, 0], sizes = [1, 64], strides = [1, 1]} : vector<2x64xf32> to vector<1x64xf32>
    %35 = vector.broadcast %34 : vector<1x64xf32> to vector<64x64xf32>
    %36 = arith.mulf %33, %35 : vector<64x64xf32>
    %37 = arith.truncf %36 : vector<64x64xf32> to vector<64x64xbf16>
    %c0_18 = arith.constant 0 : index
    %c0_19 = arith.constant 0 : index
    %c0_20 = arith.constant 0 : index
    %38 = vector.load %arg5[%c0_18, %c0_19, %c0_20] : memref<2x64x64xbf16, #tpu.memory_space<vmem>>, vector<1x64x64xbf16>
    %39 = vector.shape_cast %38 : vector<1x64x64xbf16> to vector<64x64xbf16>
    %40 = vector.shape_cast %37 : vector<64x64xbf16> to vector<1x64x64xbf16>
    tpu.vector_store %arg5[%c0_18, %c0_19, %c0_20], %40 {strides = array<i32>} : memref<2x64x64xbf16, #tpu.memory_space<vmem>>, vector<1x64x64xbf16>,
    %41 = vector.extract_strided_slice %1 {offsets = [1, 0, 0], sizes = [1, 64, 64], strides = [1, 1, 1]} : vector<2x64x64xf32> to vector<1x64x64xf32>
    %42 = vector.shape_cast %41 : vector<1x64x64xf32> to vector<64x64xf32>
    %43 = vector.extract_strided_slice %31 {offsets = [1, 0], sizes = [1, 64], strides = [1, 1]} : vector<2x64xf32> to vector<1x64xf32>
    %44 = vector.broadcast %43 : vector<1x64xf32> to vector<64x64xf32>
    %45 = arith.mulf %42, %44 : vector<64x64xf32>
    %46 = arith.truncf %45 : vector<64x64xf32> to vector<64x64xbf16>
    %c1 = arith.constant 1 : index
    %c0_21 = arith.constant 0 : index
    %c0_22 = arith.constant 0 : index
    %47 = vector.load %arg5[%c1, %c0_21, %c0_22] : memref<2x64x64xbf16, #tpu.memory_space<vmem>>, vector<1x64x64xbf16>
    %48 = vector.shape_cast %47 : vector<1x64x64xbf16> to vector<64x64xbf16>
    %49 = vector.shape_cast %46 : vector<64x64xbf16> to vector<1x64x64xbf16>
    tpu.vector_store %arg5[%c1, %c0_21, %c0_22], %49 {strides = array<i32>} : memref<2x64x64xbf16, #tpu.memory_space<vmem>>, vector<1x64x64xbf16>,
    return
  }
}

module attributes {stable_mosaic.version = 11 : i64} {
  func.func @_se_kernel(%arg0: memref<2x16x128xbf16, #tpu.memory_space<vmem>>, %arg1: memref<128x8xf32, #tpu.memory_space<vmem>>, %arg2: memref<1x8xf32, #tpu.memory_space<vmem>>, %arg3: memref<8x128xf32, #tpu.memory_space<vmem>>, %arg4: memref<1x128xf32, #tpu.memory_space<vmem>>, %arg5: memref<2x16x128xbf16, #tpu.memory_space<vmem>>) attributes {dimension_semantics = [], scalar_prefetch = 0 : i64, scratch_operands = 0 : i64, tpu.core_type = #tpu.core_type<tc>} {
    %c0 = arith.constant 0 : index
    %c0_0 = arith.constant 0 : index
    %c0_1 = arith.constant 0 : index
    %0 = vector.load %arg0[%c0, %c0_0, %c0_1] : memref<2x16x128xbf16, #tpu.memory_space<vmem>>, vector<2x16x128xbf16>
    %1 = arith.extf %0 : vector<2x16x128xbf16> to vector<2x16x128xf32>
    %2 = vector.extract_strided_slice %1 {offsets = [0, 0, 0], sizes = [1, 16, 128], strides = [1, 1, 1]} : vector<2x16x128xf32> to vector<1x16x128xf32>
    %3 = vector.shape_cast %2 : vector<1x16x128xf32> to vector<16x128xf32>
    %cst = arith.constant dense<0.000000e+00> : vector<128xf32>
    %4 = vector.multi_reduction <add>, %3, %cst [0] : vector<16x128xf32> to vector<128xf32>
    %5 = vector.shape_cast %4 : vector<128xf32> to vector<1x128xf32>
    %6 = vector.extract_strided_slice %1 {offsets = [1, 0, 0], sizes = [1, 16, 128], strides = [1, 1, 1]} : vector<2x16x128xf32> to vector<1x16x128xf32>
    %7 = vector.shape_cast %6 : vector<1x16x128xf32> to vector<16x128xf32>
    %cst_2 = arith.constant dense<0.000000e+00> : vector<128xf32>
    %8 = vector.multi_reduction <add>, %7, %cst_2 [0] : vector<16x128xf32> to vector<128xf32>
    %9 = vector.shape_cast %8 : vector<128xf32> to vector<1x128xf32>
    %10 = tpu.concatenate %5, %9 in 0 : vector<1x128xf32>, vector<1x128xf32> -> vector<2x128xf32>
    %cst_3 = arith.constant 6.250000e-02 : f32
    %11 = vector.broadcast %cst_3 : f32 to vector<2x128xf32>
    %12 = arith.mulf %10, %11 : vector<2x128xf32>
    %c0_4 = arith.constant 0 : index
    %c0_5 = arith.constant 0 : index
    %13 = vector.load %arg1[%c0_4, %c0_5] : memref<128x8xf32, #tpu.memory_space<vmem>>, vector<128x8xf32>
    %cst_6 = arith.constant dense<0.000000e+00> : vector<2x8xf32>
    %14 = tpu.matmul %12, %13, %cst_6 {dimension_numbers = #tpu.dot_dimension_numbers<[1], [0], [0], [1], [0, 0, 1, 1], [], []>} : vector<2x128xf32>, vector<128x8xf32>, vector<2x8xf32> -> vector<2x8xf32>
    %c0_7 = arith.constant 0 : index
    %c0_8 = arith.constant 0 : index
    %15 = vector.load %arg2[%c0_7, %c0_8] : memref<1x8xf32, #tpu.memory_space<vmem>>, vector<1x8xf32>
    %16 = vector.broadcast %15 : vector<1x8xf32> to vector<2x8xf32>
    %17 = arith.addf %14, %16 : vector<2x8xf32>
    %cst_9 = arith.constant 0.000000e+00 : f32
    %18 = vector.broadcast %cst_9 : f32 to vector<2x8xf32>
    %19 = arith.maximumf %17, %18 : vector<2x8xf32>
    %c0_10 = arith.constant 0 : index
    %c0_11 = arith.constant 0 : index
    %20 = vector.load %arg3[%c0_10, %c0_11] : memref<8x128xf32, #tpu.memory_space<vmem>>, vector<8x128xf32>
    %cst_12 = arith.constant dense<0.000000e+00> : vector<2x128xf32>
    %21 = tpu.matmul %19, %20, %cst_12 {dimension_numbers = #tpu.dot_dimension_numbers<[1], [0], [0], [1], [0, 0, 1, 1], [], []>} : vector<2x8xf32>, vector<8x128xf32>, vector<2x128xf32> -> vector<2x128xf32>
    %c0_13 = arith.constant 0 : index
    %c0_14 = arith.constant 0 : index
    %22 = vector.load %arg4[%c0_13, %c0_14] : memref<1x128xf32, #tpu.memory_space<vmem>>, vector<1x128xf32>
    %23 = vector.broadcast %22 : vector<1x128xf32> to vector<2x128xf32>
    %24 = arith.addf %21, %23 : vector<2x128xf32>
    %cst_15 = arith.constant 0.000000e+00 : f32
    %25 = vector.broadcast %cst_15 : f32 to vector<2x128xf32>
    %26 = arith.subf %25, %24 : vector<2x128xf32>
    %27 = math.exp %26 : vector<2x128xf32>
    %cst_16 = arith.constant 1.000000e+00 : f32
    %28 = vector.broadcast %cst_16 : f32 to vector<2x128xf32>
    %29 = arith.addf %28, %27 : vector<2x128xf32>
    %cst_17 = arith.constant 1.000000e+00 : f32
    %30 = vector.broadcast %cst_17 : f32 to vector<2x128xf32>
    %31 = arith.divf %30, %29 : vector<2x128xf32>
    %32 = vector.extract_strided_slice %1 {offsets = [0, 0, 0], sizes = [1, 16, 128], strides = [1, 1, 1]} : vector<2x16x128xf32> to vector<1x16x128xf32>
    %33 = vector.shape_cast %32 : vector<1x16x128xf32> to vector<16x128xf32>
    %34 = vector.extract_strided_slice %31 {offsets = [0, 0], sizes = [1, 128], strides = [1, 1]} : vector<2x128xf32> to vector<1x128xf32>
    %35 = vector.broadcast %34 : vector<1x128xf32> to vector<16x128xf32>
    %36 = arith.mulf %33, %35 : vector<16x128xf32>
    %37 = arith.truncf %36 : vector<16x128xf32> to vector<16x128xbf16>
    %c0_18 = arith.constant 0 : index
    %c0_19 = arith.constant 0 : index
    %c0_20 = arith.constant 0 : index
    %38 = vector.load %arg5[%c0_18, %c0_19, %c0_20] : memref<2x16x128xbf16, #tpu.memory_space<vmem>>, vector<1x16x128xbf16>
    %39 = vector.shape_cast %38 : vector<1x16x128xbf16> to vector<16x128xbf16>
    %40 = vector.shape_cast %37 : vector<16x128xbf16> to vector<1x16x128xbf16>
    tpu.vector_store %arg5[%c0_18, %c0_19, %c0_20], %40 {strides = array<i32>} : memref<2x16x128xbf16, #tpu.memory_space<vmem>>, vector<1x16x128xbf16>,
    %41 = vector.extract_strided_slice %1 {offsets = [1, 0, 0], sizes = [1, 16, 128], strides = [1, 1, 1]} : vector<2x16x128xf32> to vector<1x16x128xf32>
    %42 = vector.shape_cast %41 : vector<1x16x128xf32> to vector<16x128xf32>
    %43 = vector.extract_strided_slice %31 {offsets = [1, 0], sizes = [1, 128], strides = [1, 1]} : vector<2x128xf32> to vector<1x128xf32>
    %44 = vector.broadcast %43 : vector<1x128xf32> to vector<16x128xf32>
    %45 = arith.mulf %42, %44 : vector<16x128xf32>
    %46 = arith.truncf %45 : vector<16x128xf32> to vector<16x128xbf16>
    %c1 = arith.constant 1 : index
    %c0_21 = arith.constant 0 : index
    %c0_22 = arith.constant 0 : index
    %47 = vector.load %arg5[%c1, %c0_21, %c0_22] : memref<2x16x128xbf16, #tpu.memory_space<vmem>>, vector<1x16x128xbf16>
    %48 = vector.shape_cast %47 : vector<1x16x128xbf16> to vector<16x128xbf16>
    %49 = vector.shape_cast %46 : vector<16x128xbf16> to vector<1x16x128xbf16>
    tpu.vector_store %arg5[%c1, %c0_21, %c0_22], %49 {strides = array<i32>} : memref<2x16x128xbf16, #tpu.memory_space<vmem>>, vector<1x16x128xbf16>,
    return
  }
}

module attributes {stable_mosaic.version = 11 : i64} {
  func.func @_attention_kernel(%arg0: i32, %arg1: memref<1x16x128xbf16, #tpu.memory_space<vmem>>, %arg2: memref<128x384xbf16, #tpu.memory_space<vmem>>, %arg3: memref<1x384xf32, #tpu.memory_space<vmem>>, %arg4: memref<1xf32, #tpu.memory_space<smem>>, %arg5: memref<1x16x128xbf16, #tpu.memory_space<vmem>>) attributes {dimension_semantics = [#tpu.dimension_semantics<parallel>], iteration_bounds = array<i64: 2>, scalar_prefetch = 0 : i64, scratch_operands = 0 : i64, tpu.core_type = #tpu.core_type<tc>, window_params = [{transform_indices = @transform_0, window_bounds = array<i64: 1, 16, 128>}, {pipeline_mode = #tpu.pipeline_mode<synchronous>, transform_indices = @transform_1, window_bounds = array<i64: 128, 384>}, {pipeline_mode = #tpu.pipeline_mode<synchronous>, transform_indices = @transform_2, window_bounds = array<i64: 1, 384>}, {transform_indices = @transform_3, window_bounds = array<i64: 1>}, {transform_indices = @transform_4, window_bounds = array<i64: 1, 16, 128>}]} {
    %c0 = arith.constant 0 : index
    %c0_0 = arith.constant 0 : index
    %c0_1 = arith.constant 0 : index
    %0 = vector.load %arg1[%c0, %c0_0, %c0_1] : memref<1x16x128xbf16, #tpu.memory_space<vmem>>, vector<1x16x128xbf16>
    %1 = vector.shape_cast %0 : vector<1x16x128xbf16> to vector<16x128xbf16>
    %c0_2 = arith.constant 0 : index
    %c0_3 = arith.constant 0 : index
    %2 = vector.load %arg2[%c0_2, %c0_3] : memref<128x384xbf16, #tpu.memory_space<vmem>>, vector<128x384xbf16>
    %cst = arith.constant dense<0.000000e+00> : vector<16x384xf32>
    %3 = tpu.matmul %1, %2, %cst {dimension_numbers = #tpu.dot_dimension_numbers<[1], [0], [0], [1], [0, 0, 1, 1], [], []>} : vector<16x128xbf16>, vector<128x384xbf16>, vector<16x384xf32> -> vector<16x384xf32>
    %c0_4 = arith.constant 0 : index
    %c0_5 = arith.constant 0 : index
    %4 = vector.load %arg3[%c0_4, %c0_5] : memref<1x384xf32, #tpu.memory_space<vmem>>, vector<1x384xf32>
    %5 = vector.broadcast %4 : vector<1x384xf32> to vector<16x384xf32>
    %6 = arith.addf %3, %5 : vector<16x384xf32>
    %7 = vector.extract_strided_slice %6 {offsets = [0, 0], sizes = [16, 128], strides = [1, 1]} : vector<16x384xf32> to vector<16x128xf32>
    %8 = arith.truncf %7 : vector<16x128xf32> to vector<16x128xbf16>
    %9 = vector.extract_strided_slice %6 {offsets = [0, 128], sizes = [16, 128], strides = [1, 1]} : vector<16x384xf32> to vector<16x128xf32>
    %10 = arith.truncf %9 : vector<16x128xf32> to vector<16x128xbf16>
    %11 = vector.extract_strided_slice %6 {offsets = [0, 256], sizes = [16, 128], strides = [1, 1]} : vector<16x384xf32> to vector<16x128xf32>
    %12 = arith.truncf %11 : vector<16x128xf32> to vector<16x128xbf16>
    %cst_6 = arith.constant dense<0.000000e+00> : vector<16x16xf32>
    %13 = tpu.matmul %8, %10, %cst_6 {dimension_numbers = #tpu.dot_dimension_numbers<[1], [1], [0], [0], [0, 0, 1, 0], [], []>} : vector<16x128xbf16>, vector<16x128xbf16>, vector<16x16xf32> -> vector<16x16xf32>
    %cst_7 = arith.constant dense<0xFF800000> : vector<16xf32>
    %14 = vector.multi_reduction <maximumf>, %13, %cst_7 [1] : vector<16x16xf32> to vector<16xf32>
    %15 = vector.shape_cast %14 : vector<16xf32> to vector<16x1xf32>
    %16 = vector.broadcast %15 : vector<16x1xf32> to vector<16x16xf32>
    %17 = arith.subf %13, %16 : vector<16x16xf32>
    %18 = math.exp %17 : vector<16x16xf32>
    %cst_8 = arith.constant dense<0.000000e+00> : vector<16xf32>
    %19 = vector.multi_reduction <add>, %18, %cst_8 [1] : vector<16x16xf32> to vector<16xf32>
    %20 = vector.shape_cast %19 : vector<16xf32> to vector<16x1xf32>
    %21 = tpu.reciprocal %20 {approx = true} : vector<16x1xf32> -> vector<16x1xf32>
    %22 = vector.broadcast %21 : vector<16x1xf32> to vector<16x16xf32>
    %23 = arith.mulf %18, %22 : vector<16x16xf32>
    %24 = arith.truncf %23 : vector<16x16xf32> to vector<16x16xbf16>
    %cst_9 = arith.constant dense<0.000000e+00> : vector<16x128xf32>
    %25 = tpu.matmul %24, %12, %cst_9 {dimension_numbers = #tpu.dot_dimension_numbers<[1], [0], [0], [1], [0, 0, 1, 1], [], []>} : vector<16x16xbf16>, vector<16x128xbf16>, vector<16x128xf32> -> vector<16x128xf32>
    %c0_10 = arith.constant 0 : index
    %26 = memref.load %arg4[%c0_10] : memref<1xf32, #tpu.memory_space<smem>>
    %27 = vector.broadcast %26 : f32 to vector<16x128xf32>
    %28 = arith.mulf %27, %25 : vector<16x128xf32>
    %29 = arith.extf %1 : vector<16x128xbf16> to vector<16x128xf32>
    %30 = arith.addf %28, %29 : vector<16x128xf32>
    %31 = arith.truncf %30 : vector<16x128xf32> to vector<16x128xbf16>
    %c0_11 = arith.constant 0 : index
    %c0_12 = arith.constant 0 : index
    %c0_13 = arith.constant 0 : index
    %32 = vector.load %arg5[%c0_11, %c0_12, %c0_13] : memref<1x16x128xbf16, #tpu.memory_space<vmem>>, vector<1x16x128xbf16>
    %33 = vector.shape_cast %32 : vector<1x16x128xbf16> to vector<16x128xbf16>
    %34 = vector.shape_cast %31 : vector<16x128xbf16> to vector<1x16x128xbf16>
    tpu.vector_store %arg5[%c0_11, %c0_12, %c0_13], %34 {strides = array<i32>} : memref<1x16x128xbf16, #tpu.memory_space<vmem>>, vector<1x16x128xbf16>,
    return
  }
  func.func @transform_0(%arg0: i32) -> (i32, i32, i32) {
    %c0_i32 = arith.constant 0 : i32
    %c0_i32_0 = arith.constant 0 : i32
    %c0_i32_1 = arith.constant 0 : i32
    return %arg0, %c0_i32, %c0_i32_0 : i32, i32, i32
  }
  func.func @transform_1(%arg0: i32) -> (i32, i32) {
    %c0_i32 = arith.constant 0 : i32
    %c0_i32_0 = arith.constant 0 : i32
    %c0_i32_1 = arith.constant 0 : i32
    return %c0_i32, %c0_i32_0 : i32, i32
  }
  func.func @transform_2(%arg0: i32) -> (i32, i32) {
    %c0_i32 = arith.constant 0 : i32
    %c0_i32_0 = arith.constant 0 : i32
    %c0_i32_1 = arith.constant 0 : i32
    return %c0_i32, %c0_i32_0 : i32, i32
  }
  func.func @transform_3(%arg0: i32) -> i32 {
    %c0_i32 = arith.constant 0 : i32
    %c0_i32_0 = arith.constant 0 : i32
    return %c0_i32 : i32
  }
  func.func @transform_4(%arg0: i32) -> (i32, i32, i32) {
    %c0_i32 = arith.constant 0 : i32
    %c0_i32_0 = arith.constant 0 : i32
    %c0_i32_1 = arith.constant 0 : i32
    return %arg0, %c0_i32, %c0_i32_0 : i32, i32, i32
  }
}

module attributes {stable_mosaic.version = 11 : i64} {
  func.func @_attention_kernel(%arg0: i32, %arg1: memref<1x64x64xbf16, #tpu.memory_space<vmem>>, %arg2: memref<64x384xbf16, #tpu.memory_space<vmem>>, %arg3: memref<1x384xf32, #tpu.memory_space<vmem>>, %arg4: memref<1xf32, #tpu.memory_space<smem>>, %arg5: memref<1x64x64xbf16, #tpu.memory_space<vmem>>) attributes {dimension_semantics = [#tpu.dimension_semantics<parallel>], iteration_bounds = array<i64: 2>, scalar_prefetch = 0 : i64, scratch_operands = 0 : i64, tpu.core_type = #tpu.core_type<tc>, window_params = [{transform_indices = @transform_0, window_bounds = array<i64: 1, 64, 64>}, {pipeline_mode = #tpu.pipeline_mode<synchronous>, transform_indices = @transform_1, window_bounds = array<i64: 64, 384>}, {pipeline_mode = #tpu.pipeline_mode<synchronous>, transform_indices = @transform_2, window_bounds = array<i64: 1, 384>}, {transform_indices = @transform_3, window_bounds = array<i64: 1>}, {transform_indices = @transform_4, window_bounds = array<i64: 1, 64, 64>}]} {
    %c0 = arith.constant 0 : index
    %c0_0 = arith.constant 0 : index
    %c0_1 = arith.constant 0 : index
    %0 = vector.load %arg1[%c0, %c0_0, %c0_1] : memref<1x64x64xbf16, #tpu.memory_space<vmem>>, vector<1x64x64xbf16>
    %1 = vector.shape_cast %0 : vector<1x64x64xbf16> to vector<64x64xbf16>
    %c0_2 = arith.constant 0 : index
    %c0_3 = arith.constant 0 : index
    %2 = vector.load %arg2[%c0_2, %c0_3] : memref<64x384xbf16, #tpu.memory_space<vmem>>, vector<64x384xbf16>
    %cst = arith.constant dense<0.000000e+00> : vector<64x384xf32>
    %3 = tpu.matmul %1, %2, %cst {dimension_numbers = #tpu.dot_dimension_numbers<[1], [0], [0], [1], [0, 0, 1, 1], [], []>} : vector<64x64xbf16>, vector<64x384xbf16>, vector<64x384xf32> -> vector<64x384xf32>
    %c0_4 = arith.constant 0 : index
    %c0_5 = arith.constant 0 : index
    %4 = vector.load %arg3[%c0_4, %c0_5] : memref<1x384xf32, #tpu.memory_space<vmem>>, vector<1x384xf32>
    %5 = vector.broadcast %4 : vector<1x384xf32> to vector<64x384xf32>
    %6 = arith.addf %3, %5 : vector<64x384xf32>
    %7 = vector.extract_strided_slice %6 {offsets = [0, 0], sizes = [64, 128], strides = [1, 1]} : vector<64x384xf32> to vector<64x128xf32>
    %8 = arith.truncf %7 : vector<64x128xf32> to vector<64x128xbf16>
    %9 = vector.extract_strided_slice %6 {offsets = [0, 128], sizes = [64, 128], strides = [1, 1]} : vector<64x384xf32> to vector<64x128xf32>
    %10 = arith.truncf %9 : vector<64x128xf32> to vector<64x128xbf16>
    %11 = vector.extract_strided_slice %6 {offsets = [0, 256], sizes = [64, 128], strides = [1, 1]} : vector<64x384xf32> to vector<64x128xf32>
    %12 = arith.truncf %11 : vector<64x128xf32> to vector<64x128xbf16>
    %cst_6 = arith.constant dense<0.000000e+00> : vector<64x64xf32>
    %13 = tpu.matmul %8, %10, %cst_6 {dimension_numbers = #tpu.dot_dimension_numbers<[1], [1], [0], [0], [0, 0, 1, 0], [], []>} : vector<64x128xbf16>, vector<64x128xbf16>, vector<64x64xf32> -> vector<64x64xf32>
    %cst_7 = arith.constant dense<0xFF800000> : vector<64xf32>
    %14 = vector.multi_reduction <maximumf>, %13, %cst_7 [1] : vector<64x64xf32> to vector<64xf32>
    %15 = vector.shape_cast %14 : vector<64xf32> to vector<64x1xf32>
    %16 = vector.broadcast %15 : vector<64x1xf32> to vector<64x64xf32>
    %17 = arith.subf %13, %16 : vector<64x64xf32>
    %18 = math.exp %17 : vector<64x64xf32>
    %cst_8 = arith.constant dense<0.000000e+00> : vector<64xf32>
    %19 = vector.multi_reduction <add>, %18, %cst_8 [1] : vector<64x64xf32> to vector<64xf32>
    %20 = vector.shape_cast %19 : vector<64xf32> to vector<64x1xf32>
    %21 = tpu.reciprocal %20 {approx = true} : vector<64x1xf32> -> vector<64x1xf32>
    %22 = vector.broadcast %21 : vector<64x1xf32> to vector<64x64xf32>
    %23 = arith.mulf %18, %22 : vector<64x64xf32>
    %24 = arith.truncf %23 : vector<64x64xf32> to vector<64x64xbf16>
    %cst_9 = arith.constant dense<0.000000e+00> : vector<64x128xf32>
    %25 = tpu.matmul %24, %12, %cst_9 {dimension_numbers = #tpu.dot_dimension_numbers<[1], [0], [0], [1], [0, 0, 1, 1], [], []>} : vector<64x64xbf16>, vector<64x128xbf16>, vector<64x128xf32> -> vector<64x128xf32>
    %c0_10 = arith.constant 0 : index
    %26 = memref.load %arg4[%c0_10] : memref<1xf32, #tpu.memory_space<smem>>
    %27 = vector.extract_strided_slice %25 {offsets = [0, 0], sizes = [64, 64], strides = [1, 1]} : vector<64x128xf32> to vector<64x64xf32>
    %28 = vector.broadcast %26 : f32 to vector<64x64xf32>
    %29 = arith.mulf %28, %27 : vector<64x64xf32>
    %30 = arith.extf %1 : vector<64x64xbf16> to vector<64x64xf32>
    %31 = arith.addf %29, %30 : vector<64x64xf32>
    %32 = arith.truncf %31 : vector<64x64xf32> to vector<64x64xbf16>
    %c0_11 = arith.constant 0 : index
    %c0_12 = arith.constant 0 : index
    %c0_13 = arith.constant 0 : index
    %33 = vector.load %arg5[%c0_11, %c0_12, %c0_13] : memref<1x64x64xbf16, #tpu.memory_space<vmem>>, vector<1x64x64xbf16>
    %34 = vector.shape_cast %33 : vector<1x64x64xbf16> to vector<64x64xbf16>
    %35 = vector.shape_cast %32 : vector<64x64xbf16> to vector<1x64x64xbf16>
    tpu.vector_store %arg5[%c0_11, %c0_12, %c0_13], %35 {strides = array<i32>} : memref<1x64x64xbf16, #tpu.memory_space<vmem>>, vector<1x64x64xbf16>,
    return
  }
  func.func @transform_0(%arg0: i32) -> (i32, i32, i32) {
    %c0_i32 = arith.constant 0 : i32
    %c0_i32_0 = arith.constant 0 : i32
    %c0_i32_1 = arith.constant 0 : i32
    return %arg0, %c0_i32, %c0_i32_0 : i32, i32, i32
  }
  func.func @transform_1(%arg0: i32) -> (i32, i32) {
    %c0_i32 = arith.constant 0 : i32
    %c0_i32_0 = arith.constant 0 : i32
    %c0_i32_1 = arith.constant 0 : i32
    return %c0_i32, %c0_i32_0 : i32, i32
  }
  func.func @transform_2(%arg0: i32) -> (i32, i32) {
    %c0_i32 = arith.constant 0 : i32
    %c0_i32_0 = arith.constant 0 : i32
    %c0_i32_1 = arith.constant 0 : i32
    return %c0_i32, %c0_i32_0 : i32, i32
  }
  func.func @transform_3(%arg0: i32) -> i32 {
    %c0_i32 = arith.constant 0 : i32
    %c0_i32_0 = arith.constant 0 : i32
    return %c0_i32 : i32
  }
  func.func @transform_4(%arg0: i32) -> (i32, i32, i32) {
    %c0_i32 = arith.constant 0 : i32
    %c0_i32_0 = arith.constant 0 : i32
    %c0_i32_1 = arith.constant 0 : i32
    return %arg0, %c0_i32, %c0_i32_0 : i32, i32, i32
  }
}

module attributes {stable_mosaic.version = 11 : i64} {
  func.func @_attention_kernel(%arg0: i32, %arg1: memref<1x256x32xbf16, #tpu.memory_space<vmem>>, %arg2: memref<32x384xbf16, #tpu.memory_space<vmem>>, %arg3: memref<1x384xf32, #tpu.memory_space<vmem>>, %arg4: memref<1xf32, #tpu.memory_space<smem>>, %arg5: memref<1x256x32xbf16, #tpu.memory_space<vmem>>) attributes {dimension_semantics = [#tpu.dimension_semantics<parallel>], iteration_bounds = array<i64: 2>, scalar_prefetch = 0 : i64, scratch_operands = 0 : i64, tpu.core_type = #tpu.core_type<tc>, window_params = [{transform_indices = @transform_0, window_bounds = array<i64: 1, 256, 32>}, {pipeline_mode = #tpu.pipeline_mode<synchronous>, transform_indices = @transform_1, window_bounds = array<i64: 32, 384>}, {pipeline_mode = #tpu.pipeline_mode<synchronous>, transform_indices = @transform_2, window_bounds = array<i64: 1, 384>}, {transform_indices = @transform_3, window_bounds = array<i64: 1>}, {transform_indices = @transform_4, window_bounds = array<i64: 1, 256, 32>}]} {
    %c0 = arith.constant 0 : index
    %c0_0 = arith.constant 0 : index
    %c0_1 = arith.constant 0 : index
    %0 = vector.load %arg1[%c0, %c0_0, %c0_1] : memref<1x256x32xbf16, #tpu.memory_space<vmem>>, vector<1x256x32xbf16>
    %1 = vector.shape_cast %0 : vector<1x256x32xbf16> to vector<256x32xbf16>
    %c0_2 = arith.constant 0 : index
    %c0_3 = arith.constant 0 : index
    %2 = vector.load %arg2[%c0_2, %c0_3] : memref<32x384xbf16, #tpu.memory_space<vmem>>, vector<32x384xbf16>
    %cst = arith.constant dense<0.000000e+00> : vector<256x384xf32>
    %3 = tpu.matmul %1, %2, %cst {dimension_numbers = #tpu.dot_dimension_numbers<[1], [0], [0], [1], [0, 0, 1, 1], [], []>} : vector<256x32xbf16>, vector<32x384xbf16>, vector<256x384xf32> -> vector<256x384xf32>
    %c0_4 = arith.constant 0 : index
    %c0_5 = arith.constant 0 : index
    %4 = vector.load %arg3[%c0_4, %c0_5] : memref<1x384xf32, #tpu.memory_space<vmem>>, vector<1x384xf32>
    %5 = vector.broadcast %4 : vector<1x384xf32> to vector<256x384xf32>
    %6 = arith.addf %3, %5 : vector<256x384xf32>
    %7 = vector.extract_strided_slice %6 {offsets = [0, 0], sizes = [256, 128], strides = [1, 1]} : vector<256x384xf32> to vector<256x128xf32>
    %8 = arith.truncf %7 : vector<256x128xf32> to vector<256x128xbf16>
    %9 = vector.extract_strided_slice %6 {offsets = [0, 128], sizes = [256, 128], strides = [1, 1]} : vector<256x384xf32> to vector<256x128xf32>
    %10 = arith.truncf %9 : vector<256x128xf32> to vector<256x128xbf16>
    %11 = vector.extract_strided_slice %6 {offsets = [0, 256], sizes = [256, 128], strides = [1, 1]} : vector<256x384xf32> to vector<256x128xf32>
    %12 = arith.truncf %11 : vector<256x128xf32> to vector<256x128xbf16>
    %cst_6 = arith.constant dense<0.000000e+00> : vector<256x256xf32>
    %13 = tpu.matmul %8, %10, %cst_6 {dimension_numbers = #tpu.dot_dimension_numbers<[1], [1], [0], [0], [0, 0, 1, 0], [], []>} : vector<256x128xbf16>, vector<256x128xbf16>, vector<256x256xf32> -> vector<256x256xf32>
    %cst_7 = arith.constant dense<0xFF800000> : vector<256xf32>
    %14 = vector.multi_reduction <maximumf>, %13, %cst_7 [1] : vector<256x256xf32> to vector<256xf32>
    %15 = vector.shape_cast %14 : vector<256xf32> to vector<256x1xf32>
    %16 = vector.broadcast %15 : vector<256x1xf32> to vector<256x256xf32>
    %17 = arith.subf %13, %16 : vector<256x256xf32>
    %18 = math.exp %17 : vector<256x256xf32>
    %cst_8 = arith.constant dense<0.000000e+00> : vector<256xf32>
    %19 = vector.multi_reduction <add>, %18, %cst_8 [1] : vector<256x256xf32> to vector<256xf32>
    %20 = vector.shape_cast %19 : vector<256xf32> to vector<256x1xf32>
    %21 = tpu.reciprocal %20 {approx = true} : vector<256x1xf32> -> vector<256x1xf32>
    %22 = vector.broadcast %21 : vector<256x1xf32> to vector<256x256xf32>
    %23 = arith.mulf %18, %22 : vector<256x256xf32>
    %24 = arith.truncf %23 : vector<256x256xf32> to vector<256x256xbf16>
    %cst_9 = arith.constant dense<0.000000e+00> : vector<256x128xf32>
    %25 = tpu.matmul %24, %12, %cst_9 {dimension_numbers = #tpu.dot_dimension_numbers<[1], [0], [0], [1], [0, 0, 1, 1], [], []>} : vector<256x256xbf16>, vector<256x128xbf16>, vector<256x128xf32> -> vector<256x128xf32>
    %c0_10 = arith.constant 0 : index
    %26 = memref.load %arg4[%c0_10] : memref<1xf32, #tpu.memory_space<smem>>
    %27 = vector.extract_strided_slice %25 {offsets = [0, 0], sizes = [256, 32], strides = [1, 1]} : vector<256x128xf32> to vector<256x32xf32>
    %28 = vector.broadcast %26 : f32 to vector<256x32xf32>
    %29 = arith.mulf %28, %27 : vector<256x32xf32>
    %30 = arith.extf %1 : vector<256x32xbf16> to vector<256x32xf32>
    %31 = arith.addf %29, %30 : vector<256x32xf32>
    %32 = arith.truncf %31 : vector<256x32xf32> to vector<256x32xbf16>
    %c0_11 = arith.constant 0 : index
    %c0_12 = arith.constant 0 : index
    %c0_13 = arith.constant 0 : index
    %33 = vector.load %arg5[%c0_11, %c0_12, %c0_13] : memref<1x256x32xbf16, #tpu.memory_space<vmem>>, vector<1x256x32xbf16>
    %34 = vector.shape_cast %33 : vector<1x256x32xbf16> to vector<256x32xbf16>
    %35 = vector.shape_cast %32 : vector<256x32xbf16> to vector<1x256x32xbf16>
    tpu.vector_store %arg5[%c0_11, %c0_12, %c0_13], %35 {strides = array<i32>} : memref<1x256x32xbf16, #tpu.memory_space<vmem>>, vector<1x256x32xbf16>,
    return
  }
  func.func @transform_0(%arg0: i32) -> (i32, i32, i32) {
    %c0_i32 = arith.constant 0 : i32
    %c0_i32_0 = arith.constant 0 : i32
    %c0_i32_1 = arith.constant 0 : i32
    return %arg0, %c0_i32, %c0_i32_0 : i32, i32, i32
  }
  func.func @transform_1(%arg0: i32) -> (i32, i32) {
    %c0_i32 = arith.constant 0 : i32
    %c0_i32_0 = arith.constant 0 : i32
    %c0_i32_1 = arith.constant 0 : i32
    return %c0_i32, %c0_i32_0 : i32, i32
  }
  func.func @transform_2(%arg0: i32) -> (i32, i32) {
    %c0_i32 = arith.constant 0 : i32
    %c0_i32_0 = arith.constant 0 : i32
    %c0_i32_1 = arith.constant 0 : i32
    return %c0_i32, %c0_i32_0 : i32, i32
  }
  func.func @transform_3(%arg0: i32) -> i32 {
    %c0_i32 = arith.constant 0 : i32
    %c0_i32_0 = arith.constant 0 : i32
    return %c0_i32 : i32
  }
  func.func @transform_4(%arg0: i32) -> (i32, i32, i32) {
    %c0_i32 = arith.constant 0 : i32
    %c0_i32_0 = arith.constant 0 : i32
    %c0_i32_1 = arith.constant 0 : i32
    return %arg0, %c0_i32, %c0_i32_0 : i32, i32, i32
  }
}

module attributes {stable_mosaic.version = 11 : i64} {
  func.func @_tanh_kernel(%arg0: i32, %arg1: memref<16x128xbf16, #tpu.memory_space<vmem>>, %arg2: memref<16x128xbf16, #tpu.memory_space<vmem>>) attributes {dimension_semantics = [#tpu.dimension_semantics<parallel>], iteration_bounds = array<i64: 1>, scalar_prefetch = 0 : i64, scratch_operands = 0 : i64, tpu.core_type = #tpu.core_type<tc>, window_params = [{transform_indices = @transform_0, window_bounds = array<i64: 16, 128>}, {transform_indices = @transform_1, window_bounds = array<i64: 16, 128>}]} {
    %c0 = arith.constant 0 : index
    %c0_0 = arith.constant 0 : index
    %0 = vector.load %arg1[%c0, %c0_0] : memref<16x128xbf16, #tpu.memory_space<vmem>>, vector<16x128xbf16>
    %1 = arith.extf %0 : vector<16x128xbf16> to vector<16x128xf32>
    %2 = math.tanh %1 : vector<16x128xf32>
    %3 = arith.truncf %2 : vector<16x128xf32> to vector<16x128xbf16>
    %c0_1 = arith.constant 0 : index
    %c0_2 = arith.constant 0 : index
    %4 = vector.load %arg2[%c0_1, %c0_2] : memref<16x128xbf16, #tpu.memory_space<vmem>>, vector<16x128xbf16>
    tpu.vector_store %arg2[%c0_1, %c0_2], %3 {strides = array<i32>} : memref<16x128xbf16, #tpu.memory_space<vmem>>, vector<16x128xbf16>,
    return
  }
  func.func @transform_0(%arg0: i32) -> (i32, i32) {
    %c0_i32 = arith.constant 0 : i32
    %c0_i32_0 = arith.constant 0 : i32
    return %arg0, %c0_i32 : i32, i32
  }
  func.func @transform_1(%arg0: i32) -> (i32, i32) {
    %c0_i32 = arith.constant 0 : i32
    %c0_i32_0 = arith.constant 0 : i32
    return %arg0, %c0_i32 : i32, i32
  }
}

</mosaic_0001>

<bundles_post_ra>
// kernel: netg_fwd.10
= control target key start
LH: loop header
LB: loop body
LE: loop exit
PB: predicated region body
PF: predicated region fallthrough
CT: control target
= control target key end

     0   :  { %v1218_v0 = vmov 0.0   ;;  %vm1219_vm0 = vmmov 0   ;;  %vm148_vm1 = vcmask 261120   ;;  %vm287_vm2 = vcmask 1040384   ;;  %s2202_s1 = inlined_call_operand.vmem [shape: f32[32,2], index: 1, kind: input, shape index: {}]   ;;  %s2203_s0 = inlined_call_operand.vmem [shape: bf16[2,256,32], index: 0, kind: input, shape index: {}]   ;;  %s2204_s3 = inlined_call_operand.vmem [shape: f32[2,32], index: 3, kind: input, shape index: {}]   ;;  %s2205_s2 = inlined_call_operand.vmem [shape: f32[1,2], index: 2, kind: input, shape index: {}]   ;;  %s2206_s4 = inlined_call_operand.vmem [shape: f32[1,32], index: 4, kind: input, shape index: {}]   ;;  %s2207_s5 = inlined_call_operand.vmem [shape: bf16[2,256,32], index: 5, kind: output, shape index: {}]  }
   0x1   :  { %1196 = vmatprep.subr.mxu0 %v1218_v0  ;;  %v293_v1 = vld [vmem:[%s2202_s1 + $0x18] sm:$0xff]  ;;  %v292_v2 = vld [vmem:[%s2202_s1 + $0x10] sm:$0xff]  ;;  %1204 = vmatprep.mubr.msk.f32.mxu0 %vm1219_vm0, %v1218_v0  ;;  %v291_v3 = vld [vmem:[%s2202_s1 + $0x8] sm:$0xff]  ;;  %vm387_vm3 = vcmask 1041408   ;;  %vm383_vm4 = vcmask 15360   ;;  %vm631_vm5 = vcmask 257024  }
   0x2   :  { %1197 = vmatpush3.msra.mxu0 %v293_v1  ;;  %1207 = vmatprep.subr.mxu1 %v1218_v0  ;;  %v290_v4 = vld [vmem:[%s2202_s1] sm:$0xff]  ;;  %v1270_v6 = vld [vmem:[%s2203_s0 + $0x8] sm:$0xff]   ;;  %v1278_v10 = vld [vmem:[%s2203_s0 + $0x10] sm:$0xff]  }
   0x3   :  { %1198 = vmatprep.subr.mxu0 %v1218_v0  ;;  %1209 = vmatprep.mubr.msk.f32.mxu1 %vm1219_vm0, %v1218_v0  ;;  %v1265_v5 = vld [vmem:[%s2203_s0] sm:$0xff]   ;;  %v1036_v9 = vunpack.c.l.bf16 %v1270_v6  ;;  %v1037_v11 = vunpack.c.h.bf16 %v1270_v6  ;;  %v1040_v12 = vunpack.c.l.bf16 %v1278_v10  ;;  %v1294_v16 = vld [vmem:[%s2203_s0 + $0x18] sm:$0xff]   ;;  %v1041_v18 = vunpack.c.h.bf16 %v1278_v10  ;;  %v1305_v20 = vld [vmem:[%s2203_s0 + $0x88] sm:$0xff]  }
   0x4   :  { %1199 = vmatpush3.msra.mxu0 %v292_v2  ;;  %v1032_v7 = vunpack.c.l.bf16 %v1265_v5  ;;  %v1033_v8 = vunpack.c.h.bf16 %v1265_v5  ;;  %v1300_v19 = vld [vmem:[%s2203_s0 + $0x80] sm:$0xff]   ;;  %v1044_v23 = vunpack.c.l.bf16 %v1294_v16  ;;  %v2221_v28 = vunpack.c.l.bf16 %v1305_v20  ;;  %v1325_v29 = vld [vmem:[%s2203_s0 + $0x90] sm:$0xff]   ;;  %v1340_v38 = vld [vmem:[%s2203_s0 + $0x28] sm:$0xff]  }
   0x5   :  { %1200 = vmatprep.subr.mxu0 %v1218_v0  ;;  %v152_v15 = vsel %vm148_vm1, %v1036_v9, 0.0  ;;  %v154_v21 = vsel %vm148_vm1, %v1037_v11, 0.0  ;;  %v156_v24 = vsel %vm148_vm1, %v1040_v12, 0.0  ;;  %v1317_v25 = vld [vmem:[%s2203_s0 + $0x20] sm:$0xff]   ;;  %v2224_v26 = vunpack.c.l.bf16 %v1300_v19  ;;  %v1355_v44 = vld [vmem:[%s2203_s0 + $0x98] sm:$0xff]   ;;  %v1371_v53 = vld [vmem:[%s2203_s0 + $0x30] sm:$0xff]  }
   0x6   :  { %1201 = vmatpush3.msra.mxu0 %v291_v3  ;;  %v149_v13 = vsel %vm148_vm1, %v1032_v7, 0.0  ;;  %v150_v14 = vsel %vm148_vm1, %v1033_v8, 0.0  ;;  %v2223_v27 = vunpack.c.h.bf16 %v1300_v19  ;;  %v1045_v31 = vunpack.c.h.bf16 %v1294_v16  ;;  %v1381_v58 = vld [vmem:[%s2203_s0 + $0xa0] sm:$0xff]   ;;  %v1397_v3 = vld [vmem:[%s2203_s0 + $0x38] sm:$0xff]  }
   0x7   :  { %1202 = vmatprep.subr.mxu0 %v1218_v0  ;;  %v151_v17 = vadd.f32 %v150_v14, %v149_v13  ;;  %v158_v32 = vsel %vm148_vm1, %v1041_v18, 0.0  ;;  %v2220_v33 = vunpack.c.h.bf16 %v1305_v20  ;;  %v1048_v35 = vunpack.c.l.bf16 %v1317_v25 }
   0x8   :  { %1203 = vmatpush3.msra.mxu0 %v290_v4  ;;  %v2218_v36 = vunpack.c.l.bf16 %v1325_v29  ;;  %v160_v37 = vsel %vm148_vm1, %v1044_v23, 0.0  ;;  %v218_v40 = vsel %vm148_vm1, %v2224_v26, 0.0  ;;  %v219_v41 = vsel %vm148_vm1, %v2223_v27, 0.0  ;;  %v1553_v26 = vld [vmem:[%s2203_s0 + $0x68] sm:$0xff]  }
   0x9   :  { %v153_v22 = vadd.f32 %v152_v15, %v151_v17  ;;  %v221_v42 = vsel %vm148_vm1, %v2221_v28, 0.0  ;;  %v1049_v43 = vunpack.c.h.bf16 %v1317_v25  ;;  %v162_v45 = vsel %vm148_vm1, %v1045_v31, 0.0  ;;  %v1407_v17 = vld [vmem:[%s2203_s0 + $0xa8] sm:$0xff]  }
   0xa   :  { %v220_v46 = vadd.f32 %v219_v41, %v218_v40  ;;  %v2217_v47 = vunpack.c.h.bf16 %v1325_v29  ;;  %v223_v49 = vsel %vm148_vm1, %v2220_v33, 0.0  ;;  %v1052_v50 = vunpack.c.l.bf16 %v1340_v38  ;;  %v1423_v40 = vld [vmem:[%s2203_s0 + $0x40] sm:$0xff]  }
   0xb   :  { %v155_v30 = vadd.f32 %v154_v21, %v153_v22  ;;  %v164_v51 = vsel %vm148_vm1, %v1048_v35, 0.0  ;;  %v2215_v54 = vunpack.c.l.bf16 %v1355_v44  ;;  %v225_v56 = vsel %vm148_vm1, %v2218_v36, 0.0  ;;  %v1527_v36 = vld [vmem:[%s2203_s0 + $0x60] sm:$0xff]  }
   0xc   :  { %v222_v52 = vadd.f32 %v221_v42, %v220_v46  ;;  %v2257_v57 = vunpack.c.h.bf16 %v1340_v38  ;;  %v166_v59 = vsel %vm148_vm1, %v1049_v43, 0.0  ;;  %v2214_v61 = vunpack.c.h.bf16 %v1355_v44 }
   0xd   :  { %v157_v34 = vadd.f32 %v156_v24, %v155_v30  ;;  %v227_v63 = vsel %vm148_vm1, %v2217_v47, 0.0  ;;  %v2256_v0 = vunpack.c.l.bf16 %v1371_v53  ;;  %v168_v1 = vsel %vm148_vm1, %v1052_v50, 0.0 }
   0xe   :  { %v224_v60 = vadd.f32 %v223_v49, %v222_v52  ;;  %v2212_v4 = vunpack.c.l.bf16 %v1381_v58  ;;  %v229_v14 = vsel %vm148_vm1, %v2215_v54, 0.0  ;;  %v2252_v15 = vunpack.c.h.bf16 %v1371_v53 }
   0xf   :  { %v159_v39 = vadd.f32 %v158_v32, %v157_v34  ;;  %v170_v21 = vsel %vm148_vm1, %v2257_v57, 0.0  ;;  %v2211_v24 = vunpack.c.h.bf16 %v1381_v58  ;;  %v231_v32 = vsel %vm148_vm1, %v2214_v61, 0.0 }
  0x10   :  { %v226_v2 = vadd.f32 %v225_v56, %v224_v60  ;;  %v2243_v34 = vunpack.c.l.bf16 %v1397_v3  ;;  %v2209_v41 = vunpack.c.l.bf16 %v1407_v17  ;;  %v2242_v46 = vunpack.c.h.bf16 %v1397_v3 }
  0x11   :  { %v161_v48 = vadd.f32 %v160_v37, %v159_v39  ;;  %v172_v37 = vsel %vm148_vm1, %v2256_v0, 0.0  ;;  %v174_v49 = vsel %vm148_vm1, %v2252_v15, 0.0  ;;  %v2208_v52 = vunpack.c.h.bf16 %v1407_v17 }
  0x12   :  { %v228_v22 = vadd.f32 %v227_v63, %v226_v2  ;;  %v235_v56 = vsel %vm148_vm1, %v2211_v24, 0.0  ;;  %v176_v60 = vsel %vm148_vm1, %v2243_v34, 0.0  ;;  %v1449_v63 = vld [vmem:[%s2203_s0 + $0x48] sm:$0xff]   ;;  %v2265_v10 = vunpack.c.l.bf16 %v1371_v53 }
  0x13   :  { %v163_v55 = vadd.f32 %v162_v45, %v161_v48  ;;  %v233_v45 = vsel %vm148_vm1, %v2212_v4, 0.0  ;;  %v1433_v48 = vld [vmem:[%s2203_s0 + $0xb0] sm:$0xff]   ;;  %v1501_v4 = vld [vmem:[%s2203_s0 + $0x58] sm:$0xff]   ;;  %v2267_v16 = vunpack.c.l.bf16 %v1397_v3  ;;  %v2269_v25 = vunpack.c.l.bf16 %v1423_v40 }
  0x14   :  { %v230_v39 = vadd.f32 %v229_v14, %v228_v22  ;;  %v2236_v14 = vunpack.c.h.bf16 %v1423_v40  ;;  %v178_v22 = vsel %vm148_vm1, %v2242_v46, 0.0 }
  0x15   :  { %v165_v62 = vadd.f32 %v164_v51, %v163_v55 }
  0x16   :  { %v232_v51 = vadd.f32 %v231_v32, %v230_v39  ;;  %v2213_v32 = vunpack.c.h.bf16 %v1433_v48  ;;  %v239_v39 = vsel %vm148_vm1, %v2208_v52, 0.0 }
  0x17   :  { %v167_v13 = vadd.f32 %v166_v59, %v165_v62  ;;  %v2241_v59 = vunpack.c.l.bf16 %v1423_v40 }
  0x18   :  { %v234_v62 = vadd.f32 %v233_v45, %v232_v51  ;;  %v1475_v51 = vld [vmem:[%s2203_s0 + $0x50] sm:$0xff]  }
  0x19   :  { %v169_v30 = vadd.f32 %v168_v1, %v167_v13  ;;  %v2210_v1 = vunpack.c.l.bf16 %v1433_v48  ;;  %v237_v13 = vsel %vm148_vm1, %v2209_v41, 0.0  ;;  %v180_v45 = vsel %vm148_vm1, %v2241_v59, 0.0 }
  0x1b   :  { %v171_v42 = vadd.f32 %v170_v21, %v169_v30  ;;  %v1459_v21 = vld [vmem:[%s2203_s0 + $0xb8] sm:$0xff]   ;;  %v236_v30 = vadd.f32 %v235_v56, %v234_v62  ;;  %v2230_v62 = vunpack.c.h.bf16 %v1449_v63 }
  0x1c   :  { %v2219_v52 = vunpack.c.h.bf16 %v1459_v21 }
  0x1d   :  { %v173_v55 = vadd.f32 %v172_v37, %v171_v42  ;;  %v2235_v42 = vunpack.c.l.bf16 %v1449_v63 }
  0x1f   :  { %v175_v2 = vadd.f32 %v174_v49, %v173_v55  ;;  %v238_v49 = vadd.f32 %v237_v13, %v236_v30  ;;  %v2216_v55 = vunpack.c.l.bf16 %v1459_v21  ;;  %v182_v13 = vsel %vm148_vm1, %v2236_v14, 0.0  ;;  %v1605_v14 = vld [vmem:[%s2203_s0 + $0x78] sm:$0xff]  }
  0x21   :  { %v177_v37 = vadd.f32 %v176_v60, %v175_v2  ;;  %v241_v60 = vsel %vm148_vm1, %v2210_v1, 0.0  ;;  %v1485_v2 = vld [vmem:[%s2203_s0 + $0xc0] sm:$0xff]   ;;  %v240_v30 = vadd.f32 %v239_v39, %v238_v49  ;;  %v184_v1 = vsel %vm148_vm1, %v2235_v42, 0.0 }
  0x22   :  { %v2222_v39 = vunpack.c.l.bf16 %v1485_v2  ;;  %v2225_v61 = vunpack.c.h.bf16 %v1485_v2 }
  0x23   :  { %v179_v56 = vadd.f32 %v178_v22, %v177_v37  ;;  %v243_v22 = vsel %vm148_vm1, %v2213_v32, 0.0  ;;  %v2229_v37 = vunpack.c.l.bf16 %v1475_v51  ;;  %v242_v24 = vadd.f32 %v241_v60, %v240_v30  ;;  %v1511_v32 = vld [vmem:[%s2203_s0 + $0xc8] sm:$0xff]  }
  0x24   :  { %v186_v60 = vsel %vm148_vm1, %v2230_v62, 0.0  ;;  %v2231_v33 = vunpack.c.h.bf16 %v1511_v32  ;;  %v1579_v62 = vld [vmem:[%s2203_s0 + $0x70] sm:$0xff]  }
  0x25   :  { %v181_v41 = vadd.f32 %v180_v45, %v179_v56  ;;  %v245_v45 = vsel %vm148_vm1, %v2216_v55, 0.0  ;;  %v2227_v56 = vunpack.c.h.bf16 %v1475_v51  ;;  %v244_v30 = vadd.f32 %v243_v22, %v242_v24 }
  0x26   :  { %v188_v55 = vsel %vm148_vm1, %v2229_v37, 0.0  ;;  %v2228_v24 = vunpack.c.l.bf16 %v1511_v32 }
  0x27   :  { %v183_v49 = vadd.f32 %v182_v13, %v181_v41  ;;  %v247_v41 = vsel %vm148_vm1, %v2219_v52, 0.0  ;;  %v2226_v13 = vunpack.c.l.bf16 %v1501_v4  ;;  %v246_v47 = vadd.f32 %v245_v45, %v244_v30  ;;  %v1537_v52 = vld [vmem:[%s2203_s0 + $0xd0] sm:$0xff]  }
  0x28   :  { %v190_v45 = vsel %vm148_vm1, %v2227_v56, 0.0 }
  0x29   :  { %v185_v54 = vadd.f32 %v184_v1, %v183_v49  ;;  %v249_v1 = vsel %vm148_vm1, %v2222_v39, 0.0  ;;  %v2233_v49 = vunpack.c.h.bf16 %v1501_v4  ;;  %v248_v30 = vadd.f32 %v247_v41, %v246_v47 }
  0x2a   :  { %v192_v39 = vsel %vm148_vm1, %v2226_v13, 0.0  ;;  %v2234_v47 = vunpack.c.l.bf16 %v1537_v52  ;;  %v2237_v13 = vunpack.c.h.bf16 %v1537_v52 }
  0x2b   :  { %v187_v22 = vadd.f32 %v186_v60, %v185_v54  ;;  %v251_v54 = vsel %vm148_vm1, %v2225_v61, 0.0  ;;  %v2232_v60 = vunpack.c.l.bf16 %v1527_v36  ;;  %v250_v27 = vadd.f32 %v249_v1, %v248_v30  ;;  %v1563_v61 = vld [vmem:[%s2203_s0 + $0xd8] sm:$0xff]  }
  0x2c   :  { %v194_v1 = vsel %vm148_vm1, %v2233_v49, 0.0 }
  0x2d   :  { %v189_v28 = vadd.f32 %v188_v55, %v187_v22  ;;  %v253_v55 = vsel %vm148_vm1, %v2228_v24, 0.0  ;;  %v2239_v22 = vunpack.c.h.bf16 %v1527_v36  ;;  %v252_v30 = vadd.f32 %v251_v54, %v250_v27 }
  0x2e   :  { %v196_v24 = vsel %vm148_vm1, %v2232_v60, 0.0  ;;  %v2240_v27 = vunpack.c.l.bf16 %v1563_v61  ;;  %v2244_v60 = vunpack.c.h.bf16 %v1563_v61 }
  0x2f   :  { %v191_v41 = vadd.f32 %v190_v45, %v189_v28  ;;  %v255_v28 = vsel %vm148_vm1, %v2231_v33, 0.0  ;;  %v2238_v45 = vunpack.c.l.bf16 %v1553_v26  ;;  %v254_v37 = vadd.f32 %v253_v55, %v252_v30  ;;  %v1589_v33 = vld [vmem:[%s2203_s0 + $0xe0] sm:$0xff]  }
  0x30   :  { %v198_v55 = vsel %vm148_vm1, %v2239_v22, 0.0 }
  0x31   :  { %v193_v56 = vadd.f32 %v192_v39, %v191_v41  ;;  %v257_v39 = vsel %vm148_vm1, %v2234_v47, 0.0  ;;  %v2247_v41 = vunpack.c.h.bf16 %v1553_v26  ;;  %v256_v30 = vadd.f32 %v255_v28, %v254_v37 }
  0x32   :  { %v200_v47 = vsel %vm148_vm1, %v2238_v45, 0.0  ;;  %v2245_v37 = vunpack.c.l.bf16 %v1589_v33  ;;  %v2250_v45 = vunpack.c.h.bf16 %v1589_v33 }
  0x33   :  { %v195_v54 = vadd.f32 %v194_v1, %v193_v56  ;;  %v259_v56 = vsel %vm148_vm1, %v2237_v13, 0.0  ;;  %v2246_v1 = vunpack.c.l.bf16 %v1579_v62  ;;  %v258_v42 = vadd.f32 %v257_v39, %v256_v30  ;;  %v1615_v13 = vld [vmem:[%s2203_s0 + $0xe8] sm:$0xff]  }
  0x34   :  { %v202_v39 = vsel %vm148_vm1, %v2247_v41, 0.0  ;;  %v2249_v46 = vunpack.c.l.bf16 %v1615_v13 }
  0x35   :  { %v197_v49 = vadd.f32 %v196_v24, %v195_v54  ;;  %v261_v24 = vsel %vm148_vm1, %v2240_v27, 0.0  ;;  %v2248_v54 = vunpack.c.h.bf16 %v1579_v62  ;;  %v260_v30 = vadd.f32 %v259_v56, %v258_v42  ;;  %v1636_v56 = vld [vmem:[%s2203_s0 + $0xf0] sm:$0xff]  }
  0x36   :  { %v204_v27 = vsel %vm148_vm1, %v2246_v1, 0.0  ;;  %v265_v42 = vsel %vm148_vm1, %v2245_v37, 0.0  ;;  %v2254_v1 = vunpack.c.l.bf16 %v1636_v56 }
  0x37   :  { %v199_v28 = vadd.f32 %v198_v55, %v197_v49  ;;  %v263_v49 = vsel %vm148_vm1, %v2244_v60, 0.0  ;;  %v2251_v55 = vunpack.c.l.bf16 %v1605_v14  ;;  %v262_v59 = vadd.f32 %v261_v24, %v260_v30 }
  0x38   :  { %v2255_v24 = vunpack.c.h.bf16 %v1615_v13 }
  0x39   :  { %v201_v22 = vadd.f32 %v200_v47, %v199_v28  ;;  %v2253_v47 = vunpack.c.h.bf16 %v1605_v14  ;;  %v206_v28 = vsel %vm148_vm1, %v2248_v54, 0.0  ;;  %v264_v60 = vadd.f32 %v263_v49, %v262_v59 }
  0x3a   :  { %v269_v54 = vsel %vm148_vm1, %v2249_v46, 0.0  ;;  %v2258_v49 = vunpack.c.h.bf16 %v1636_v56 }
  0x3b   :  { %v203_v34 = vadd.f32 %v202_v39, %v201_v22  ;;  %v267_v22 = vsel %vm148_vm1, %v2250_v45, 0.0  ;;  %v208_v39 = vsel %vm148_vm1, %v2251_v55, 0.0  ;;  %v266_v37 = vadd.f32 %v265_v42, %v264_v60 }
  0x3c   :  { %v210_v59 = vsel %vm148_vm1, %v2253_v47, 0.0  ;;  %v271_v42 = vsel %vm148_vm1, %v2255_v24, 0.0  ;;  %v273_v45 = vsel %vm148_vm1, %v2254_v1, 0.0 }
  0x3d   :  { %v205_v30 = vadd.f32 %v204_v27, %v203_v34  ;;  %v1655_v34 = vld [vmem:[%s2203_s0 + $0xf8] sm:$0xff]   ;;  %v268_v27 = vadd.f32 %v267_v22, %v266_v37 }
  0x3e   :  { %2263 = vst [vmem:[#allocation2_spill] sm:$0xff] %v1655_v34  ;;  %v2260_v15 = vunpack.c.h.bf16 %v1655_v34 }
  0x3f   :  { %v207_v41 = vadd.f32 %v206_v28, %v205_v30  ;;  %v270_v28 = vadd.f32 %v269_v54, %v268_v27  ;;  %v2259_v30 = vunpack.c.l.bf16 %v1655_v34 }
  0x41   :  { %v209_v60 = vadd.f32 %v208_v39, %v207_v41  ;;  %v272_v55 = vadd.f32 %v271_v42, %v270_v28  ;;  %v275_v41 = vsel %vm148_vm1, %v2258_v49, 0.0  ;;  %v277_v54 = vsel %vm148_vm1, %v2259_v30, 0.0 }
  0x43   :  { %v211_v46 = vadd.f32 %v210_v59, %v209_v60  ;;  %v274_v37 = vadd.f32 %v273_v45, %v272_v55  ;;  %v279_v59 = vsel %vm148_vm1, %v2260_v15, 0.0 }
  0x45   :  { %v212_v47 = vrot.slane %v211_v46, 4  ;;  %v276_v39 = vadd.f32 %v275_v41, %v274_v37  ;;  %v375_v41 = vld [vmem:[%s2204_s3] sm:$0x3] }
  0x46   :  { %1208 = vmatpush3.msk.msra.mxu1 %vm387_vm3, %v375_v41 }
  0x47   :  { %v213_v22 = vadd.f32 %v212_v47, %v211_v46  ;;  %v278_v60 = vadd.f32 %v277_v54, %v276_v39 }
  0x49   :  { %v214_v27 = vrot.slane %v213_v22, 2  ;;  %v280_v42 = vadd.f32 %v279_v59, %v278_v60 }
  0x4b   :  { %v215_v28 = vadd.f32 %v214_v27, %v213_v22  ;;  %v281_v1 = vrot.slane %v280_v42, 4 }
  0x4d   :  { %v282_v24 = vadd.f32 %v281_v1, %v280_v42  ;;  %v216_v0 = vrot.slane %v215_v28, 1  ;;  %v865_v1 = vld [vmem:[%s2205_s2] ss:$0 sm:$0xff]  ;;  %v467_v42 = vlaneseq }
  0x4f   :  { %v283_v57 = vrot.slane %v282_v24, 2  ;;  %v217_v45 = vadd.f32 %v216_v0, %v215_v28  ;;  %v468_v28 = vshrl.u32 %v467_v42, 7  ;;  %v2274_v42 = vunpack.c.h.bf16 %v1475_v51 }
  0x51   :  { %v284_v49 = vadd.f32 %v283_v57, %v282_v24 }
  0x53   :  { %v285_v46 = vrot.slane %v284_v49, 1 }
  0x55   :  { %v286_v55 = vadd.f32 %v285_v46, %v284_v49  ;;  %v867_v49 = vld [vmem:[%s2206_s4] ss:$0 sm:$0xff]  ;;  %v666_v46 = vsub.s32 1, %v468_v28 }
  0x57   :  { %v288_v47 = vsel %vm287_vm2, %v217_v45, %v286_v55  ;;  %v469_v45 = vsub.s32 0, %v468_v28  ;;  %v2275_v28 = vunpack.c.l.bf16 %v1501_v4 }
  0x58   :  { %v289_v30 = vmul.f32 0.00390625, %v288_v47 }
  0x5a   :  { %1205 = vmatmul.mubr.msk.f32.vlgmr.msra.gmra.mxu0 %vm148_vm1, %v289_v30 }
 0x11a   :  { %v370_v37 = vpop.f32.mrf.mxu0 }
 0x11b   :  { %v371_v57 = vadd.f32 %v865_v1, %v370_v37 }
 0x11c   :  { %v1206_v0 = vpop.f32.mrf.mxu0 }
 0x11d   :  { %v374_v24 = vmax.f32 %v371_v57, 0.0 }
 0x11f   :  { %1210 = vmatmul.mubr.msk.f32.vlgmr.msra.gmra.mxu1 %vm383_vm4, %v374_v24 }
 0x1df   :  { %v457_v30 = vpop.f32.mrf.mxu1 }
 0x1e0   :  { %v458_v22 = vadd.f32 %v867_v49, %v457_v30 }
 0x1e1   :  { %v1211_v54 = vpop.f32.mrf.mxu1 }
 0x1e2   :  { %v461_v39 = vsub.f32 0.0, %v458_v22 }
 0x1e4   :  { %v462_v59 = vmul.f32 1.442695, %v461_v39 }
 0x1e6   :  { %1214 = vpow2.f32 %v462_v59  ;;  %v2272_v59 = vunpack.c.h.bf16 %v1449_v63 }
 0x1f3   :  { %v1215_v27 = vpop.eup %1214 }
 0x1f4   :  { %v464_v60 = vadd.f32 1.0, %v1215_v27 }
 0x1f6   :  { %1216 = vrcp.f32 %v464_v60 }
 0x203   :  { %v1217_v55 = vpop.eup %1216 }
 0x204   :  { %v470_v47 = vrot.slane %v1217_v55, %v469_v45  ;;  %v1688_v41 = vrot.slane %v1217_v55, %v666_v46  ;;  %v2277_v55 = vunpack.c.l.bf16 %v1527_v36 }
 0x206   :  { %v471_v1 = vmul.f32 %v1032_v7, %v470_v47  ;;  %v472_v37 = vmul.f32 %v1033_v8, %v470_v47  ;;  %v473_v57 = vmul.f32 %v1036_v9, %v470_v47  ;;  %v474_v0 = vmul.f32 %v1037_v11, %v470_v47 }
 0x207   :  { %v475_v24 = vmul.f32 %v1040_v12, %v470_v47  ;;  %v476_v49 = vmul.f32 %v1041_v18, %v470_v47  ;;  %v477_v30 = vmul.f32 %v1044_v23, %v470_v47  ;;  %v478_v7 = vmul.f32 %v1045_v31, %v470_v47 }
 0x208   :  { %v479_v5 = vmul.f32 %v1048_v35, %v470_v47  ;;  %v480_v8 = vmul.f32 %v1049_v43, %v470_v47  ;;  %v481_v6 = vmul.f32 %v1052_v50, %v470_v47  ;;  %v2264_v9 = vunpack.c.h.bf16 %v1340_v38 }
 0x209   :  { %v483_v12 = vmul.f32 %v2265_v10, %v470_v47  ;;  %v2266_v18 = vunpack.c.h.bf16 %v1371_v53  ;;  %v485_v31 = vmul.f32 %v2267_v16, %v470_v47  ;;  %v2268_v35 = vunpack.c.h.bf16 %v1397_v3 }
 0x20a   :  { %v482_v11 = vmul.f32 %v2264_v9, %v470_v47  ;;  %v487_v43 = vmul.f32 %v2269_v25, %v470_v47  ;;  %v2270_v50 = vunpack.c.h.bf16 %v1423_v40  ;;  %v2271_v38 = vunpack.c.l.bf16 %v1449_v63 }
 0x20b   :  { %v484_v23 = vmul.f32 %v2266_v18, %v470_v47  ;;  %v486_v22 = vmul.f32 %v2268_v35, %v470_v47  ;;  %v490_v27 = vmul.f32 %v2272_v59, %v470_v47  ;;  %v2273_v53 = vunpack.c.l.bf16 %v1475_v51 }
 0x20c   :  { %v488_v54 = vmul.f32 %v2270_v50, %v470_v47  ;;  %v489_v39 = vmul.f32 %v2271_v38, %v470_v47  ;;  %v1736_v3 = vmul.f32 %v2274_v42, %v470_v47  ;;  %v1740_v45 = vmul.f32 %v2275_v28, %v470_v47 }
 0x20d   :  { %v1732_v60 = vmul.f32 %v2273_v53, %v470_v47  ;;  %v2276_v40 = vunpack.c.h.bf16 %v1501_v4  ;;  %v1748_v63 = vmul.f32 %v2277_v55, %v470_v47  ;;  %v2278_v9 = vunpack.c.h.bf16 %v1527_v36 }
 0x20e   :  { %v2279_v51 = vunpack.c.l.bf16 %v1553_v26  ;;  %v2280_v16 = vunpack.c.h.bf16 %v1553_v26  ;;  %v2281_v4 = vunpack.c.l.bf16 %v1579_v62  ;;  %v2282_v50 = vunpack.c.h.bf16 %v1579_v62 }
 0x20f   :  { %v1744_v46 = vmul.f32 %v2276_v40, %v470_v47  ;;  %v1752_v10 = vmul.f32 %v2278_v9, %v470_v47  ;;  %v2283_v36 = vunpack.c.l.bf16 %v1605_v14  ;;  %v2284_v53 = vunpack.c.h.bf16 %v1605_v14 }
 0x210   :  { %v1756_v18 = vmul.f32 %v2279_v51, %v470_v47  ;;  %v1760_v35 = vmul.f32 %v2280_v16, %v470_v47  ;;  %v1764_v25 = vmul.f32 %v2281_v4, %v470_v47  ;;  %v1768_v38 = vmul.f32 %v2282_v50, %v470_v47 }
 0x211   :  { %v1772_v59 = vmul.f32 %v2283_v36, %v470_v47  ;;  %v1776_v42 = vmul.f32 %v2284_v53, %v470_v47  ;;  %v966_v28 = vpack.c.bf16 %v471_v1, %v471_v1  ;;  %v967_v26 = vpack.c.bf16 %v472_v37, %v472_v37 }
 0x212   :  { %v968_v40 = vpack.c.bf16 %v473_v57, %v473_v57  ;;  %v969_v55 = vpack.c.bf16 %v474_v0, %v474_v0  ;;  %v970_v9 = vpack.c.bf16 %v475_v24, %v475_v24  ;;  %v971_v51 = vpack.c.bf16 %v476_v49, %v476_v49 }
 0x213   :  { %v972_v16 = vpack.c.bf16 %v477_v30, %v477_v30  ;;  %v973_v4 = vpack.c.bf16 %v478_v7, %v478_v7  ;;  %v974_v15 = vpack.c.bf16 %v479_v5, %v479_v5  ;;  %v975_v62 = vpack.c.bf16 %v480_v8, %v480_v8  ;;  %632 = vst.msk [vmem:[%s2207_s5] sm:$0xf] %vm631_vm5, %v966_v28 }
 0x214   :  { %v976_v50 = vpack.c.bf16 %v481_v6, %v481_v6  ;;  %v977_v34 = vpack.c.bf16 %v482_v11, %v482_v11  ;;  %633 = vst.msk [vmem:[%s2207_s5 + $0x4] sm:$0xf] %vm631_vm5, %v967_v26  ;;  %634 = vst.msk [vmem:[%s2207_s5 + $0x8] sm:$0xf] %vm631_vm5, %v968_v40  ;;  %v978_v14 = vpack.c.bf16 %v483_v12, %v483_v12  ;;  %v2293_v36 = vunpack.c.l.bf16 %v1381_v58 }
 0x215   :  { %635 = vst.msk [vmem:[%s2207_s5 + $0xc] sm:$0xf] %vm631_vm5, %v969_v55  ;;  %v979_v47 = vpack.c.bf16 %v484_v23, %v484_v23  ;;  %v980_v1 = vpack.c.bf16 %v485_v31, %v485_v31  ;;  %v981_v37 = vpack.c.bf16 %v486_v22, %v486_v22  ;;  %636 = vst.msk [vmem:[%s2207_s5 + $0x10] sm:$0xf] %vm631_vm5, %v970_v9  ;;  %v2294_v53 = vunpack.c.h.bf16 %v1381_v58 }
 0x216   :  { %637 = vst.msk [vmem:[%s2207_s5 + $0x14] sm:$0xf] %vm631_vm5, %v971_v51  ;;  %638 = vst.msk [vmem:[%s2207_s5 + $0x18] sm:$0xf] %vm631_vm5, %v972_v16  ;;  %v982_v57 = vpack.c.bf16 %v487_v43, %v487_v43  ;;  %v983_v0 = vpack.c.bf16 %v488_v54, %v488_v54  ;;  %v984_v24 = vpack.c.bf16 %v489_v39, %v489_v39  ;;  %v2285_v43 = vunpack.c.l.bf16 %v1300_v19 }
 0x217   :  { %639 = vst.msk [vmem:[%s2207_s5 + $0x1c] sm:$0xf] %vm631_vm5, %v973_v4  ;;  %v985_v49 = vpack.c.bf16 %v490_v27, %v490_v27  ;;  %640 = vst.msk [vmem:[%s2207_s5 + $0x20] sm:$0xf] %vm631_vm5, %v974_v15  ;;  %v986_v30 = vpack.c.bf16 %v1732_v60, %v1732_v60  ;;  %v987_v15 = vpack.c.bf16 %v1736_v3, %v1736_v3  ;;  %v2286_v39 = vunpack.c.h.bf16 %v1300_v19 }
 0x218   :  { %641 = vst.msk [vmem:[%s2207_s5 + $0x24] sm:$0xf] %vm631_vm5, %v975_v62  ;;  %642 = vst.msk [vmem:[%s2207_s5 + $0x28] sm:$0xf] %vm631_vm5, %v976_v50  ;;  %v988_v7 = vpack.c.bf16 %v1740_v45, %v1740_v45  ;;  %v989_v5 = vpack.c.bf16 %v1744_v46, %v1744_v46  ;;  %v991_v8 = vpack.c.bf16 %v1752_v10, %v1752_v10  ;;  %v2287_v60 = vunpack.c.l.bf16 %v1305_v20 }
 0x219   :  { %643 = vst.msk [vmem:[%s2207_s5 + $0x2c] sm:$0xf] %vm631_vm5, %v977_v34  ;;  %644 = vst.msk [vmem:[%s2207_s5 + $0x30] sm:$0xf] %vm631_vm5, %v978_v14  ;;  %v990_v34 = vpack.c.bf16 %v1748_v63, %v1748_v63  ;;  %v992_v6 = vpack.c.bf16 %v1756_v18, %v1756_v18  ;;  %v993_v11 = vpack.c.bf16 %v1760_v35, %v1760_v35  ;;  %v2288_v45 = vunpack.c.h.bf16 %v1305_v20 }
 0x21a   :  { %645 = vst.msk [vmem:[%s2207_s5 + $0x34] sm:$0xf] %vm631_vm5, %v979_v47  ;;  %646 = vst.msk [vmem:[%s2207_s5 + $0x38] sm:$0xf] %vm631_vm5, %v980_v1  ;;  %v994_v12 = vpack.c.bf16 %v1764_v25, %v1764_v25  ;;  %v995_v23 = vpack.c.bf16 %v1768_v38, %v1768_v38  ;;  %v996_v31 = vpack.c.bf16 %v1772_v59, %v1772_v59  ;;  %v2289_v19 = vunpack.c.l.bf16 %v1325_v29 }
 0x21b   :  { %647 = vst.msk [vmem:[%s2207_s5 + $0x3c] sm:$0xf] %vm631_vm5, %v981_v37  ;;  %648 = vst.msk [vmem:[%s2207_s5 + $0x40] sm:$0xf] %vm631_vm5, %v982_v57  ;;  %v997_v22 = vpack.c.bf16 %v1776_v42, %v1776_v42  ;;  %v668_v54 = vmul.f32 %v2285_v43, %v1688_v41  ;;  %v669_v27 = vmul.f32 %v2286_v39, %v1688_v41  ;;  %v2290_v63 = vunpack.c.h.bf16 %v1325_v29 }
 0x21c   :  { %649 = vst.msk [vmem:[%s2207_s5 + $0x44] sm:$0xf] %vm631_vm5, %v983_v0  ;;  %650 = vst.msk [vmem:[%s2207_s5 + $0x48] sm:$0xf] %vm631_vm5, %v984_v24  ;;  %v670_v3 = vmul.f32 %v2287_v60, %v1688_v41  ;;  %v671_v46 = vmul.f32 %v2288_v45, %v1688_v41  ;;  %v672_v20 = vmul.f32 %v2289_v19, %v1688_v41  ;;  %v2291_v18 = vunpack.c.l.bf16 %v1355_v44 }
 0x21d   :  { %651 = vst.msk [vmem:[%s2207_s5 + $0x4c] sm:$0xf] %vm631_vm5, %v985_v49  ;;  %652 = vst.msk [vmem:[%s2207_s5 + $0x50] sm:$0xf] %vm631_vm5, %v986_v30  ;;  %v673_v10 = vmul.f32 %v2290_v63, %v1688_v41  ;;  %v2292_v25 = vunpack.c.h.bf16 %v1355_v44  ;;  %v676_v59 = vmul.f32 %v2293_v36, %v1688_v41  ;;  %v677_v42 = vmul.f32 %v2294_v53, %v1688_v41 }
 0x21e   :  { %653 = vst.msk [vmem:[%s2207_s5 + $0x54] sm:$0xf] %vm631_vm5, %v987_v15  ;;  %654 = vst.msk [vmem:[%s2207_s5 + $0x58] sm:$0xf] %vm631_vm5, %v988_v7  ;;  %v674_v35 = vmul.f32 %v2291_v18, %v1688_v41  ;;  %v2295_v29 = vunpack.c.l.bf16 %v1407_v17  ;;  %v2296_v26 = vunpack.c.h.bf16 %v1407_v17  ;;  %v2297_v44 = vunpack.c.l.bf16 %v1433_v48 }
 0x21f   :  { %655 = vst.msk [vmem:[%s2207_s5 + $0x5c] sm:$0xf] %vm631_vm5, %v989_v5  ;;  %656 = vst.msk [vmem:[%s2207_s5 + $0x60] sm:$0xf] %vm631_vm5, %v990_v34  ;;  %v675_v38 = vmul.f32 %v2292_v25, %v1688_v41  ;;  %v2298_v9 = vunpack.c.h.bf16 %v1433_v48  ;;  %v2299_v58 = vunpack.c.l.bf16 %v1459_v21  ;;  %v2300_v4 = vunpack.c.h.bf16 %v1459_v21 }
 0x220   :  { %657 = vst.msk [vmem:[%s2207_s5 + $0x64] sm:$0xf] %vm631_vm5, %v991_v8  ;;  %658 = vst.msk [vmem:[%s2207_s5 + $0x68] sm:$0xf] %vm631_vm5, %v992_v6  ;;  %v678_v28 = vmul.f32 %v2295_v29, %v1688_v41  ;;  %v679_v40 = vmul.f32 %v2296_v26, %v1688_v41  ;;  %v680_v55 = vmul.f32 %v2297_v44, %v1688_v41  ;;  %v2301_v17 = vunpack.c.l.bf16 %v1485_v2 }
 0x221   :  { %659 = vst.msk [vmem:[%s2207_s5 + $0x6c] sm:$0xf] %vm631_vm5, %v993_v11  ;;  %660 = vst.msk [vmem:[%s2207_s5 + $0x70] sm:$0xf] %vm631_vm5, %v994_v12  ;;  %v681_v51 = vmul.f32 %v2298_v9, %v1688_v41  ;;  %v682_v16 = vmul.f32 %v2299_v58, %v1688_v41  ;;  %v683_v62 = vmul.f32 %v2300_v4, %v1688_v41  ;;  %v2302_v14 = vunpack.c.h.bf16 %v1485_v2 }
 0x222   :  { %661 = vst.msk [vmem:[%s2207_s5 + $0x74] sm:$0xf] %vm631_vm5, %v995_v23  ;;  %662 = vst.msk [vmem:[%s2207_s5 + $0x78] sm:$0xf] %vm631_vm5, %v996_v31  ;;  %v684_v50 = vmul.f32 %v2301_v17, %v1688_v41  ;;  %v2303_v48 = vunpack.c.l.bf16 %v1511_v32  ;;  %v2304_v37 = vunpack.c.h.bf16 %v1511_v32  ;;  %v2305_v21 = vunpack.c.l.bf16 %v1537_v52 }
 0x223   :  { %663 = vst.msk [vmem:[%s2207_s5 + $0x7c] sm:$0xf] %vm631_vm5, %v997_v22  ;;  %v685_v47 = vmul.f32 %v2302_v14, %v1688_v41  ;;  %v2306_v24 = vunpack.c.h.bf16 %v1537_v52  ;;  %v2307_v2 = vunpack.c.l.bf16 %v1563_v61  ;;  %v2308_v15 = vunpack.c.h.bf16 %v1563_v61  ;;  %v2315_v22 = vld [vmem:[#allocation2_spill] sm:$0xff] }
 0x224   :  { %v686_v1 = vmul.f32 %v2303_v48, %v1688_v41  ;;  %v687_v57 = vmul.f32 %v2304_v37, %v1688_v41  ;;  %v1993_v0 = vmul.f32 %v2305_v21, %v1688_v41  ;;  %v2309_v7 = vunpack.c.l.bf16 %v1589_v33 }
 0x225   :  { %v1998_v49 = vmul.f32 %v2306_v24, %v1688_v41  ;;  %v2003_v30 = vmul.f32 %v2307_v2, %v1688_v41  ;;  %v2008_v32 = vmul.f32 %v2308_v15, %v1688_v41  ;;  %v2310_v52 = vunpack.c.h.bf16 %v1589_v33 }
 0x226   :  { %v2013_v5 = vmul.f32 %v2309_v7, %v1688_v41  ;;  %v2311_v8 = vunpack.c.l.bf16 %v1615_v13  ;;  %v2312_v61 = vunpack.c.h.bf16 %v1615_v13  ;;  %v2313_v12 = vunpack.c.l.bf16 %v1636_v56 }
 0x227   :  { %v2018_v34 = vmul.f32 %v2310_v52, %v1688_v41  ;;  %v2314_v33 = vunpack.c.h.bf16 %v1636_v56  ;;  %v2316_v43 = vunpack.c.l.bf16 %v2315_v22  ;;  %v2317_v13 = vunpack.c.h.bf16 %v2315_v22 }
 0x228   :  { %v2023_v6 = vmul.f32 %v2311_v8, %v1688_v41  ;;  %v2028_v11 = vmul.f32 %v2312_v61, %v1688_v41  ;;  %v2033_v23 = vmul.f32 %v2313_v12, %v1688_v41  ;;  %v998_v45 = vpack.c.bf16 %v668_v54, %v668_v54 }
 0x229   :  { %v2038_v31 = vmul.f32 %v2314_v33, %v1688_v41  ;;  %v2043_v39 = vmul.f32 %v2316_v43, %v1688_v41  ;;  %v2048_v60 = vmul.f32 %v2317_v13, %v1688_v41  ;;  %v999_v19 = vpack.c.bf16 %v669_v27, %v669_v27 }
 0x22a   :  { %v1000_v63 = vpack.c.bf16 %v670_v3, %v670_v3  ;;  %v1001_v18 = vpack.c.bf16 %v671_v46, %v671_v46  ;;  %v1002_v25 = vpack.c.bf16 %v672_v20, %v672_v20  ;;  %v1003_v36 = vpack.c.bf16 %v673_v10, %v673_v10  ;;  %934 = vst.msk [vmem:[%s2207_s5 + $0x80] sm:$0xf] %vm631_vm5, %v998_v45 }
 0x22b   :  { %v1004_v53 = vpack.c.bf16 %v674_v35, %v674_v35  ;;  %v1005_v56 = vpack.c.bf16 %v675_v38, %v675_v38  ;;  %v1006_v29 = vpack.c.bf16 %v676_v59, %v676_v59  ;;  %v1007_v26 = vpack.c.bf16 %v677_v42, %v677_v42  ;;  %935 = vst.msk [vmem:[%s2207_s5 + $0x84] sm:$0xf] %vm631_vm5, %v999_v19 }
 0x22c   :  { %v1008_v44 = vpack.c.bf16 %v678_v28, %v678_v28  ;;  %v1009_v9 = vpack.c.bf16 %v679_v40, %v679_v40  ;;  %936 = vst.msk [vmem:[%s2207_s5 + $0x88] sm:$0xf] %vm631_vm5, %v1000_v63  ;;  %937 = vst.msk [vmem:[%s2207_s5 + $0x8c] sm:$0xf] %vm631_vm5, %v1001_v18  ;;  %v1010_v41 = vpack.c.bf16 %v680_v55, %v680_v55 }
 0x22d   :  { %v1011_v54 = vpack.c.bf16 %v681_v51, %v681_v51  ;;  %v1012_v27 = vpack.c.bf16 %v682_v16, %v682_v16  ;;  %v1013_v3 = vpack.c.bf16 %v683_v62, %v683_v62  ;;  %938 = vst.msk [vmem:[%s2207_s5 + $0x90] sm:$0xf] %vm631_vm5, %v1002_v25  ;;  %939 = vst.msk [vmem:[%s2207_s5 + $0x94] sm:$0xf] %vm631_vm5, %v1003_v36 }
 0x22e   :  { %940 = vst.msk [vmem:[%s2207_s5 + $0x98] sm:$0xf] %vm631_vm5, %v1004_v53  ;;  %941 = vst.msk [vmem:[%s2207_s5 + $0x9c] sm:$0xf] %vm631_vm5, %v1005_v56  ;;  %v1014_v46 = vpack.c.bf16 %v684_v50, %v684_v50  ;;  %v1015_v20 = vpack.c.bf16 %v685_v47, %v685_v47  ;;  %v1016_v10 = vpack.c.bf16 %v686_v1, %v686_v1 }
 0x22f   :  { %v1017_v35 = vpack.c.bf16 %v687_v57, %v687_v57  ;;  %942 = vst.msk [vmem:[%s2207_s5 + $0xa0] sm:$0xf] %vm631_vm5, %v1006_v29  ;;  %943 = vst.msk [vmem:[%s2207_s5 + $0xa4] sm:$0xf] %vm631_vm5, %v1007_v26  ;;  %v1018_v38 = vpack.c.bf16 %v1993_v0, %v1993_v0  ;;  %v1019_v59 = vpack.c.bf16 %v1998_v49, %v1998_v49 }
 0x230   :  { %944 = vst.msk [vmem:[%s2207_s5 + $0xa8] sm:$0xf] %vm631_vm5, %v1008_v44  ;;  %945 = vst.msk [vmem:[%s2207_s5 + $0xac] sm:$0xf] %vm631_vm5, %v1009_v9  ;;  %v1020_v42 = vpack.c.bf16 %v2003_v30, %v2003_v30  ;;  %v1021_v28 = vpack.c.bf16 %v2008_v32, %v2008_v32  ;;  %v1022_v40 = vpack.c.bf16 %v2013_v5, %v2013_v5 }
 0x231   :  { %946 = vst.msk [vmem:[%s2207_s5 + $0xb0] sm:$0xf] %vm631_vm5, %v1010_v41  ;;  %947 = vst.msk [vmem:[%s2207_s5 + $0xb4] sm:$0xf] %vm631_vm5, %v1011_v54  ;;  %v1023_v55 = vpack.c.bf16 %v2018_v34, %v2018_v34  ;;  %v1024_v51 = vpack.c.bf16 %v2023_v6, %v2023_v6  ;;  %v1025_v58 = vpack.c.bf16 %v2028_v11, %v2028_v11 }
 0x232   :  { %948 = vst.msk [vmem:[%s2207_s5 + $0xb8] sm:$0xf] %vm631_vm5, %v1012_v27  ;;  %949 = vst.msk [vmem:[%s2207_s5 + $0xbc] sm:$0xf] %vm631_vm5, %v1013_v3  ;;  %v1026_v16 = vpack.c.bf16 %v2033_v23, %v2033_v23  ;;  %v1027_v4 = vpack.c.bf16 %v2038_v31, %v2038_v31  ;;  %v1028_v62 = vpack.c.bf16 %v2043_v39, %v2043_v39 }
 0x233   :  { %950 = vst.msk [vmem:[%s2207_s5 + $0xc0] sm:$0xf] %vm631_vm5, %v1014_v46  ;;  %951 = vst.msk [vmem:[%s2207_s5 + $0xc4] sm:$0xf] %vm631_vm5, %v1015_v20  ;;  %v1029_v17 = vpack.c.bf16 %v2048_v60, %v2048_v60 }
 0x234   :  { %952 = vst.msk [vmem:[%s2207_s5 + $0xc8] sm:$0xf] %vm631_vm5, %v1016_v10  ;;  %953 = vst.msk [vmem:[%s2207_s5 + $0xcc] sm:$0xf] %vm631_vm5, %v1017_v35 }
 0x235   :  { %954 = vst.msk [vmem:[%s2207_s5 + $0xd0] sm:$0xf] %vm631_vm5, %v1018_v38  ;;  %955 = vst.msk [vmem:[%s2207_s5 + $0xd4] sm:$0xf] %vm631_vm5, %v1019_v59 }
 0x236   :  { %956 = vst.msk [vmem:[%s2207_s5 + $0xd8] sm:$0xf] %vm631_vm5, %v1020_v42  ;;  %957 = vst.msk [vmem:[%s2207_s5 + $0xdc] sm:$0xf] %vm631_vm5, %v1021_v28 }
 0x237   :  { %958 = vst.msk [vmem:[%s2207_s5 + $0xe0] sm:$0xf] %vm631_vm5, %v1022_v40  ;;  %959 = vst.msk [vmem:[%s2207_s5 + $0xe4] sm:$0xf] %vm631_vm5, %v1023_v55 }
 0x238   :  { %960 = vst.msk [vmem:[%s2207_s5 + $0xe8] sm:$0xf] %vm631_vm5, %v1024_v51  ;;  %961 = vst.msk [vmem:[%s2207_s5 + $0xec] sm:$0xf] %vm631_vm5, %v1025_v58 }
 0x239   :  { %962 = vst.msk [vmem:[%s2207_s5 + $0xf0] sm:$0xf] %vm631_vm5, %v1026_v16  ;;  %963 = vst.msk [vmem:[%s2207_s5 + $0xf4] sm:$0xf] %vm631_vm5, %v1027_v4 }
 0x23a   :  { %964 = vst.msk [vmem:[%s2207_s5 + $0xf8] sm:$0xf] %vm631_vm5, %v1028_v62  ;;  %965 = vst.msk [vmem:[%s2207_s5 + $0xfc] sm:$0xf] %vm631_vm5, %v1029_v17 }

// kernel: netg_fwd.11
= control target key start
LH: loop header
LB: loop body
LE: loop exit
PB: predicated region body
PF: predicated region fallthrough
CT: control target
= control target key end

     0   :  { %v514_v0 = vmov 0.0   ;;  %vm515_vm0 = vmmov 0   ;;  %vm52_vm1 = vcmask 523264   ;;  %vm95_vm2 = vcmask 1040384   ;;  %s791_s1 = inlined_call_operand.vmem [shape: f32[64,4], index: 1, kind: input, shape index: {}]   ;;  %s792_s0 = inlined_call_operand.vmem [shape: bf16[2,64,64], index: 0, kind: input, shape index: {}]   ;;  %s793_s3 = inlined_call_operand.vmem [shape: f32[4,64], index: 3, kind: input, shape index: {}]   ;;  %s794_s2 = inlined_call_operand.vmem [shape: f32[1,4], index: 2, kind: input, shape index: {}]   ;;  %s795_s4 = inlined_call_operand.vmem [shape: f32[1,64], index: 4, kind: input, shape index: {}]   ;;  %s796_s5 = inlined_call_operand.vmem [shape: bf16[2,64,64], index: 5, kind: output, shape index: {}]  }
   0x1   :  { %484 = vmatprep.subr.mxu0 %v514_v0  ;;  %v105_v1 = vld [vmem:[%s791_s1 + $0x38] sm:$0xff]  ;;  %v104_v2 = vld [vmem:[%s791_s1 + $0x30] sm:$0xff]  ;;  %500 = vmatprep.mubr.msk.f32.mxu0 %vm515_vm0, %v514_v0  ;;  %v103_v3 = vld [vmem:[%s791_s1 + $0x28] sm:$0xff]  ;;  %vm199_vm3 = vcmask 1043456   ;;  %vm195_vm4 = vcmask 31744   ;;  %vm323_vm5 = vcmask 519168  }
   0x2   :  { %485 = vmatpush3.msra.mxu0 %v105_v1  ;;  %503 = vmatprep.subr.mxu1 %v514_v0  ;;  %v562_v4 = vld [vmem:[%s792_s0] sm:$0xff]   ;;  %v573_v8 = vld [vmem:[%s792_s0 + $0x8] sm:$0xff]   ;;  %v580_v10 = vld [vmem:[%s792_s0 + $0x10] sm:$0xff]  }
   0x3   :  { %486 = vmatprep.subr.mxu0 %v514_v0  ;;  %505 = vmatprep.mubr.msk.f32.mxu1 %vm515_vm0, %v514_v0  ;;  %v102_v5 = vld [vmem:[%s791_s1 + $0x20] sm:$0xff]  ;;  %v436_v6 = vunpack.c.l.bf16 %v562_v4  ;;  %v437_v7 = vunpack.c.h.bf16 %v562_v4  ;;  %v440_v9 = vunpack.c.l.bf16 %v573_v8  ;;  %v590_v12 = vld [vmem:[%s792_s0 + $0x28] sm:$0xff]   ;;  %v441_v13 = vunpack.c.h.bf16 %v573_v8  ;;  %v101_v15 = vld [vmem:[%s791_s1 + $0x18] sm:$0xff] }
   0x4   :  { %487 = vmatpush3.msra.mxu0 %v104_v2  ;;  %v585_v11 = vld [vmem:[%s792_s0 + $0x20] sm:$0xff]   ;;  %v456_v17 = vunpack.c.l.bf16 %v590_v12  ;;  %v444_v18 = vunpack.c.l.bf16 %v580_v10  ;;  %v604_v19 = vld [vmem:[%s792_s0 + $0x30] sm:$0xff]   ;;  %v619_v23 = vld [vmem:[%s792_s0 + $0x18] sm:$0xff]   ;;  %v457_v24 = vunpack.c.h.bf16 %v590_v12  ;;  %v445_v27 = vunpack.c.h.bf16 %v580_v10 }
   0x5   :  { %488 = vmatprep.subr.mxu0 %v514_v0  ;;  %v452_v14 = vunpack.c.l.bf16 %v585_v11  ;;  %v453_v16 = vunpack.c.h.bf16 %v585_v11  ;;  %v53_v20 = vsel %vm52_vm1, %v436_v6, 0.0  ;;  %v54_v21 = vsel %vm52_vm1, %v437_v7, 0.0  ;;  %v100_v22 = vld [vmem:[%s791_s1 + $0x10] sm:$0xff]  ;;  %v99_v30 = vld [vmem:[%s791_s1 + $0x8] sm:$0xff]  ;;  %v647_v36 = vld [vmem:[%s792_s0 + $0x38] sm:$0xff]  }
   0x6   :  { %489 = vmatpush3.msra.mxu0 %v103_v3  ;;  %v55_v25 = vadd.f32 %v54_v21, %v53_v20  ;;  %v56_v26 = vsel %vm52_vm1, %v440_v9, 0.0  ;;  %v58_v28 = vsel %vm52_vm1, %v441_v13, 0.0  ;;  %v460_v31 = vunpack.c.l.bf16 %v604_v19  ;;  %v98_v39 = vld [vmem:[%s791_s1] sm:$0xff] }
   0x7   :  { %490 = vmatprep.subr.mxu0 %v514_v0  ;;  %v74_v29 = vsel %vm52_vm1, %v452_v14, 0.0  ;;  %v75_v33 = vsel %vm52_vm1, %v453_v16, 0.0  ;;  %v77_v34 = vsel %vm52_vm1, %v456_v17, 0.0  ;;  %v448_v35 = vunpack.c.l.bf16 %v619_v23 }
   0x8   :  { %491 = vmatpush3.msra.mxu0 %v102_v5  ;;  %v57_v32 = vadd.f32 %v56_v26, %v55_v25  ;;  %v60_v37 = vsel %vm52_vm1, %v444_v18, 0.0  ;;  %v76_v38 = vadd.f32 %v75_v33, %v74_v29  ;;  %v461_v40 = vunpack.c.h.bf16 %v604_v19 }
   0x9   :  { %492 = vmatprep.subr.mxu0 %v514_v0  ;;  %v79_v42 = vsel %vm52_vm1, %v457_v24, 0.0  ;;  %v449_v43 = vunpack.c.h.bf16 %v619_v23  ;;  %v62_v44 = vsel %vm52_vm1, %v445_v27, 0.0  ;;  %v464_v46 = vunpack.c.l.bf16 %v647_v36 }
   0xa   :  { %493 = vmatpush3.msra.mxu0 %v101_v15  ;;  %v59_v41 = vadd.f32 %v58_v28, %v57_v32  ;;  %v78_v45 = vadd.f32 %v77_v34, %v76_v38  ;;  %v81_v48 = vsel %vm52_vm1, %v460_v31, 0.0  ;;  %v64_v49 = vsel %vm52_vm1, %v448_v35, 0.0  ;;  %v389_v32 = vld [vmem:[%s794_s2] ss:$0 sm:$0xff] }
   0xb   :  { %494 = vmatprep.subr.mxu0 %v514_v0  ;;  %v465_v51 = vunpack.c.h.bf16 %v647_v36  ;;  %v83_v53 = vsel %vm52_vm1, %v461_v40, 0.0  ;;  %v66_v54 = vsel %vm52_vm1, %v449_v43, 0.0  ;;  %v85_v57 = vsel %vm52_vm1, %v464_v46, 0.0 }
   0xc   :  { %495 = vmatpush3.msra.mxu0 %v100_v22  ;;  %v61_v47 = vadd.f32 %v60_v37, %v59_v41  ;;  %v80_v50 = vadd.f32 %v79_v42, %v78_v45 }
   0xd   :  { %496 = vmatprep.subr.mxu0 %v514_v0  ;;  %v87_v60 = vsel %vm52_vm1, %v465_v51, 0.0 }
   0xe   :  { %497 = vmatpush3.msra.mxu0 %v99_v30  ;;  %v63_v52 = vadd.f32 %v62_v44, %v61_v47  ;;  %v82_v55 = vadd.f32 %v81_v48, %v80_v50  ;;  %v187_v30 = vld [vmem:[%s793_s3] sm:$0xf]  ;;  %v279_v50 = vlaneseq }
   0xf   :  { %498 = vmatprep.subr.mxu0 %v514_v0  ;;  %504 = vmatpush3.msk.msra.mxu1 %vm199_vm3, %v187_v30 }
  0x10   :  { %499 = vmatpush3.msra.mxu0 %v98_v39  ;;  %v65_v56 = vadd.f32 %v64_v49, %v63_v52  ;;  %v84_v58 = vadd.f32 %v83_v53, %v82_v55  ;;  %v391_v39 = vld [vmem:[%s795_s4] ss:$0 sm:$0xff]  ;;  %v280_v52 = vshrl.u32 %v279_v50, 7 }
  0x12   :  { %v67_v59 = vadd.f32 %v66_v54, %v65_v56  ;;  %v86_v61 = vadd.f32 %v85_v57, %v84_v58  ;;  %v281_v53 = vsub.s32 0, %v280_v52  ;;  %v334_v54 = vsub.s32 1, %v280_v52 }
  0x14   :  { %v68_v62 = vrot.slane %v67_v59, 4  ;;  %v88_v63 = vadd.f32 %v87_v60, %v86_v61 }
  0x16   :  { %v69_v0 = vadd.f32 %v68_v62, %v67_v59  ;;  %v89_v1 = vrot.slane %v88_v63, 4 }
  0x18   :  { %v70_v2 = vrot.slane %v69_v0, 2  ;;  %v90_v3 = vadd.f32 %v89_v1, %v88_v63 }
  0x1a   :  { %v71_v5 = vadd.f32 %v70_v2, %v69_v0  ;;  %v91_v15 = vrot.slane %v90_v3, 2 }
  0x1c   :  { %v72_v20 = vrot.slane %v71_v5, 1  ;;  %v92_v21 = vadd.f32 %v91_v15, %v90_v3 }
  0x1e   :  { %v73_v22 = vadd.f32 %v72_v20, %v71_v5  ;;  %v93_v25 = vrot.slane %v92_v21, 1 }
  0x20   :  { %v94_v26 = vadd.f32 %v93_v25, %v92_v21 }
  0x22   :  { %v96_v28 = vsel %vm95_vm2, %v73_v22, %v94_v26 }
  0x23   :  { %v97_v29 = vmul.f32 0.015625, %v96_v28 }
  0x25   :  { %501 = vmatmul.mubr.msk.f32.vlgmr.msra.gmra.mxu0 %vm52_vm1, %v97_v29 }
  0xe5   :  { %v182_v33 = vpop.f32.mrf.mxu0 }
  0xe6   :  { %v183_v34 = vadd.f32 %v389_v32, %v182_v33 }
  0xe7   :  { %v502_v37 = vpop.f32.mrf.mxu0 }
  0xe8   :  { %v186_v38 = vmax.f32 %v183_v34, 0.0 }
  0xea   :  { %506 = vmatmul.mubr.msk.f32.vlgmr.msra.gmra.mxu1 %vm195_vm4, %v186_v38 }
 0x1aa   :  { %v269_v41 = vpop.f32.mrf.mxu1 }
 0x1ab   :  { %v270_v42 = vadd.f32 %v391_v39, %v269_v41 }
 0x1ac   :  { %v507_v44 = vpop.f32.mrf.mxu1 }
 0x1ad   :  { %v273_v45 = vsub.f32 0.0, %v270_v42 }
 0x1af   :  { %v274_v47 = vmul.f32 1.442695, %v273_v45 }
 0x1b1   :  { %510 = vpow2.f32 %v274_v47 }
 0x1be   :  { %v511_v48 = vpop.eup %510 }
 0x1bf   :  { %v276_v49 = vadd.f32 1.0, %v511_v48 }
 0x1c1   :  { %512 = vrcp.f32 %v276_v49 }
 0x1ce   :  { %v513_v55 = vpop.eup %512 }
 0x1cf   :  { %v282_v56 = vrot.slane %v513_v55, %v281_v53  ;;  %v335_v57 = vrot.slane %v513_v55, %v334_v54 }
 0x1d1   :  { %v283_v58 = vmul.f32 %v436_v6, %v282_v56  ;;  %v284_v59 = vmul.f32 %v437_v7, %v282_v56  ;;  %v285_v60 = vmul.f32 %v440_v9, %v282_v56  ;;  %v286_v61 = vmul.f32 %v441_v13, %v282_v56 }
 0x1d2   :  { %v287_v62 = vmul.f32 %v444_v18, %v282_v56  ;;  %v288_v63 = vmul.f32 %v445_v27, %v282_v56  ;;  %v289_v0 = vmul.f32 %v448_v35, %v282_v56  ;;  %v290_v6 = vmul.f32 %v449_v43, %v282_v56 }
 0x1d3   :  { %v418_v4 = vpack.c.bf16 %v283_v58, %v283_v58  ;;  %v419_v7 = vpack.c.bf16 %v284_v59, %v284_v59  ;;  %v420_v1 = vpack.c.bf16 %v285_v60, %v285_v60  ;;  %v421_v2 = vpack.c.bf16 %v286_v61, %v286_v61 }
 0x1d4   :  { %v422_v9 = vpack.c.bf16 %v287_v62, %v287_v62  ;;  %v423_v3 = vpack.c.bf16 %v288_v63, %v288_v63  ;;  %v424_v8 = vpack.c.bf16 %v289_v0, %v289_v0  ;;  %v425_v13 = vpack.c.bf16 %v290_v6, %v290_v6 }
 0x1d5   :  { %324 = vst.msk [vmem:[%s796_s5] sm:$0xf] %vm323_vm5, %v418_v4  ;;  %325 = vst.msk [vmem:[%s796_s5 + $0x4] sm:$0xf] %vm323_vm5, %v419_v7  ;;  %v336_v10 = vmul.f32 %v452_v14, %v335_v57  ;;  %v337_v18 = vmul.f32 %v453_v16, %v335_v57  ;;  %v338_v23 = vmul.f32 %v456_v17, %v335_v57 }
 0x1d6   :  { %326 = vst.msk [vmem:[%s796_s5 + $0x8] sm:$0xf] %vm323_vm5, %v420_v1  ;;  %327 = vst.msk [vmem:[%s796_s5 + $0xc] sm:$0xf] %vm323_vm5, %v421_v2  ;;  %v339_v27 = vmul.f32 %v457_v24, %v335_v57  ;;  %v340_v11 = vmul.f32 %v460_v31, %v335_v57  ;;  %v341_v12 = vmul.f32 %v461_v40, %v335_v57 }
 0x1d7   :  { %328 = vst.msk [vmem:[%s796_s5 + $0x10] sm:$0xf] %vm323_vm5, %v422_v9  ;;  %329 = vst.msk [vmem:[%s796_s5 + $0x14] sm:$0xf] %vm323_vm5, %v423_v3  ;;  %v342_v14 = vmul.f32 %v464_v46, %v335_v57  ;;  %v343_v16 = vmul.f32 %v465_v51, %v335_v57  ;;  %v426_v17 = vpack.c.bf16 %v336_v10, %v336_v10 }
 0x1d8   :  { %330 = vst.msk [vmem:[%s796_s5 + $0x18] sm:$0xf] %vm323_vm5, %v424_v8  ;;  %331 = vst.msk [vmem:[%s796_s5 + $0x1c] sm:$0xf] %vm323_vm5, %v425_v13  ;;  %v427_v24 = vpack.c.bf16 %v337_v18, %v337_v18  ;;  %v428_v35 = vpack.c.bf16 %v338_v23, %v338_v23  ;;  %v429_v43 = vpack.c.bf16 %v339_v27, %v339_v27 }
 0x1d9   :  { %v430_v5 = vpack.c.bf16 %v340_v11, %v340_v11  ;;  %v431_v15 = vpack.c.bf16 %v341_v12, %v341_v12  ;;  %v432_v20 = vpack.c.bf16 %v342_v14, %v342_v14  ;;  %v433_v21 = vpack.c.bf16 %v343_v16, %v343_v16  ;;  %410 = vst.msk [vmem:[%s796_s5 + $0x20] sm:$0xf] %vm323_vm5, %v426_v17 }
 0x1da   :  { %411 = vst.msk [vmem:[%s796_s5 + $0x24] sm:$0xf] %vm323_vm5, %v427_v24  ;;  %412 = vst.msk [vmem:[%s796_s5 + $0x28] sm:$0xf] %vm323_vm5, %v428_v35 }
 0x1db   :  { %413 = vst.msk [vmem:[%s796_s5 + $0x2c] sm:$0xf] %vm323_vm5, %v429_v43  ;;  %414 = vst.msk [vmem:[%s796_s5 + $0x30] sm:$0xf] %vm323_vm5, %v430_v5 }
 0x1dc   :  { %415 = vst.msk [vmem:[%s796_s5 + $0x34] sm:$0xf] %vm323_vm5, %v431_v15  ;;  %416 = vst.msk [vmem:[%s796_s5 + $0x38] sm:$0xf] %vm323_vm5, %v432_v20 }
 0x1dd   :  { %417 = vst.msk [vmem:[%s796_s5 + $0x3c] sm:$0xf] %vm323_vm5, %v433_v21 }

// kernel: netg_fwd.12
= control target key start
LH: loop header
LB: loop body
LE: loop exit
PB: predicated region body
PF: predicated region fallthrough
CT: control target
= control target key end

     0   :  { %v362_v0 = vmov 0.0   ;;  %vm363_vm0 = vmmov 0   ;;  %vm42_vm1 = vcmask 1040384   ;;  %vm147_vm2 = vcmask 64512   ;;  %s506_s1 = inlined_call_operand.vmem [shape: f32[128,8], index: 1, kind: input, shape index: {}]   ;;  %s507_s0 = inlined_call_operand.vmem [shape: bf16[2,16,128], index: 0, kind: input, shape index: {}]   ;;  %s508_s3 = inlined_call_operand.vmem [shape: f32[8,128], index: 3, kind: input, shape index: {}]   ;;  %s509_s2 = inlined_call_operand.vmem [shape: f32[1,8], index: 2, kind: input, shape index: {}]   ;;  %s510_s4 = inlined_call_operand.vmem [shape: f32[1,128], index: 4, kind: input, shape index: {}]   ;;  %s511_s5 = inlined_call_operand.vmem [shape: bf16[2,16,128], index: 5, kind: output, shape index: {}]  }
   0x1   :  { %316 = vmatprep.subr.mxu0 %v362_v0  ;;  %v60_v1 = vld [vmem:[%s506_s1 + $0x78] sm:$0xff]  ;;  %v59_v2 = vld [vmem:[%s506_s1 + $0x70] sm:$0xff]  ;;  %348 = vmatprep.mubr.msk.f32.mxu0 %vm363_vm0, %v362_v0  ;;  %v58_v3 = vld [vmem:[%s506_s1 + $0x68] sm:$0xff]  ;;  %v227_v53 = vlaneseq }
   0x2   :  { %317 = vmatpush3.msra.mxu0 %v60_v1  ;;  %351 = vmatprep.subr.mxu1 %v362_v0  ;;  %v57_v4 = vld [vmem:[%s506_s1 + $0x60] sm:$0xff]  ;;  %v420_v6 = vld [vmem:[%s507_s0 + $0x8] sm:$0xff]   ;;  %v56_v7 = vld [vmem:[%s506_s1 + $0x58] sm:$0xff] }
   0x3   :  { %318 = vmatprep.subr.mxu0 %v362_v0  ;;  %353 = vmatprep.mubr.msk.f32.mxu1 %vm363_vm0, %v362_v0  ;;  %v415_v5 = vld [vmem:[%s507_s0] sm:$0xff]   ;;  %v283_v10 = vunpack.c.l.bf16 %v420_v6  ;;  %v284_v11 = vunpack.c.h.bf16 %v420_v6  ;;  %v55_v12 = vld [vmem:[%s506_s1 + $0x50] sm:$0xff]  ;;  %v54_v15 = vld [vmem:[%s506_s1 + $0x48] sm:$0xff]  ;;  %v228_v54 = vshrl.u32 %v227_v53, 7 }
   0x4   :  { %319 = vmatpush3.msra.mxu0 %v59_v2  ;;  %v279_v8 = vunpack.c.l.bf16 %v415_v5  ;;  %v280_v9 = vunpack.c.h.bf16 %v415_v5  ;;  %v53_v18 = vld [vmem:[%s506_s1 + $0x40] sm:$0xff]  ;;  %v52_v21 = vld [vmem:[%s506_s1 + $0x38] sm:$0xff]  ;;  %v51_v24 = vld [vmem:[%s506_s1 + $0x30] sm:$0xff] }
   0x5   :  { %320 = vmatprep.subr.mxu0 %v362_v0  ;;  %v35_v14 = vadd.f32 %v284_v11, %v283_v10  ;;  %v50_v27 = vld [vmem:[%s506_s1 + $0x28] sm:$0xff]  ;;  %v49_v30 = vld [vmem:[%s506_s1 + $0x20] sm:$0xff]  ;;  %v48_v33 = vld [vmem:[%s506_s1 + $0x18] sm:$0xff]  ;;  %v229_v55 = vsub.s32 0, %v228_v54  ;;  %v245_v56 = vsub.s32 1, %v228_v54 }
   0x6   :  { %321 = vmatpush3.msra.mxu0 %v58_v3  ;;  %v28_v13 = vadd.f32 %v280_v9, %v279_v8  ;;  %v47_v34 = vld [vmem:[%s506_s1 + $0x10] sm:$0xff]  ;;  %v46_v36 = vld [vmem:[%s506_s1 + $0x8] sm:$0xff]  ;;  %v45_v37 = vld [vmem:[%s506_s1] sm:$0xff] }
   0x7   :  { %322 = vmatprep.subr.mxu0 %v362_v0  ;;  %v36_v17 = vrot.slane %v35_v14, 4  ;;  %v139_v39 = vld [vmem:[%s508_s3] sm:$0xff] }
   0x8   :  { %323 = vmatpush3.msra.mxu0 %v57_v4  ;;  %v29_v16 = vrot.slane %v28_v13, 4  ;;  %352 = vmatpush3.msra.mxu1 %v139_v39  ;;  %v264_v40 = vld [vmem:[%s509_s2] ss:$0 sm:$0xff] }
   0x9   :  { %324 = vmatprep.subr.mxu0 %v362_v0  ;;  %v37_v20 = vadd.f32 %v36_v17, %v35_v14  ;;  %v265_v45 = vld [vmem:[%s510_s4] ss:$0 sm:$0xff] }
   0xa   :  { %325 = vmatpush3.msra.mxu0 %v56_v7  ;;  %v30_v19 = vadd.f32 %v29_v16, %v28_v13 }
   0xb   :  { %326 = vmatprep.subr.mxu0 %v362_v0  ;;  %v38_v23 = vrot.slane %v37_v20, 2 }
   0xc   :  { %327 = vmatpush3.msra.mxu0 %v55_v12  ;;  %v31_v22 = vrot.slane %v30_v19, 2 }
   0xd   :  { %328 = vmatprep.subr.mxu0 %v362_v0  ;;  %v39_v26 = vadd.f32 %v38_v23, %v37_v20 }
   0xe   :  { %329 = vmatpush3.msra.mxu0 %v54_v15  ;;  %v32_v25 = vadd.f32 %v31_v22, %v30_v19 }
   0xf   :  { %330 = vmatprep.subr.mxu0 %v362_v0  ;;  %v40_v29 = vrot.slane %v39_v26, 1 }
  0x10   :  { %331 = vmatpush3.msra.mxu0 %v53_v18  ;;  %v33_v28 = vrot.slane %v32_v25, 1 }
  0x11   :  { %332 = vmatprep.subr.mxu0 %v362_v0  ;;  %v41_v32 = vadd.f32 %v40_v29, %v39_v26 }
  0x12   :  { %333 = vmatpush3.msra.mxu0 %v52_v21  ;;  %v34_v31 = vadd.f32 %v33_v28, %v32_v25 }
  0x13   :  { %334 = vmatprep.subr.mxu0 %v362_v0 }
  0x14   :  { %335 = vmatpush3.msra.mxu0 %v51_v24  ;;  %v43_v35 = vsel %vm42_vm1, %v34_v31, %v41_v32 }
  0x15   :  { %336 = vmatprep.subr.mxu0 %v362_v0  ;;  %v44_v38 = vmul.f32 0.0625, %v43_v35 }
  0x16   :  { %337 = vmatpush3.msra.mxu0 %v50_v27 }
  0x17   :  { %338 = vmatprep.subr.mxu0 %v362_v0 }
  0x18   :  { %339 = vmatpush3.msra.mxu0 %v49_v30 }
  0x19   :  { %340 = vmatprep.subr.mxu0 %v362_v0 }
  0x1a   :  { %341 = vmatpush3.msra.mxu0 %v48_v33 }
  0x1b   :  { %342 = vmatprep.subr.mxu0 %v362_v0 }
  0x1c   :  { %343 = vmatpush3.msra.mxu0 %v47_v34 }
  0x1d   :  { %344 = vmatprep.subr.mxu0 %v362_v0 }
  0x1e   :  { %345 = vmatpush3.msra.mxu0 %v46_v36 }
  0x1f   :  { %346 = vmatprep.subr.mxu0 %v362_v0 }
  0x20   :  { %347 = vmatpush3.msra.mxu0 %v45_v37 }
  0x21   :  { %349 = vmatmul.mubr.f32.vlgmr.msra.gmra.mxu0 %v44_v38 }
  0xe1   :  { %v134_v41 = vpop.f32.mrf.mxu0 }
  0xe2   :  { %v135_v42 = vadd.f32 %v264_v40, %v134_v41 }
  0xe3   :  { %v350_v43 = vpop.f32.mrf.mxu0 }
  0xe4   :  { %v138_v44 = vmax.f32 %v135_v42, 0.0 }
  0xe6   :  { %354 = vmatmul.mubr.msk.f32.vlgmr.msra.gmra.mxu1 %vm147_vm2, %v138_v44 }
 0x1a6   :  { %v217_v46 = vpop.f32.mrf.mxu1 }
 0x1a7   :  { %v218_v47 = vadd.f32 %v265_v45, %v217_v46 }
 0x1a8   :  { %v355_v48 = vpop.f32.mrf.mxu1 }
 0x1a9   :  { %v221_v49 = vsub.f32 0.0, %v218_v47 }
 0x1ab   :  { %v222_v50 = vmul.f32 1.442695, %v221_v49 }
 0x1ad   :  { %358 = vpow2.f32 %v222_v50 }
 0x1ba   :  { %v359_v51 = vpop.eup %358 }
 0x1bb   :  { %v224_v52 = vadd.f32 1.0, %v359_v51 }
 0x1bd   :  { %360 = vrcp.f32 %v224_v52 }
 0x1ca   :  { %v361_v57 = vpop.eup %360 }
 0x1cb   :  { %v230_v58 = vrot.slane %v361_v57, %v229_v55  ;;  %v246_v59 = vrot.slane %v361_v57, %v245_v56 }
 0x1cd   :  { %v231_v60 = vmul.f32 %v279_v8, %v230_v58  ;;  %v232_v61 = vmul.f32 %v280_v9, %v230_v58  ;;  %v247_v62 = vmul.f32 %v283_v10, %v246_v59  ;;  %v248_v63 = vmul.f32 %v284_v11, %v246_v59 }
 0x1cf   :  { %v288_v0 = vpack.c.bf16 %v232_v61, %v231_v60  ;;  %v293_v1 = vpack.c.bf16 %v248_v63, %v247_v62 }
 0x1d1   :  { %289 = vst [vmem:[%s511_s5] sm:$0xff] %v288_v0   ;;  %296 = vst [vmem:[%s511_s5 + $0x8] sm:$0xff] %v293_v1  }

// kernel: netg_fwd.13
= control target key start
LH: loop header
LB: loop body
LE: loop exit
PB: predicated region body
PF: predicated region fallthrough
CT: control target
= control target key end

     0   :  { %s839_s17 = smov 0   ;;  %s962_s0 = inlined_call_operand.vmem [shape: bf16[2,16,128], index: 0, kind: input, shape index: {}]   ;;  %s963_s1 = inlined_call_operand.vmem [shape: bf16[128,384], index: 1, kind: input, shape index: {}]   ;;  %s964_s2 = inlined_call_operand.vmem [shape: f32[1,384], index: 2, kind: input, shape index: {}]   ;;  %s965_s3 = inlined_call_operand.<no memory space> [shape: f32[1], index: 3, kind: input, shape index: {}]   ;;  %s966_s4 = inlined_call_operand.vmem [shape: bf16[2,16,128], index: 4, kind: output, shape index: {}]  }
   0x1   :  { %9 = sst [smem:[#allocation2]] %s965_s3 }
   0x2 LB: > { %s654_s18 = sadd.s32 4294967295, %s806_s17   ;;  %p658_p0 = scmp.ge.s32.totalorder %s806_s17, 1  ;;  %s806_s17 = sphi %s839_s17, %s15_s17  }
   0x3   : > { %p163_p1 = scmp.lt.s32.totalorder %s806_s17, 3 }
   0x5   : > { %p164_p2 = pnand %p658_p0, %p163_p1 }
   0x6   : > { %p189_p3 = scmp.lt.s32.totalorder (!%p164_p2), %s654_s18, 1  ;;  %s581_s23 = sld [smem:[#allocation2]] (!%p164_p2) }
   0x7   : > { %167 = sbr.rel (%p164_p2) target bundleno = 970 (0x3ca), region = 36 }
   0xc   : > { %v758_v0 = vld [vmem:[%s963_s1 + $0xac] ss:$12 sps:$4 sm:$0xff]   ;;  %v760_v1 = vld [vmem:[%s963_s1 + $0xa8] ss:$12 sps:$4 sm:$0xff]   ;;  %v808_v2 = vmov 0   ;;  %s968_s18 = smov (!%p189_p3, %s654_s18), 1  ;;  %v236_v19 = vlaneseq }
   0xd   : > { %417 = vmatprep.mubr.bf16.mxu0 %v808_v2  ;;  %385 = vmatprep.subr.bf16.mxu0 %v758_v0  ;;  %v761_v3 = vld [vmem:[%s963_s1 + $0x94] ss:$12 sps:$4 sm:$0xff]   ;;  %v763_v4 = vld [vmem:[%s963_s1 + $0x90] ss:$12 sps:$4 sm:$0xff]   ;;  %v766_v6 = vld [vmem:[%s963_s1 + $0x78] ss:$12 sps:$4 sm:$0xff]  }
   0xe   : > { %386 = vmatpush1.bf16.msra.mxu0 %v760_v1  ;;  %v764_v5 = vld [vmem:[%s963_s1 + $0x7c] ss:$12 sps:$4 sm:$0xff]   ;;  %v767_v7 = vld [vmem:[%s963_s1 + $0x64] ss:$12 sps:$4 sm:$0xff]   ;;  %v769_v8 = vld [vmem:[%s963_s1 + $0x60] ss:$12 sps:$4 sm:$0xff]  }
   0xf   : > { %387 = vmatprep.subr.bf16.mxu0 %v761_v3  ;;  %v770_v9 = vld [vmem:[%s963_s1 + $0x4c] ss:$12 sps:$4 sm:$0xff]   ;;  %v772_v10 = vld [vmem:[%s963_s1 + $0x48] ss:$12 sps:$4 sm:$0xff]   ;;  %v775_v12 = vld [vmem:[%s963_s1 + $0x30] ss:$12 sps:$4 sm:$0xff]  }
  0x10   : > { %v773_v11 = vld [vmem:[%s963_s1 + $0x34] ss:$12 sps:$4 sm:$0xff]   ;;  %v776_v13 = vld [vmem:[%s963_s1 + $0x1c] ss:$12 sps:$4 sm:$0xff]   ;;  %s693_s20 = sshll.u32 %s968_s18, 3  ;;  %v809_v18 = vmov 0.0  }
  0x11   : > { %v778_v14 = vld [vmem:[%s963_s1 + $0x18] ss:$12 sps:$4 sm:$0xff]   ;;  %s193_s26 = scalar_lea.vmem %s962_s0, %s693_s20  ;;  %v781_v16 = vld [vmem:[%s963_s1] ss:$12 sps:$4 sm:$0xff]   ;;  %715 = vmatprep.subr.bf16.mxu1 %v809_v18  ;;  %vm810_vm0 = vmmov 0   ;;  %v908_v20 = vshrl.u32 %v236_v19, 7 }
  0x12   : > { %388 = vmatpush1.bf16.msra.mxu0 %v763_v4  ;;  %v779_v15 = vld [vmem:[%s963_s1 + $0x4] ss:$12 sps:$4 sm:$0xff]   ;;  %731 = vmatprep.mubr.msk.bf16.mxu1 %vm810_vm0, %v809_v18  ;;  %v914_v23 = vld [vmem:[%s964_s2] sm:$0x7]  ;;  %v786_v39 = vld [vmem:[%s963_s1 + $0x68] ss:$12 sps:$4 sm:$0xff]  }
  0x13   : > { %389 = vmatprep.subr.bf16.mxu0 %v764_v5  ;;  %v903_v17 = vld [vmem:[%s193_s26] sm:$0xff]   ;;  %v242_v21 = vsub.s32 1, %v908_v20  ;;  %v238_v27 = vsub.s32 0, %v908_v20  ;;  %v783_v36 = vld [vmem:[%s963_s1 + $0xb0] ss:$12 sps:$4 sm:$0xff]   ;;  %vm513_vm1 = vcmask 130048   ;;  %s198_s26 = scalar_lea.vmem %s966_s4, %s693_s20 }
  0x14   : > { %716 = vmatpush3.bf16.msra.mxu1 %v783_v36  ;;  %v784_v37 = vld [vmem:[%s963_s1 + $0x98] ss:$12 sps:$4 sm:$0xff]   ;;  %v785_v38 = vld [vmem:[%s963_s1 + $0x80] ss:$12 sps:$4 sm:$0xff]   ;;  %v787_v40 = vld [vmem:[%s963_s1 + $0x50] ss:$12 sps:$4 sm:$0xff]  }
  0x15   : > { %v243_v25 = vrot.slane %v914_v23, %v242_v21  ;;  %v239_v32 = vrot.slane %v914_v23, %v238_v27  ;;  %717 = vmatprep.subr.bf16.mxu1 %v809_v18  ;;  %v788_v41 = vld [vmem:[%s963_s1 + $0x38] ss:$12 sps:$4 sm:$0xff]   ;;  %v789_v42 = vld [vmem:[%s963_s1 + $0x20] ss:$12 sps:$4 sm:$0xff]   ;;  %v790_v43 = vld [vmem:[%s963_s1 + $0x8] ss:$12 sps:$4 sm:$0xff]  }
  0x16   : > { %390 = vmatpush1.bf16.msra.mxu0 %v766_v6  ;;  %v246_v61 = vsub.s32 2, %v908_v20 }
  0x17   : > { %391 = vmatprep.subr.bf16.mxu0 %v767_v7 }
  0x18   : > { %718 = vmatpush3.bf16.msra.mxu1 %v784_v37  ;;  %v247_v63 = vrot.slane %v914_v23, %v246_v61 }
  0x19   : > { %719 = vmatprep.subr.bf16.mxu1 %v809_v18 }
  0x1a   : > { %392 = vmatpush1.bf16.msra.mxu0 %v769_v8 }
  0x1b   : > { %393 = vmatprep.subr.bf16.mxu0 %v770_v9 }
  0x1c   : > { %720 = vmatpush3.bf16.msra.mxu1 %v785_v38 }
  0x1d   : > { %721 = vmatprep.subr.bf16.mxu1 %v809_v18 }
  0x1e   : > { %394 = vmatpush1.bf16.msra.mxu0 %v772_v10 }
  0x1f   : > { %395 = vmatprep.subr.bf16.mxu0 %v773_v11 }
  0x20   : > { %722 = vmatpush3.bf16.msra.mxu1 %v786_v39 }
  0x21   : > { %723 = vmatprep.subr.bf16.mxu1 %v809_v18 }
  0x22   : > { %396 = vmatpush1.bf16.msra.mxu0 %v775_v12 }
  0x23   : > { %397 = vmatprep.subr.bf16.mxu0 %v776_v13  ;;  %v582_v13 = vstv %s581_s23 }
  0x24   : > { %724 = vmatpush3.bf16.msra.mxu1 %v787_v40 }
  0x25   : > { %725 = vmatprep.subr.bf16.mxu1 %v809_v18 }
  0x26   : > { %398 = vmatpush1.bf16.msra.mxu0 %v778_v14 }
  0x27   : > { %399 = vmatprep.subr.bf16.mxu0 %v779_v15 }
  0x28   : > { %726 = vmatpush3.bf16.msra.mxu1 %v788_v41 }
  0x29   : > { %727 = vmatprep.subr.bf16.mxu1 %v809_v18 }
  0x2a   : > { %400 = vmatpush1.bf16.msra.mxu0 %v781_v16  ;;  %v585_v16 = vunpack.c.l.bf16 %v903_v17 }
  0x2b   : > { %735 = vmatprep.subr.bf16.mxu0 %v809_v18 }
  0x2c   : > { %728 = vmatpush3.bf16.msra.mxu1 %v789_v42 }
  0x2d   : > { %418 = vmatmul.mubr.bf16.vlgmr.msra.gmra.mxu0 %v903_v17  ;;  %729 = vmatprep.subr.bf16.mxu1 %v809_v18 }
  0x2e   : > { %737 = vmatprep.mubr.msk.bf16.mxu0 %vm810_vm0, %v809_v18 }
  0x30   : > { %730 = vmatpush3.bf16.msra.mxu1 %v790_v43 }
  0x31   : > { %741 = vmatprep.subr.bf16.mxu1 %v809_v18 }
  0x33   : > { %732 = vmatmul.mubr.bf16.vlgmr.msra.gmra.mxu1 %v903_v17 }
  0x34   : > { %743 = vmatprep.mubr.msk.bf16.mxu1 %vm810_vm0, %v809_v18  ;;  %v586_v18 = vunpack.c.h.bf16 %v903_v17 }
  0xed   : > { %v419_v22 = vpop.f32.mrf.mxu0 }
  0xee   : > { %v420_v34 = vadd.f32 %v419_v22, %v239_v32 }
  0xef   : > { %v421_v24 = vpop.f32.mrf.mxu0 }
  0xf0   : > { %v422_v29 = vadd.f32 %v421_v24, %v243_v25 }
  0xf1   : > { %v423_v26 = vpop.f32.mrf.mxu0 }
  0xf2   : > { %v424_v33 = vadd.f32 %v423_v26, %v239_v32 }
  0xf3   : > { %v425_v28 = vpop.f32.mrf.mxu0  ;;  %v462_v60 = vpop.f32.mrf.mxu1 }
  0xf4   : > { %v426_v30 = vadd.f32 %v425_v28, %v243_v25  ;;  %v469_v35 = vpack.c.bf16 %v424_v33, %v420_v34  ;;  %v463_v1 = vadd.f32 %v462_v60, %v247_v63 }
  0xf5   : > { %v733_v62 = vpop.f32.mrf.mxu1 }
  0xf6   : > { %v470_v31 = vpack.c.bf16 %v426_v30, %v422_v29 }
  0xf7   : > { %v465_v0 = vpop.f32.mrf.mxu1 }
  0xf8   : > { %736 = vmatpush3.bf16.xpose.msra.mxu0 %v470_v31  ;;  %v466_v3 = vadd.f32 %v465_v0, %v247_v63 }
  0xf9   : > { %v734_v2 = vpop.f32.mrf.mxu1 }
  0xfa   : > { %v471_v4 = vpack.c.bf16 %v466_v3, %v463_v1 }
  0xfc   : > { %742 = vmatpush3.bf16.msra.mxu1 %v471_v4 }
  0xff   : > { %738 = vmatmul.mubr.bf16.vlgmr.msra.gmra.mxu0 %v469_v35 }
 0x1bf   : > { %v506_v44 = vpop.f32.mrf.mxu0 }
 0x1c0   : > { %v514_v45 = vsel %vm513_vm1, %v506_v44, -inf }
 0x1c1   : > { %515 = vmax.xlane.f32.xlu0 %v514_v45  ;;  %v739_v46 = vpop.f32.mrf.mxu0 }
 0x1c3   : > { %v509_v47 = vpop.f32.mrf.mxu0 }
 0x1c4   : > { %v517_v48 = vsel %vm513_vm1, %v509_v47, -inf }
 0x1c5   : > { %518 = vmax.xlane.f32.xlu0 %v517_v48  ;;  %v740_v49 = vpop.f32.mrf.mxu0 }
 0x24a   : > { %v516_v50 = vpop.xlane.xlu0 %515 }
 0x24b   : > { %v520_v51 = vsub.f32 %v506_v44, %v516_v50 }
 0x24d   : > { %v522_v52 = vmul.f32 1.442695, %v520_v51 }
 0x24e   : > { %v519_v53 = vpop.xlane.xlu0 %518 }
 0x24f   : > { %792 = vpow2.f32 %v522_v52  ;;  %v521_v54 = vsub.f32 %v509_v47, %v519_v53 }
 0x251   : > { %v524_v55 = vmul.f32 1.442695, %v521_v54 }
 0x253   : > { %794 = vpow2.f32 %v524_v55 }
 0x25c   : > { %v793_v56 = vpop.eup %792 }
 0x25d   : > { %v526_v57 = vsel %vm513_vm1, %v793_v56, 0.0 }
 0x25e   : > { %527 = vadd.xlane.f32.xlu1 %v526_v57 }
 0x260   : > { %v795_v58 = vpop.eup %794 }
 0x261   : > { %v529_v59 = vsel %vm513_vm1, %v795_v58, 0.0 }
 0x262   : > { %530 = vadd.xlane.f32.xlu1 %v529_v59 }
 0x2e7   : > { %v528_v5 = vpop.xlane.xlu1 %527 }
 0x2e8   : > { %796 = vrcp.f32 %v528_v5 }
 0x2eb   : > { %v531_v6 = vpop.xlane.xlu1 %530 }
 0x2ec   : > { %798 = vrcp.f32 %v531_v6 }
 0x2f5   : > { %v797_v7 = vpop.eup %796 }
 0x2f6   : > { %v534_v10 = vmul.f32 %v797_v7, %v793_v56 }
 0x2f9   : > { %v799_v8 = vpop.eup %798 }
 0x2fa   : > { %v535_v9 = vmul.f32 %v799_v8, %v795_v58 }
 0x2fc   : > { %v536_v11 = vpack.c.bf16 %v535_v9, %v534_v10 }
 0x2fe   : > { %744 = vmatmul.mubr.msk.bf16.vlgmr.msra.gmra.mxu1 %vm513_vm1, %v536_v11 }
 0x3be   : > { %v574_v12 = vpop.f32.mrf.mxu1 }
 0x3bf   : > { %v583_v15 = vmul.f32 %v582_v13, %v574_v12 }
 0x3c0   : > { %v745_v14 = vpop.f32.mrf.mxu1 }
 0x3c1   : > { %v587_v22 = vadd.f32 %v585_v16, %v583_v15 }
 0x3c2   : > { %v577_v19 = vpop.f32.mrf.mxu1 }
 0x3c3   : > { %v584_v20 = vmul.f32 %v582_v13, %v577_v19 }
 0x3c4   : > { %v746_v21 = vpop.f32.mrf.mxu1 }
 0x3c5   : > { %v588_v23 = vadd.f32 %v586_v18, %v584_v20 }
 0x3c7   : > { %v700_v24 = vpack.c.bf16 %v588_v23, %v587_v22 }
 0x3c9   : > { %701 = vst [vmem:[%s198_s26] sm:$0xff] %v700_v24  }
 0x3ca PF: > { %s15_s17 = sadd.s32 1, %s806_s17  }
 0x3cb   : > { %p12_p4 = scmp.ge.s32.totalorder %s15_s17, 4  }
 0x3cd   :  { %14 = sbr.rel (!%p12_p4) target bundleno = 2 (0x2), region = 66 }

// kernel: netg_fwd.14
= control target key start
LH: loop header
LB: loop body
LE: loop exit
PB: predicated region body
PF: predicated region fallthrough
CT: control target
= control target key end

     0   :  { %s1075_s17 = smov 0   ;;  %s1226_s0 = inlined_call_operand.vmem [shape: bf16[2,64,64], index: 0, kind: input, shape index: {}]   ;;  %s1227_s1 = inlined_call_operand.vmem [shape: bf16[64,384], index: 1, kind: input, shape index: {}]   ;;  %s1228_s2 = inlined_call_operand.vmem [shape: f32[1,384], index: 2, kind: input, shape index: {}]   ;;  %s1229_s3 = inlined_call_operand.<no memory space> [shape: f32[1], index: 3, kind: input, shape index: {}]   ;;  %s1230_s4 = inlined_call_operand.vmem [shape: bf16[2,64,64], index: 4, kind: output, shape index: {}]  }
   0x1   :  { %9 = sst [smem:[#allocation2]] %s1229_s3 }
   0x2 LB: > { %s844_s18 = sadd.s32 4294967295, %s1044_s17   ;;  %p848_p0 = scmp.ge.s32.totalorder %s1044_s17, 1  ;;  %s1044_s17 = sphi %s1075_s17, %s15_s17  }
   0x3   : > { %p163_p1 = scmp.lt.s32.totalorder %s1044_s17, 3 }
   0x5   : > { %p164_p2 = pnand %p848_p0, %p163_p1 }
   0x6   : > { %p189_p3 = scmp.lt.s32.totalorder (!%p164_p2), %s844_s18, 1  ;;  %s722_s23 = sld [smem:[#allocation2]] (!%p164_p2) }
   0x7   : > { %167 = sbr.rel (%p164_p2) target bundleno = 1020 (0x3fc), region = 36 }
   0xc   : > { %v982_v0 = vld [vmem:[%s1227_s1 + $0x4c] ss:$12 sps:$4 sm:$0xff]   ;;  %v984_v1 = vld [vmem:[%s1227_s1 + $0x48] ss:$12 sps:$4 sm:$0xff]   ;;  %v1046_v2 = vmov 0   ;;  %s1232_s18 = smov (!%p189_p3, %s844_s18), 1  ;;  %v226_v13 = vlaneseq }
   0xd   : > { %370 = vmatprep.mubr.bf16.mxu0 %v1046_v2  ;;  %346 = vmatprep.subr.bf16.mxu0 %v982_v0  ;;  %v985_v3 = vld [vmem:[%s1227_s1 + $0x34] ss:$12 sps:$4 sm:$0xff]   ;;  %v987_v4 = vld [vmem:[%s1227_s1 + $0x30] ss:$12 sps:$4 sm:$0xff]   ;;  %s891_s28 = sshll.u32 %s1232_s18, 5  ;;  %vm325_vm0 = vcmask 523264  }
   0xe   : > { %347 = vmatpush1.bf16.msra.mxu0 %v984_v1  ;;  %v988_v5 = vld [vmem:[%s1227_s1 + $0x1c] ss:$12 sps:$4 sm:$0xff]   ;;  %s193_s5 = scalar_lea.vmem %s1226_s0, %s891_s28  ;;  %v990_v6 = vld [vmem:[%s1227_s1 + $0x18] ss:$12 sps:$4 sm:$0xff]   ;;  %v993_v9 = vld [vmem:[%s1227_s1] ss:$12 sps:$4 sm:$0xff]   ;;  %s1200_s26 = scalar_lea.vmem %s1230_s4, %s891_s28 }
   0xf   : > { %348 = vmatprep.subr.bf16.mxu0 %v985_v3  ;;  %v1109_v7 = vld [vmem:[%s193_s5] sm:$0xff]   ;;  %v1121_v10 = vld [vmem:[%s193_s5 + $0x8] sm:$0xff]   ;;  %v1125_v11 = vld [vmem:[%s193_s5 + $0x10] sm:$0xff]   ;;  %v1133_v14 = vshrl.u32 %v226_v13, 7  ;;  %vm780_vm1 = vcmask 519168  }
  0x10   : > { %v991_v8 = vld [vmem:[%s1227_s1 + $0x4] ss:$12 sps:$4 sm:$0xff]   ;;  %933 = vmatprep.mubr.msk.bf16.mxu1 %vm325_vm0, %v1109_v7  ;;  %v1129_v12 = vld [vmem:[%s193_s5 + $0x18] sm:$0xff]   ;;  %v1139_v16 = vld [vmem:[%s1228_s2] sm:$0x7] }
  0x11   : > { %v228_v15 = vsub.s32 0, %v1133_v14  ;;  %v232_v34 = vsub.s32 1, %v1133_v14  ;;  %v998_v60 = vld [vmem:[%s1227_s1 + $0x50] ss:$12 sps:$4 sm:$0xff]   ;;  %v999_v61 = vld [vmem:[%s1227_s1 + $0x38] ss:$12 sps:$4 sm:$0xff]  }
  0x12   : > { %349 = vmatpush1.bf16.msra.mxu0 %v987_v4  ;;  %925 = vmatprep.subr.bf16.mxu1 %v998_v60  ;;  %v1000_v62 = vld [vmem:[%s1227_s1 + $0x20] ss:$12 sps:$4 sm:$0xff]   ;;  %v1001_v63 = vld [vmem:[%s1227_s1 + $0x8] ss:$12 sps:$4 sm:$0xff]  }
  0x13   : > { %350 = vmatprep.subr.bf16.mxu0 %v988_v5  ;;  %v229_v18 = vrot.slane %v1139_v16, %v228_v15  ;;  %v233_v37 = vrot.slane %v1139_v16, %v232_v34  ;;  %926 = vmatpush3.bf16.msra.mxu1 %v998_v60 }
  0x14   : > { %927 = vmatprep.subr.bf16.mxu1 %v999_v61 }
  0x16   : > { %351 = vmatpush1.bf16.msra.mxu0 %v990_v6 }
  0x17   : > { %352 = vmatprep.subr.bf16.mxu0 %v991_v8  ;;  %928 = vmatpush3.bf16.msra.mxu1 %v999_v61 }
  0x18   : > { %929 = vmatprep.subr.bf16.mxu1 %v1000_v62 }
  0x1a   : > { %353 = vmatpush1.bf16.msra.mxu0 %v993_v9 }
  0x1b   : > { %930 = vmatpush3.bf16.msra.mxu1 %v1000_v62 }
  0x1c   : > { %931 = vmatprep.subr.bf16.mxu1 %v1001_v63 }
  0x1d   : > { %869 = vmatmul.mubr.msk.bf16.vlgmr.msra.gmra.mxu0 %vm325_vm0, %v1109_v7 }
  0x1e   : > { %380 = vmatprep.mubr.bf16.mxu0 %v1046_v2 }
  0x1f   : > { %932 = vmatpush3.bf16.msra.mxu1 %v1001_v63 }
  0x22   : > { %934 = vmatmul.mubr.msk.bf16.vlgmr.msra.gmra.mxu1 %vm325_vm0, %v1121_v10 }
  0x23   : > { %937 = vmatprep.mubr.msk.bf16.mxu1 %vm325_vm0, %v1125_v11 }
  0x25   : > { %870 = vmatmul.mubr.msk.bf16.gmra.mxu0 %vm325_vm0, %v1121_v10 }
  0x26   : > { %390 = vmatprep.mubr.bf16.mxu0 %v1046_v2 }
  0x2a   : > { %938 = vmatmul.mubr.msk.bf16.gmra.mxu1 %vm325_vm0, %v1129_v12 }
  0x2d   : > { %871 = vmatmul.mubr.msk.bf16.gmra.mxu0 %vm325_vm0, %v1125_v11 }
  0x2e   : > { %400 = vmatprep.mubr.bf16.mxu0 %v1046_v2 }
  0x35   : > { %872 = vmatmul.mubr.msk.bf16.gmra.mxu0 %vm325_vm0, %v1129_v12 }
  0xdd   : > { %v372_v17 = vpop.f32.mrf.mxu0 }
  0xde   : > { %v373_v21 = vadd.f32 %v372_v17, %v229_v18 }
  0xdf   : > { %v374_v19 = vpop.f32.mrf.mxu0 }
  0xe0   : > { %v375_v49 = vadd.f32 %v374_v19, %v233_v37 }
  0xe1   : > { %v376_v20 = vpop.f32.mrf.mxu0 }
  0xe2   : > { %v377_v22 = vadd.f32 %v376_v20, %v229_v18 }
  0xe3   : > { %v378_v23 = vpop.f32.mrf.mxu0 }
  0xe4   : > { %v476_v24 = vpack.c.bf16 %v377_v22, %v373_v21  ;;  %v379_v48 = vadd.f32 %v378_v23, %v233_v37  ;;  %v935_v22 = vpop.f32.mrf.mxu1 }
  0xe5   : > { %v382_v25 = vpop.f32.mrf.mxu0 }
  0xe6   : > { %949 = vmatprep.mubr.bf16.mxu0 %v476_v24  ;;  %v480_v50 = vpack.c.bf16 %v379_v48, %v375_v49  ;;  %v383_v53 = vadd.f32 %v382_v25, %v229_v18  ;;  %v445_v23 = vpop.f32.mrf.mxu1  ;;  %v236_v24 = vsub.s32 2, %v1133_v14 }
  0xe7   : > { %v384_v26 = vpop.f32.mrf.mxu0 }
  0xe8   : > { %v385_v46 = vadd.f32 %v384_v26, %v233_v37  ;;  %v936_v25 = vpop.f32.mrf.mxu1 }
  0xe9   : > { %v386_v27 = vpop.f32.mrf.mxu0 }
  0xea   : > { %v387_v51 = vadd.f32 %v386_v27, %v229_v18  ;;  %v448_v26 = vpop.f32.mrf.mxu1  ;;  %v237_v27 = vrot.slane %v1139_v16, %v236_v24 }
  0xeb   : > { %v388_v28 = vpop.f32.mrf.mxu0 }
  0xec   : > { %v389_v45 = vadd.f32 %v388_v28, %v233_v37  ;;  %v477_v55 = vpack.c.bf16 %v387_v51, %v383_v53  ;;  %v939_v28 = vpop.f32.mrf.mxu1 }
  0xed   : > { %v392_v29 = vpop.f32.mrf.mxu0 }
  0xee   : > { %v481_v47 = vpack.c.bf16 %v389_v45, %v385_v46  ;;  %v393_v54 = vadd.f32 %v392_v29, %v229_v18  ;;  %v461_v29 = vpop.f32.mrf.mxu1 }
  0xef   : > { %v394_v30 = vpop.f32.mrf.mxu0 }
  0xf0   : > { %v395_v42 = vadd.f32 %v394_v30, %v233_v37  ;;  %v470_v30 = vadd.f32 %v939_v28, %v237_v27 }
  0xf1   : > { %v396_v31 = vpop.f32.mrf.mxu0 }
  0xf2   : > { %v397_v52 = vadd.f32 %v396_v31, %v229_v18  ;;  %v940_v31 = vpop.f32.mrf.mxu1 }
  0xf3   : > { %v398_v32 = vpop.f32.mrf.mxu0 }
  0xf4   : > { %v399_v39 = vadd.f32 %v398_v32, %v233_v37  ;;  %v478_v56 = vpack.c.bf16 %v397_v52, %v393_v54  ;;  %v462_v32 = vadd.f32 %v461_v29, %v237_v27  ;;  %v464_v34 = vpop.f32.mrf.mxu1 }
  0xf5   : > { %v402_v33 = vpop.f32.mrf.mxu0 }
  0xf6   : > { %v482_v44 = vpack.c.bf16 %v399_v39, %v395_v42  ;;  %v403_v58 = vadd.f32 %v402_v33, %v229_v18  ;;  %v473_v33 = vadd.f32 %v940_v31, %v237_v27 }
  0xf7   : > { %v404_v35 = vpop.f32.mrf.mxu0 }
  0xf8   : > { %v405_v40 = vadd.f32 %v404_v35, %v233_v37  ;;  %v454_v35 = vadd.f32 %v935_v22, %v237_v27 }
  0xf9   : > { %v406_v36 = vpop.f32.mrf.mxu0 }
  0xfa   : > { %v407_v57 = vadd.f32 %v406_v36, %v229_v18  ;;  %v457_v36 = vadd.f32 %v936_v25, %v237_v27 }
  0xfb   : > { %v408_v38 = vpop.f32.mrf.mxu0 }
  0xfc   : > { %v409_v41 = vadd.f32 %v408_v38, %v233_v37  ;;  %v479_v59 = vpack.c.bf16 %v407_v57, %v403_v58  ;;  %v487_v37 = vpack.c.bf16 %v473_v33, %v470_v30  ;;  %v465_v38 = vadd.f32 %v464_v34, %v237_v27 }
  0xfd   : > { %v485_v14 = vpack.c.bf16 %v457_v36, %v454_v35 }
  0xfe   : > { %v483_v43 = vpack.c.bf16 %v409_v41, %v405_v40  ;;  %v486_v39 = vpack.c.bf16 %v465_v38, %v462_v32  ;;  %957 = vmatprep.subr.bf16.mxu1 %v487_v37  ;;  %v446_v40 = vadd.f32 %v445_v23, %v237_v27  ;;  %v449_v41 = vadd.f32 %v448_v26, %v237_v27 }
  0xff   : > { %958 = vmatpush3.bf16.msra.mxu1 %v487_v37 }
 0x100   : > { %941 = vmatprep.subr.bf16.mxu0 %v483_v43  ;;  %959 = vmatprep.subr.bf16.mxu1 %v486_v39  ;;  %v484_v16 = vpack.c.bf16 %v449_v41, %v446_v40 }
 0x101   : > { %942 = vmatpush3.bf16.xpose.msra.mxu0 %v483_v43 }
 0x102   : > { %943 = vmatprep.subr.bf16.mxu0 %v482_v44 }
 0x103   : > { %960 = vmatpush3.bf16.msra.mxu1 %v486_v39 }
 0x104   : > { %961 = vmatprep.subr.bf16.mxu1 %v485_v14 }
 0x107   : > { %962 = vmatpush3.bf16.msra.mxu1 %v485_v14 }
 0x108   : > { %963 = vmatprep.subr.bf16.mxu1 %v484_v16 }
 0x109   : > { %944 = vmatpush3.bf16.xpose.msra.mxu0 %v482_v44 }
 0x10a   : > { %945 = vmatprep.subr.bf16.mxu0 %v481_v47 }
 0x10b   : > { %964 = vmatpush3.bf16.msra.mxu1 %v484_v16 }
 0x111   : > { %946 = vmatpush3.bf16.xpose.msra.mxu0 %v481_v47 }
 0x112   : > { %947 = vmatprep.subr.bf16.mxu0 %v480_v50 }
 0x119   : > { %948 = vmatpush3.bf16.xpose.msra.mxu0 %v480_v50 }
 0x120   : > { %950 = vmatmul.mubr.bf16.vlgmr.msra.gmra.mxu0 %v477_v55 }
 0x121   : > { %953 = vmatprep.mubr.bf16.mxu0 %v478_v56 }
 0x128   : > { %954 = vmatmul.mubr.bf16.gmra.mxu0 %v479_v59 }
 0x1e0   : > { %v951_v0 = vpop.f32.mrf.mxu0 }
 0x1e1   : > { %v559_v1 = vsel %vm325_vm0, %v951_v0, -inf }
 0x1e2   : > { %560 = vmax.xlane.f32.xlu1 %v559_v1  ;;  %v522_v2 = vpop.f32.mrf.mxu0 }
 0x1e3   : > { %v553_v3 = vsel %vm325_vm0, %v522_v2, -inf }
 0x1e4   : > { %554 = vmax.xlane.f32.xlu0 %v553_v3  ;;  %v952_v4 = vpop.f32.mrf.mxu0 }
 0x1e5   : > { %v562_v5 = vsel %vm325_vm0, %v952_v4, -inf }
 0x1e6   : > { %563 = vmax.xlane.f32.xlu1 %v562_v5  ;;  %v525_v6 = vpop.f32.mrf.mxu0 }
 0x1e7   : > { %v556_v8 = vsel %vm325_vm0, %v525_v6, -inf }
 0x1e8   : > { %557 = vmax.xlane.f32.xlu0 %v556_v8  ;;  %v1166_v9 = vpop.f32.mrf.mxu0 }
 0x1e9   : > { %v571_v19 = vsel %vm325_vm0, %v1166_v9, -inf }
 0x1ea   : > { %v538_v13 = vpop.f32.mrf.mxu0 }
 0x1eb   : > { %v565_v15 = vsel %vm325_vm0, %v538_v13, -inf }
 0x1ec   : > { %566 = vmax.xlane.f32.xlu0 %v565_v15  ;;  %v1169_v17 = vpop.f32.mrf.mxu0 }
 0x1ed   : > { %v574_v21 = vsel %vm325_vm0, %v1169_v17, -inf }
 0x1ee   : > { %v541_v18 = vpop.f32.mrf.mxu0 }
 0x1ef   : > { %v568_v20 = vsel %vm325_vm0, %v541_v18, -inf }
 0x1f0   : > { %572 = vmax.xlane.f32.xlu0 %v571_v19  ;;  %569 = vmax.xlane.f32.xlu1 %v568_v20 }
 0x1f4   : > { %575 = vmax.xlane.f32.xlu1 %v574_v21 }
 0x26b   : > { %v561_v42 = vpop.xlane.xlu1 %560 }
 0x26c   : > { %v579_v43 = vsub.f32 %v951_v0, %v561_v42 }
 0x26d   : > { %v555_v44 = vpop.xlane.xlu0 %554 }
 0x26e   : > { %v577_v45 = vsub.f32 %v522_v2, %v555_v44  ;;  %v589_v47 = vmul.f32 1.442695, %v579_v43 }
 0x26f   : > { %v564_v46 = vpop.xlane.xlu1 %563 }
 0x270   : > { %v585_v48 = vmul.f32 1.442695, %v577_v45  ;;  %v580_v49 = vsub.f32 %v952_v4, %v564_v46 }
 0x271   : > { %v558_v50 = vpop.xlane.xlu0 %557 }
 0x272   : > { %1006 = vpow2.f32 %v585_v48  ;;  %v578_v51 = vsub.f32 %v525_v6, %v558_v50  ;;  %v591_v52 = vmul.f32 1.442695, %v580_v49  ;;  %v723_v50 = vstv %s722_s23 }
 0x273   : > { %1008 = vpow2.f32 %v589_v47 }
 0x274   : > { %v587_v53 = vmul.f32 1.442695, %v578_v51  ;;  %v734_v51 = vunpack.c.l.bf16 %v1121_v10 }
 0x275   : > { %v567_v54 = vpop.xlane.xlu0 %566 }
 0x276   : > { %1010 = vpow2.f32 %v587_v53  ;;  %v581_v55 = vsub.f32 %v538_v13, %v567_v54  ;;  %v732_v54 = vunpack.c.l.bf16 %v1109_v7 }
 0x277   : > { %1012 = vpow2.f32 %v591_v52 }
 0x278   : > { %v593_v56 = vmul.f32 1.442695, %v581_v55 }
 0x279   : > { %v573_v57 = vpop.xlane.xlu0 %572  ;;  %v570_v58 = vpop.xlane.xlu1 %569 }
 0x27a   : > { %1014 = vpow2.f32 %v593_v56  ;;  %v583_v59 = vsub.f32 %v1166_v9, %v573_v57  ;;  %v582_v60 = vsub.f32 %v541_v18, %v570_v58  ;;  %v735_v58 = vunpack.c.h.bf16 %v1121_v10 }
 0x27c   : > { %v597_v61 = vmul.f32 1.442695, %v583_v59  ;;  %v595_v62 = vmul.f32 1.442695, %v582_v60 }
 0x27d   : > { %v576_v63 = vpop.xlane.xlu1 %575 }
 0x27e   : > { %1016 = vpow2.f32 %v597_v61  ;;  %v584_v0 = vsub.f32 %v1169_v17, %v576_v63  ;;  %v733_v63 = vunpack.c.h.bf16 %v1109_v7 }
 0x27f   : > { %v1007_v1 = vpop.eup %1006  ;;  %1018 = vpow2.f32 %v595_v62 }
 0x280   : > { %v599_v2 = vmul.f32 1.442695, %v584_v0  ;;  %v601_v3 = vsel %vm325_vm0, %v1007_v1, 0.0  ;;  %v1009_v4 = vpop.eup %1008 }
 0x281   : > { %602 = vadd.xlane.f32.xlu0 %v601_v3  ;;  %v607_v6 = vsel %vm325_vm0, %v1009_v4, 0.0  ;;  %v738_v3 = vunpack.c.l.bf16 %v1129_v12 }
 0x282   : > { %1020 = vpow2.f32 %v599_v2 }
 0x283   : > { %v1011_v5 = vpop.eup %1010 }
 0x284   : > { %v604_v8 = vsel %vm325_vm0, %v1011_v5, 0.0  ;;  %v1013_v9 = vpop.eup %1012 }
 0x285   : > { %608 = vadd.xlane.f32.xlu0 %v607_v6  ;;  %605 = vadd.xlane.f32.xlu1 %v604_v8  ;;  %v610_v17 = vsel %vm325_vm0, %v1013_v9, 0.0 }
 0x287   : > { %v1015_v13 = vpop.eup %1014 }
 0x288   : > { %v613_v15 = vsel %vm325_vm0, %v1015_v13, 0.0 }
 0x289   : > { %614 = vadd.xlane.f32.xlu0 %v613_v15  ;;  %611 = vadd.xlane.f32.xlu1 %v610_v17 }
 0x28b   : > { %v1017_v18 = vpop.eup %1016 }
 0x28c   : > { %v1019_v19 = vpop.eup %1018  ;;  %v619_v20 = vsel %vm325_vm0, %v1017_v18, 0.0 }
 0x28d   : > { %620 = vadd.xlane.f32.xlu0 %v619_v20  ;;  %v616_v21 = vsel %vm325_vm0, %v1019_v19, 0.0 }
 0x28e   : > { %617 = vadd.xlane.f32.xlu1 %v616_v21 }
 0x28f   : > { %v1021_v22 = vpop.eup %1020 }
 0x290   : > { %v622_v23 = vsel %vm325_vm0, %v1021_v22, 0.0 }
 0x292   : > { %623 = vadd.xlane.f32.xlu1 %v622_v23  ;;  %v737_v23 = vunpack.c.h.bf16 %v1125_v11 }
 0x30a   : > { %v603_v24 = vpop.xlane.xlu0 %602 }
 0x30b   : > { %1022 = vrcp.f32 %v603_v24 }
 0x30e   : > { %v609_v25 = vpop.xlane.xlu0 %608  ;;  %v606_v26 = vpop.xlane.xlu1 %605 }
 0x30f   : > { %1024 = vrcp.f32 %v606_v26 }
 0x310   : > { %1026 = vrcp.f32 %v609_v25 }
 0x312   : > { %v615_v27 = vpop.xlane.xlu0 %614  ;;  %v612_v28 = vpop.xlane.xlu1 %611 }
 0x313   : > { %1028 = vrcp.f32 %v612_v28 }
 0x314   : > { %1030 = vrcp.f32 %v615_v27 }
 0x316   : > { %v621_v29 = vpop.xlane.xlu0 %620 }
 0x317   : > { %v618_v30 = vpop.xlane.xlu1 %617 }
 0x318   : > { %1032 = vrcp.f32 %v618_v30  ;;  %v1023_v31 = vpop.eup %1022 }
 0x319   : > { %1034 = vrcp.f32 %v621_v29  ;;  %v633_v34 = vmul.f32 %v1023_v31, %v1007_v1 }
 0x31b   : > { %v624_v32 = vpop.xlane.xlu1 %623 }
 0x31c   : > { %1036 = vrcp.f32 %v624_v32  ;;  %v1025_v33 = vpop.eup %1024 }
 0x31d   : > { %v634_v35 = vmul.f32 %v1025_v33, %v1011_v5  ;;  %v1027_v36 = vpop.eup %1026 }
 0x31e   : > { %v635_v39 = vmul.f32 %v1027_v36, %v1009_v4 }
 0x31f   : > { %v641_v37 = vpack.c.bf16 %v634_v35, %v633_v34 }
 0x320   : > { %v1029_v38 = vpop.eup %1028 }
 0x321   : > { %v636_v40 = vmul.f32 %v1029_v38, %v1013_v9  ;;  %965 = vmatprep.mubr.msk.bf16.mxu1 %vm325_vm0, %v641_v37  ;;  %v1031_v14 = vpop.eup %1030  ;;  %v736_v9 = vunpack.c.l.bf16 %v1125_v11 }
 0x322   : > { %v637_v42 = vmul.f32 %v1031_v14, %v1015_v13 }
 0x323   : > { %v642_v41 = vpack.c.bf16 %v636_v40, %v635_v39 }
 0x325   : > { %v1033_v16 = vpop.eup %1032  ;;  %966 = vmatmul.mubr.msk.bf16.vlgmr.msra.gmra.mxu1 %vm325_vm0, %v642_v41 }
 0x326   : > { %v638_v43 = vmul.f32 %v1033_v16, %v1019_v19  ;;  %v1035_v44 = vpop.eup %1034 }
 0x327   : > { %v639_v47 = vmul.f32 %v1035_v44, %v1017_v18  ;;  %v739_v18 = vunpack.c.h.bf16 %v1129_v12 }
 0x328   : > { %v643_v45 = vpack.c.bf16 %v638_v43, %v637_v42 }
 0x329   : > { %v1037_v46 = vpop.eup %1036 }
 0x32a   : > { %969 = vmatprep.mubr.msk.bf16.mxu1 %vm325_vm0, %v643_v45  ;;  %v640_v48 = vmul.f32 %v1037_v46, %v1021_v22 }
 0x32c   : > { %v644_v49 = vpack.c.bf16 %v640_v48, %v639_v47 }
 0x32e   : > { %970 = vmatmul.mubr.msk.bf16.gmra.mxu1 %vm325_vm0, %v644_v49 }
 0x3e5   : > { %v967_v52 = vpop.f32.mrf.mxu1 }
 0x3e6   : > { %v726_v53 = vmul.f32 %v967_v52, %v723_v50 }
 0x3e7   : > { %v691_v55 = vpop.f32.mrf.mxu1 }
 0x3e8   : > { %v742_v56 = vadd.f32 %v734_v51, %v726_v53  ;;  %v724_v57 = vmul.f32 %v723_v50, %v691_v55 }
 0x3e9   : > { %v968_v59 = vpop.f32.mrf.mxu1 }
 0x3ea   : > { %v895_v60 = vpack.c.bf16 %v742_v56, %v742_v56  ;;  %v740_v61 = vadd.f32 %v732_v54, %v724_v57  ;;  %v727_v62 = vmul.f32 %v968_v59, %v723_v50 }
 0x3eb   : > { %v694_v0 = vpop.f32.mrf.mxu1 }
 0x3ec   : > { %783 = vst.msk [vmem:[%s1200_s26 + $0x8] sm:$0xf] %vm780_vm1, %v895_v60  ;;  %v893_v10 = vpack.c.bf16 %v740_v61, %v740_v61  ;;  %v743_v1 = vadd.f32 %v735_v58, %v727_v62  ;;  %v725_v2 = vmul.f32 %v723_v50, %v694_v0 }
 0x3ee   : > { %v971_v4 = vpop.f32.mrf.mxu1  ;;  %781 = vst.msk [vmem:[%s1200_s26] sm:$0xf] %vm780_vm1, %v893_v10  ;;  %v896_v5 = vpack.c.bf16 %v743_v1, %v743_v1  ;;  %v741_v6 = vadd.f32 %v733_v63, %v725_v2 }
 0x3ef   : > { %v730_v8 = vmul.f32 %v971_v4, %v723_v50 }
 0x3f0   : > { %v707_v13 = vpop.f32.mrf.mxu1  ;;  %784 = vst.msk [vmem:[%s1200_s26 + $0xc] sm:$0xf] %vm780_vm1, %v896_v5  ;;  %v894_v7 = vpack.c.bf16 %v741_v6, %v741_v6 }
 0x3f1   : > { %v746_v15 = vadd.f32 %v738_v3, %v730_v8  ;;  %v728_v17 = vmul.f32 %v723_v50, %v707_v13 }
 0x3f2   : > { %v972_v19 = vpop.f32.mrf.mxu1  ;;  %782 = vst.msk [vmem:[%s1200_s26 + $0x4] sm:$0xf] %vm780_vm1, %v894_v7 }
 0x3f3   : > { %v899_v20 = vpack.c.bf16 %v746_v15, %v746_v15  ;;  %v744_v21 = vadd.f32 %v736_v9, %v728_v17  ;;  %v731_v22 = vmul.f32 %v972_v19, %v723_v50 }
 0x3f4   : > { %v710_v24 = vpop.f32.mrf.mxu1 }
 0x3f5   : > { %787 = vst.msk [vmem:[%s1200_s26 + $0x18] sm:$0xf] %vm780_vm1, %v899_v20  ;;  %v897_v25 = vpack.c.bf16 %v744_v21, %v744_v21  ;;  %v747_v26 = vadd.f32 %v739_v18, %v731_v22  ;;  %v729_v27 = vmul.f32 %v723_v50, %v710_v24 }
 0x3f7   : > { %785 = vst.msk [vmem:[%s1200_s26 + $0x10] sm:$0xf] %vm780_vm1, %v897_v25  ;;  %v900_v28 = vpack.c.bf16 %v747_v26, %v747_v26  ;;  %v745_v29 = vadd.f32 %v737_v23, %v729_v27 }
 0x3f9   : > { %788 = vst.msk [vmem:[%s1200_s26 + $0x1c] sm:$0xf] %vm780_vm1, %v900_v28  ;;  %v898_v12 = vpack.c.bf16 %v745_v29, %v745_v29 }
 0x3fb   : > { %786 = vst.msk [vmem:[%s1200_s26 + $0x14] sm:$0xf] %vm780_vm1, %v898_v12 }
 0x3fc PF: > { %s15_s17 = sadd.s32 1, %s1044_s17  }
 0x3fd   : > { %p12_p4 = scmp.ge.s32.totalorder %s15_s17, 4  }
 0x3ff   :  { %14 = sbr.rel (!%p12_p4) target bundleno = 2 (0x2), region = 66 }

// kernel: netg_fwd.15
= control target key start
LH: loop header
LB: loop body
LE: loop exit
PB: predicated region body
PF: predicated region fallthrough
CT: control target
= control target key end

     0   :  { %s2643_s17 = smov 0   ;;  %s3714_s0 = inlined_call_operand.vmem [shape: bf16[2,256,32], index: 0, kind: input, shape index: {}]   ;;  %s3715_s1 = inlined_call_operand.vmem [shape: bf16[32,384], index: 1, kind: input, shape index: {}]   ;;  %s3716_s2 = inlined_call_operand.vmem [shape: f32[1,384], index: 2, kind: input, shape index: {}]   ;;  %s3717_s3 = inlined_call_operand.<no memory space> [shape: f32[1], index: 3, kind: input, shape index: {}]   ;;  %s3718_s4 = inlined_call_operand.vmem [shape: bf16[2,256,32], index: 4, kind: output, shape index: {}]  }
   0x1   :  { %9 = sst [smem:[#allocation2]] %s3717_s3 }
   0x2 LB: > { %s2000_s18 = sadd.s32 4294967295, %s2612_s17   ;;  %p2004_p0 = scmp.ge.s32.totalorder %s2612_s17, 1  ;;  %s2612_s17 = sphi %s2643_s17, %s15_s17  }
   0x3   : > { %p163_p1 = scmp.lt.s32.totalorder %s2612_s17, 3 }
   0x5   : > { %p164_p2 = pnand %p2004_p0, %p163_p1 }
   0x7   : > { %167 = sbr.rel (%p164_p2) target bundleno = 1257 (0x4e9), region = 36 }
   0xc   : > { %v2358_v0 = vld [vmem:[%s3715_s1 + $0x1c] ss:$12 sps:$4 sm:$0xff]   ;;  %p189_p3 = scmp.lt.s32.totalorder %s2000_s18, 1  ;;  %v2360_v1 = vld [vmem:[%s3715_s1 + $0x18] ss:$12 sps:$4 sm:$0xff]   ;;  %v2614_v2 = vmov 0   ;;  %v242_v23 = vlaneseq }
   0xd   : > { %450 = vmatprep.mubr.bf16.mxu0 %v2614_v2  ;;  %570 = vmatprep.mubr.bf16.mxu1 %v2614_v2  ;;  %v2361_v3 = vld [vmem:[%s3715_s1 + $0x4] ss:$12 sps:$4 sm:$0xff]   ;;  %v2363_v4 = vld [vmem:[%s3715_s1] ss:$12 sps:$4 sm:$0xff]   ;;  %vm369_vm0 = vcmask 261120   ;;  %s1686_s10 = sld [smem:[#allocation2]] }
   0xe   : > { %430 = vmatprep.subr.bf16.mxu0 %v2358_v0  ;;  %s3804_s18 = smov (!%p189_p3, %s2000_s18), 1  ;;  %2345 = vmatprep.subr.bf16.mxu1 %v2358_v0  ;;  %v2380_v5 = vld [vmem:[%s3715_s1 + $0x20] ss:$12 sps:$4 sm:$0xff]   ;;  %v2381_v8 = vld [vmem:[%s3715_s1 + $0x8] ss:$12 sps:$4 sm:$0xff]   ;;  %v2743_v24 = vshrl.u32 %v242_v23, 7 }
   0xf   : > { %431 = vmatpush1.bf16.msra.mxu0 %v2360_v1  ;;  %2347 = vmatpush1.bf16.msra.mxu1 %v2360_v1  ;;  %s2097_s28 = sshll.u32 %s3804_s18, 7  ;;  %v2749_v26 = vld [vmem:[%s3716_s2] sm:$0x7]  ;;  %vm1912_vm1 = vcmask 257024  }
  0x10   : > { %432 = vmatprep.subr.bf16.mxu0 %v2361_v3  ;;  %2346 = vmatprep.subr.bf16.mxu1 %v2361_v3  ;;  %s2676_s5 = scalar_lea.vmem %s3714_s0, %s2097_s28  ;;  %v244_v25 = vsub.s32 0, %v2743_v24  ;;  %v248_v27 = vsub.s32 1, %v2743_v24  ;;  %s3599_s13 = scalar_lea.vmem %s3718_s4, %s2097_s28 }
  0x11   : > { %v200_v6 = vld [vmem:[%s2676_s5] sm:$0xff]   ;;  %v202_v9 = vld [vmem:[%s2676_s5 + $0x8] sm:$0xff]   ;;  %v204_v11 = vld [vmem:[%s2676_s5 + $0x10] sm:$0xff]  }
  0x12   : > { %v224_v7 = vld [vmem:[%s2676_s5 + $0x60] sm:$0xff]   ;;  %v226_v10 = vld [vmem:[%s2676_s5 + $0x68] sm:$0xff]   ;;  %v228_v12 = vld [vmem:[%s2676_s5 + $0x70] sm:$0xff]   ;;  %v2753_v30 = vrot.slane %v2749_v26, %v244_v25  ;;  %v2756_v31 = vrot.slane %v2749_v26, %v248_v27 }
  0x13   : > { %433 = vmatpush1.bf16.msra.mxu0 %v2363_v4  ;;  %2348 = vmatpush1.bf16.msra.mxu1 %v2363_v4  ;;  %v206_v13 = vld [vmem:[%s2676_s5 + $0x18] sm:$0xff]   ;;  %v208_v15 = vld [vmem:[%s2676_s5 + $0x20] sm:$0xff]   ;;  %v210_v16 = vld [vmem:[%s2676_s5 + $0x28] sm:$0xff]  }
  0x14   : > { %2309 = vmatprep.subr.bf16.mxu1 %v2380_v5  ;;  %v230_v14 = vld [vmem:[%s2676_s5 + $0x78] sm:$0xff]   ;;  %v212_v17 = vld [vmem:[%s2676_s5 + $0x30] sm:$0xff]   ;;  %v216_v19 = vld [vmem:[%s2676_s5 + $0x40] sm:$0xff]  }
  0x15   : > { %v214_v18 = vld [vmem:[%s2676_s5 + $0x38] sm:$0xff]   ;;  %v218_v20 = vld [vmem:[%s2676_s5 + $0x48] sm:$0xff]   ;;  %v220_v21 = vld [vmem:[%s2676_s5 + $0x50] sm:$0xff]  }
  0x16   : > { %2031 = vmatmul.mubr.msk.bf16.vlgmr.msra.gmra.mxu0 %vm369_vm0, %v200_v6  ;;  %2043 = vmatmul.mubr.msk.bf16.vlgmr.msra.gmra.mxu1 %vm369_vm0, %v224_v7  ;;  %v222_v22 = vld [vmem:[%s2676_s5 + $0x58] sm:$0xff]  }
  0x17   : > { %460 = vmatprep.mubr.bf16.mxu0 %v2614_v2  ;;  %580 = vmatprep.mubr.bf16.mxu1 %v2614_v2 }
  0x18   : > { %2310 = vmatpush3.bf16.msra.mxu1 %v2380_v5 }
  0x19   : > { %2311 = vmatprep.subr.bf16.mxu1 %v2381_v8 }
  0x1c   : > { %2312 = vmatpush3.bf16.msra.mxu1 %v2381_v8 }
  0x1e   : > { %2032 = vmatmul.mubr.msk.bf16.gmra.mxu0 %vm369_vm0, %v202_v9  ;;  %2044 = vmatmul.mubr.msk.bf16.gmra.mxu1 %vm369_vm0, %v226_v10 }
  0x1f   : > { %470 = vmatprep.mubr.bf16.mxu0 %v2614_v2  ;;  %590 = vmatprep.mubr.bf16.mxu1 %v2614_v2 }
  0x26   : > { %2033 = vmatmul.mubr.msk.bf16.gmra.mxu0 %vm369_vm0, %v204_v11  ;;  %2045 = vmatmul.mubr.msk.bf16.gmra.mxu1 %vm369_vm0, %v228_v12 }
  0x27   : > { %480 = vmatprep.mubr.bf16.mxu0 %v2614_v2  ;;  %600 = vmatprep.mubr.bf16.mxu1 %v2614_v2 }
  0x2e   : > { %2034 = vmatmul.mubr.msk.bf16.gmra.mxu0 %vm369_vm0, %v206_v13  ;;  %2046 = vmatmul.mubr.msk.bf16.gmra.mxu1 %vm369_vm0, %v230_v14 }
  0x2f   : > { %490 = vmatprep.mubr.bf16.mxu0 %v2614_v2  ;;  %2313 = vmatprep.mubr.msk.bf16.mxu1 %vm369_vm0, %v200_v6 }
  0x36   : > { %2035 = vmatmul.mubr.msk.bf16.gmra.mxu0 %vm369_vm0, %v208_v15  ;;  %2314 = vmatmul.mubr.msk.bf16.vlgmr.msra.gmra.mxu1 %vm369_vm0, %v202_v9 }
  0x37   : > { %500 = vmatprep.mubr.bf16.mxu0 %v2614_v2  ;;  %2317 = vmatprep.mubr.msk.bf16.mxu1 %vm369_vm0, %v204_v11 }
  0x3e   : > { %2036 = vmatmul.mubr.msk.bf16.gmra.mxu0 %vm369_vm0, %v210_v16  ;;  %2318 = vmatmul.mubr.msk.bf16.gmra.mxu1 %vm369_vm0, %v206_v13 }
  0x3f   : > { %510 = vmatprep.mubr.bf16.mxu0 %v2614_v2  ;;  %2321 = vmatprep.mubr.msk.bf16.mxu1 %vm369_vm0, %v208_v15 }
  0x46   : > { %2037 = vmatmul.mubr.msk.bf16.gmra.mxu0 %vm369_vm0, %v212_v17  ;;  %2322 = vmatmul.mubr.msk.bf16.gmra.mxu1 %vm369_vm0, %v210_v16 }
  0x47   : > { %520 = vmatprep.mubr.bf16.mxu0 %v2614_v2  ;;  %2325 = vmatprep.mubr.msk.bf16.mxu1 %vm369_vm0, %v212_v17 }
  0x4e   : > { %2038 = vmatmul.mubr.msk.bf16.gmra.mxu0 %vm369_vm0, %v214_v18  ;;  %2326 = vmatmul.mubr.msk.bf16.gmra.mxu1 %vm369_vm0, %v214_v18 }
  0x4f   : > { %530 = vmatprep.mubr.bf16.mxu0 %v2614_v2  ;;  %2329 = vmatprep.mubr.msk.bf16.mxu1 %vm369_vm0, %v216_v19 }
  0x56   : > { %2039 = vmatmul.mubr.msk.bf16.gmra.mxu0 %vm369_vm0, %v216_v19  ;;  %2330 = vmatmul.mubr.msk.bf16.gmra.mxu1 %vm369_vm0, %v218_v20 }
  0x57   : > { %540 = vmatprep.mubr.bf16.mxu0 %v2614_v2  ;;  %2333 = vmatprep.mubr.msk.bf16.mxu1 %vm369_vm0, %v220_v21 }
  0x5e   : > { %2040 = vmatmul.mubr.msk.bf16.gmra.mxu0 %vm369_vm0, %v218_v20  ;;  %2334 = vmatmul.mubr.msk.bf16.gmra.mxu1 %vm369_vm0, %v222_v22 }
  0x5f   : > { %550 = vmatprep.mubr.bf16.mxu0 %v2614_v2  ;;  %2337 = vmatprep.mubr.msk.bf16.mxu1 %vm369_vm0, %v224_v7 }
  0x66   : > { %2041 = vmatmul.mubr.msk.bf16.gmra.mxu0 %vm369_vm0, %v220_v21  ;;  %2338 = vmatmul.mubr.msk.bf16.gmra.mxu1 %vm369_vm0, %v226_v10 }
  0x67   : > { %560 = vmatprep.mubr.bf16.mxu0 %v2614_v2  ;;  %2341 = vmatprep.mubr.msk.bf16.mxu1 %vm369_vm0, %v228_v12 }
  0x6e   : > { %2042 = vmatmul.mubr.msk.bf16.gmra.mxu0 %vm369_vm0, %v222_v22  ;;  %2342 = vmatmul.mubr.msk.bf16.gmra.mxu1 %vm369_vm0, %v230_v14 }
  0xd6   : > { %v452_v28 = vpop.f32.mrf.mxu0  ;;  %v572_v29 = vpop.f32.mrf.mxu1 }
  0xd7   : > { %v573_v34 = vadd.f32 %v572_v29, %v2753_v30  ;;  %v453_v37 = vadd.f32 %v452_v28, %v2753_v30 }
  0xd8   : > { %v454_v32 = vpop.f32.mrf.mxu0  ;;  %v574_v33 = vpop.f32.mrf.mxu1 }
  0xd9   : > { %v2762_v39 = vadd.f32 %v574_v33, %v2756_v31  ;;  %v2766_v41 = vadd.f32 %v454_v32, %v2756_v31 }
  0xda   : > { %v456_v35 = vpop.f32.mrf.mxu0  ;;  %v576_v36 = vpop.f32.mrf.mxu1 }
  0xdb   : > { %v457_v38 = vadd.f32 %v456_v35, %v2753_v30  ;;  %v577_v40 = vadd.f32 %v576_v36, %v2753_v30 }
  0xdc   : > { %v458_v42 = vpop.f32.mrf.mxu0  ;;  %v578_v43 = vpop.f32.mrf.mxu1 }
  0xdd   : > { %v2768_v44 = vpack.c.bf16 %v457_v38, %v453_v37  ;;  %v2771_v45 = vadd.f32 %v458_v42, %v2756_v31  ;;  %v2773_v46 = vpack.c.bf16 %v577_v40, %v573_v34  ;;  %v2776_v47 = vadd.f32 %v578_v43, %v2756_v31 }
  0xde   : > { %v462_v48 = vpop.f32.mrf.mxu0  ;;  %v582_v49 = vpop.f32.mrf.mxu1 }
  0xdf   : > { %3744 = vst [vmem:[#allocation3_spill] sm:$0xff] %v2773_v46  ;;  %2165 = vmatprep.mubr.bf16.mxu1 %v2768_v44  ;;  %v583_v54 = vadd.f32 %v582_v49, %v2753_v30  ;;  %v463_v57 = vadd.f32 %v462_v48, %v2753_v30 }
  0xe0   : > { %v464_v52 = vpop.f32.mrf.mxu0  ;;  %v2783_v53 = vpop.f32.mrf.mxu1 }
  0xe1   : > { %v2792_v62 = vadd.f32 %v464_v52, %v2756_v31 }
  0xe2   : > { %v466_v55 = vpop.f32.mrf.mxu0  ;;  %v586_v56 = vpop.f32.mrf.mxu1 }
  0xe3   : > { %v467_v58 = vadd.f32 %v466_v55, %v2753_v30  ;;  %v587_v59 = vadd.f32 %v586_v56, %v2753_v30 }
  0xe4   : > { %v468_v60 = vpop.f32.mrf.mxu0  ;;  %v2789_v61 = vpop.f32.mrf.mxu1 }
  0xe5   : > { %v2794_v63 = vpack.c.bf16 %v467_v58, %v463_v57  ;;  %v2797_v0 = vadd.f32 %v468_v60, %v2756_v31  ;;  %v2799_v1 = vpack.c.bf16 %v587_v59, %v583_v54  ;;  %v252_v60 = vsub.s32 2, %v2743_v24 }
  0xe6   : > { %v472_v2 = vpop.f32.mrf.mxu0  ;;  %v592_v3 = vpop.f32.mrf.mxu1 }
  0xe7   : > { %3745 = vst [vmem:[#allocation4_spill] sm:$0xff] %v2799_v1  ;;  %v593_v7 = vadd.f32 %v592_v3, %v2753_v30  ;;  %v473_v10 = vadd.f32 %v472_v2, %v2753_v30 }
  0xe8   : > { %v474_v5 = vpop.f32.mrf.mxu0  ;;  %v2803_v6 = vpop.f32.mrf.mxu1 }
  0xe9   : > { %v2812_v15 = vadd.f32 %v474_v5, %v2756_v31 }
  0xea   : > { %v476_v8 = vpop.f32.mrf.mxu0  ;;  %v596_v9 = vpop.f32.mrf.mxu1 }
  0xeb   : > { %v477_v11 = vadd.f32 %v476_v8, %v2753_v30  ;;  %v597_v12 = vadd.f32 %v596_v9, %v2753_v30 }
  0xec   : > { %v478_v13 = vpop.f32.mrf.mxu0  ;;  %v2809_v14 = vpop.f32.mrf.mxu1 }
  0xed   : > { %v2814_v16 = vpack.c.bf16 %v477_v11, %v473_v10  ;;  %v2817_v17 = vadd.f32 %v478_v13, %v2756_v31  ;;  %v2819_v18 = vpack.c.bf16 %v597_v12, %v593_v7  ;;  %v2853_v7 = vrot.slane %v2749_v26, %v252_v60 }
  0xee   : > { %v482_v19 = vpop.f32.mrf.mxu0  ;;  %v602_v20 = vpop.f32.mrf.mxu1 }
  0xef   : > { %3746 = vst [vmem:[#allocation5_spill] sm:$0xff] %v2819_v18  ;;  %v603_v25 = vadd.f32 %v602_v20, %v2753_v30  ;;  %v483_v29 = vadd.f32 %v482_v19, %v2753_v30 }
  0xf0   : > { %v484_v22 = vpop.f32.mrf.mxu0  ;;  %v604_v23 = vpop.f32.mrf.mxu1 }
  0xf1   : > { %v605_v33 = vadd.f32 %v604_v23, %v2756_v31  ;;  %v2829_v35 = vadd.f32 %v484_v22, %v2756_v31 }
  0xf2   : > { %v486_v27 = vpop.f32.mrf.mxu0  ;;  %v606_v28 = vpop.f32.mrf.mxu1 }
  0xf3   : > { %v487_v32 = vadd.f32 %v486_v27, %v2753_v30  ;;  %v607_v34 = vadd.f32 %v606_v28, %v2753_v30 }
  0xf4   : > { %v488_v36 = vpop.f32.mrf.mxu0  ;;  %v608_v37 = vpop.f32.mrf.mxu1 }
  0xf5   : > { %v2831_v38 = vpack.c.bf16 %v487_v32, %v483_v29  ;;  %v2834_v40 = vadd.f32 %v488_v36, %v2756_v31  ;;  %v2836_v42 = vpack.c.bf16 %v607_v34, %v603_v25  ;;  %v609_v43 = vadd.f32 %v608_v37, %v2756_v31 }
  0xf6   : > { %v492_v48 = vpop.f32.mrf.mxu0  ;;  %v2315_v3 = vpop.f32.mrf.mxu1 }
  0xf7   : > { %3747 = vst [vmem:[#allocation6_spill] sm:$0xff] %v2836_v42  ;;  %v803_v52 = vpack.c.bf16 %v609_v43, %v605_v33  ;;  %v493_v56 = vadd.f32 %v492_v48, %v2753_v30  ;;  %v2858_v12 = vadd.f32 %v2315_v3, %v2853_v7 }
  0xf8   : > { %v2841_v54 = vpop.f32.mrf.mxu0  ;;  %v645_v9 = vpop.f32.mrf.mxu1 }
  0xf9   : > { %2149 = vmatprep.subr.bf16.mxu1 %v803_v52  ;;  %v2865_v20 = vadd.f32 %v645_v9, %v2853_v7 }
  0xfa   : > { %v496_v55 = vpop.f32.mrf.mxu0  ;;  %v2316_v19 = vpop.f32.mrf.mxu1 }
  0xfb   : > { %v497_v57 = vadd.f32 %v496_v55, %v2753_v30  ;;  %v2868_v26 = vadd.f32 %v2316_v19, %v2853_v7 }
  0xfc   : > { %v2845_v58 = vpop.f32.mrf.mxu0  ;;  %v648_v23 = vpop.f32.mrf.mxu1 }
  0xfd   : > { %v2847_v59 = vpack.c.bf16 %v497_v57, %v493_v56  ;;  %v2873_v27 = vadd.f32 %v648_v23, %v2853_v7 }
  0xfe   : > { %v502_v2 = vpop.f32.mrf.mxu0  ;;  %v2319_v29 = vpop.f32.mrf.mxu1 }
  0xff   : > { %v503_v10 = vadd.f32 %v502_v2, %v2753_v30  ;;  %v2880_v43 = vadd.f32 %v2319_v29, %v2853_v7 }
 0x100   : > { %v2850_v5 = vpop.f32.mrf.mxu0  ;;  %v661_v34 = vpop.f32.mrf.mxu1 }
 0x101   : > { %v2885_v56 = vadd.f32 %v661_v34, %v2853_v7  ;;  %v599_v34 = vadd.f32 %v2809_v14, %v2756_v31 }
 0x102   : > { %v506_v8 = vpop.f32.mrf.mxu0  ;;  %v2320_v52 = vpop.f32.mrf.mxu1 }
 0x103   : > { %v507_v11 = vadd.f32 %v506_v8, %v2753_v30  ;;  %v2888_v57 = vadd.f32 %v2320_v52, %v2853_v7 }
 0x104   : > { %v2860_v13 = vpop.f32.mrf.mxu0  ;;  %v664_v2 = vpop.f32.mrf.mxu1 }
 0x105   : > { %v2862_v24 = vpack.c.bf16 %v507_v11, %v503_v10  ;;  %v2893_v8 = vadd.f32 %v664_v2, %v2853_v7 }
 0x106   : > { %v512_v22 = vpop.f32.mrf.mxu0  ;;  %v2895_v10 = vpop.f32.mrf.mxu1 }
 0x107   : > { %3748 = vst [vmem:[#allocation7_spill] sm:$0xff] %v2862_v24  ;;  %v513_v36 = vadd.f32 %v512_v22, %v2753_v30 }
 0x108   : > { %v514_v28 = vpop.f32.mrf.mxu0  ;;  %v2899_v22 = vpop.f32.mrf.mxu1 }
 0x10a   : > { %v516_v33 = vpop.f32.mrf.mxu0 }
 0x10b   : > { %v517_v37 = vadd.f32 %v516_v33, %v2753_v30  ;;  %v595_v33 = vadd.f32 %v2803_v6, %v2756_v31 }
 0x10c   : > { %v518_v48 = vpop.f32.mrf.mxu0 }
 0x10d   : > { %v2882_v55 = vpack.c.bf16 %v517_v37, %v513_v36  ;;  %v2907_v37 = vpop.f32.mrf.mxu1 }
 0x10e   : > { %v522_v60 = vpop.f32.mrf.mxu0 }
 0x10f   : > { %3749 = vst [vmem:[#allocation8_spill] sm:$0xff] %v2882_v55  ;;  %v523_v23 = vadd.f32 %v522_v60, %v2753_v30  ;;  %v2913_v11 = vpop.f32.mrf.mxu1 }
 0x110   : > { %v524_v9 = vpop.f32.mrf.mxu0 }
 0x111   : > { %v525_v52 = vadd.f32 %v524_v9, %v2756_v31  ;;  %v2917_v6 = vpop.f32.mrf.mxu1  ;;  %v519_v9 = vadd.f32 %v518_v48, %v2756_v31 }
 0x112   : > { %v526_v19 = vpop.f32.mrf.mxu0 }
 0x113   : > { %v527_v29 = vadd.f32 %v526_v19, %v2753_v30  ;;  %v802_v19 = vpack.c.bf16 %v599_v34, %v595_v33  ;;  %v2919_v50 = vpop.f32.mrf.mxu1 }
 0x114   : > { %v528_v36 = vpop.f32.mrf.mxu0 }
 0x115   : > { %v2910_v2 = vpack.c.bf16 %v527_v29, %v523_v23  ;;  %v529_v32 = vadd.f32 %v528_v36, %v2756_v31  ;;  %v585_v36 = vadd.f32 %v2783_v53, %v2756_v31  ;;  %v2328_v34 = vpop.f32.mrf.mxu1 }
 0x116   : > { %v532_v25 = vpop.f32.mrf.mxu0 }
 0x117   : > { %3750 = vst [vmem:[#allocation9_spill] sm:$0xff] %v2910_v2  ;;  %v795_v60 = vpack.c.bf16 %v529_v32, %v525_v52  ;;  %v533_v23 = vadd.f32 %v532_v25, %v2753_v30  ;;  %v589_v32 = vadd.f32 %v2789_v61, %v2756_v31  ;;  %v515_v52 = vadd.f32 %v514_v28, %v2756_v31  ;;  %v2933_v4 = vpop.f32.mrf.mxu1 }
 0x118   : > { %v2915_v3 = vpop.f32.mrf.mxu0  ;;  %v509_v61 = vadd.f32 %v2860_v13, %v2756_v31 }
 0x119   : > { %2150 = vmatpush3.bf16.xpose.msra.mxu1 %v795_v60  ;;  %v794_v48 = vpack.c.bf16 %v519_v9, %v515_v52  ;;  %v801_v25 = vpack.c.bf16 %v589_v32, %v585_v36  ;;  %v505_v9 = vadd.f32 %v2850_v5, %v2756_v31  ;;  %v499_v5 = vadd.f32 %v2845_v58, %v2756_v31 }
 0x11a   : > { %v536_v14 = vpop.f32.mrf.mxu0  ;;  %2151 = vmatprep.subr.bf16.mxu1 %v802_v19 }
 0x11b   : > { %v537_v29 = vadd.f32 %v536_v14, %v2753_v30  ;;  %v2935_v14 = vpop.f32.mrf.mxu1 }
 0x11c   : > { %v2928_v33 = vpop.f32.mrf.mxu0 }
 0x11d   : > { %v2931_v60 = vpack.c.bf16 %v537_v29, %v533_v23  ;;  %v2937_v49 = vpop.f32.mrf.mxu1 }
 0x11e   : > { %v542_v19 = vpop.f32.mrf.mxu0 }
 0x11f   : > { %3751 = vst [vmem:[#allocation10_spill] sm:$0xff] %v2931_v60  ;;  %v543_v28 = vadd.f32 %v542_v19, %v2753_v30  ;;  %v2943_v51 = vpop.f32.mrf.mxu1  ;;  %v3753_v19 = vpack.c.bf16 %v2776_v47, %v2762_v39 }
 0x120   : > { %v544_v21 = vpop.f32.mrf.mxu0 }
 0x121   : > { %2152 = vmatpush3.bf16.xpose.msra.mxu1 %v794_v48  ;;  %v2949_v52 = vpop.f32.mrf.mxu1  ;;  %v793_v48 = vpack.c.bf16 %v509_v61, %v505_v9  ;;  %v495_v9 = vadd.f32 %v2841_v54, %v2756_v31 }
 0x122   : > { %v546_v53 = vpop.f32.mrf.mxu0  ;;  %2153 = vmatprep.subr.bf16.mxu1 %v801_v25 }
 0x123   : > { %v547_v23 = vadd.f32 %v546_v53, %v2753_v30  ;;  %v2951_v42 = vpop.f32.mrf.mxu1  ;;  %v792_v47 = vpack.c.bf16 %v499_v5, %v495_v9 }
 0x124   : > { %v548_v29 = vpop.f32.mrf.mxu0 }
 0x125   : > { %v2947_v36 = vpack.c.bf16 %v547_v23, %v543_v28  ;;  %v2956_v53 = vpop.f32.mrf.mxu1 }
 0x126   : > { %v552_v32 = vpop.f32.mrf.mxu0 }
 0x127   : > { %3752 = vst [vmem:[#allocation11_spill] sm:$0xff] %v2947_v36  ;;  %v553_v28 = vadd.f32 %v552_v32, %v2753_v30  ;;  %v2962_v61 = vpop.f32.mrf.mxu1 }
 0x128   : > { %v554_v25 = vpop.f32.mrf.mxu0 }
 0x129   : > { %2154 = vmatpush3.bf16.xpose.msra.mxu1 %v793_v48  ;;  %v2968_v39 = vpop.f32.mrf.mxu1  ;;  %v555_v9 = vadd.f32 %v554_v25, %v2756_v31  ;;  %v549_v25 = vadd.f32 %v548_v29, %v2756_v31 }
 0x12a   : > { %v556_v13 = vpop.f32.mrf.mxu0  ;;  %2155 = vmatprep.subr.bf16.mxu1 %v3753_v19 }
 0x12b   : > { %v557_v23 = vadd.f32 %v556_v13, %v2753_v30  ;;  %v2339_v46 = vpop.f32.mrf.mxu1 }
 0x12c   : > { %v558_v18 = vpop.f32.mrf.mxu0 }
 0x12d   : > { %v2966_v48 = vpack.c.bf16 %v557_v23, %v553_v28  ;;  %v741_v36 = vpop.f32.mrf.mxu1  ;;  %v559_v55 = vadd.f32 %v558_v18, %v2756_v31  ;;  %v705_v18 = vadd.f32 %v2328_v34, %v2853_v7 }
 0x12e   : > { %v562_v1 = vpop.f32.mrf.mxu0 }
 0x12f   : > { %3754 = vst [vmem:[#allocation12_spill] sm:$0xff] %v2966_v48  ;;  %v563_v32 = vadd.f32 %v562_v1, %v2753_v30  ;;  %v2340_v2 = vpop.f32.mrf.mxu1  ;;  %v798_v24 = vpack.c.bf16 %v559_v55, %v555_v9  ;;  %v702_v1 = vadd.f32 %v2917_v6, %v2853_v7  ;;  %v697_v6 = vadd.f32 %v2933_v4, %v2853_v7 }
 0x130   : > { %v564_v19 = vpop.f32.mrf.mxu0  ;;  %v689_v4 = vadd.f32 %v2907_v37, %v2853_v7  ;;  %v535_v37 = vadd.f32 %v2915_v3, %v2756_v31  ;;  %v718_v3 = vadd.f32 %v2935_v14, %v2853_v7  ;;  %v713_v14 = vadd.f32 %v2949_v52, %v2853_v7 }
 0x131   : > { %2156 = vmatpush3.bf16.xpose.msra.mxu1 %v792_v47  ;;  %v565_v54 = vadd.f32 %v564_v19, %v2756_v31  ;;  %v744_v5 = vpop.f32.mrf.mxu1 }
 0x132   : > { %v566_v58 = vpop.f32.mrf.mxu0 }
 0x133   : > { %v567_v13 = vadd.f32 %v566_v58, %v2753_v30  ;;  %v2343_v48 = vpop.f32.mrf.mxu1  ;;  %v3755_v30 = vpack.c.bf16 %v2834_v40, %v2829_v35  ;;  %v694_v35 = vadd.f32 %v2919_v50, %v2853_v7  ;;  %v811_v40 = vpack.c.bf16 %v705_v18, %v702_v1 }
 0x134   : > { %v568_v60 = vpop.f32.mrf.mxu0  ;;  %v686_v50 = vadd.f32 %v2895_v10, %v2853_v7  ;;  %v539_v1 = vadd.f32 %v2928_v33, %v2756_v31  ;;  %v681_v10 = vadd.f32 %v2913_v11, %v2853_v7  ;;  %v726_v11 = vadd.f32 %v2956_v53, %v2853_v7 }
 0x135   : > { %v2974_v28 = vpack.c.bf16 %v567_v13, %v563_v32  ;;  %v569_v23 = vadd.f32 %v568_v60, %v2756_v31  ;;  %v757_v19 = vpop.f32.mrf.mxu1  ;;  %v766_v60 = vadd.f32 %v2343_v48, %v2853_v7  ;;  %v545_v13 = vadd.f32 %v544_v21, %v2756_v31 }
 0x136   : > { %v758_v32 = vadd.f32 %v757_v19, %v2853_v7  ;;  %v753_v48 = vadd.f32 %v2340_v2, %v2853_v7  ;;  %v3756_v21 = vpack.c.bf16 %v2817_v17, %v2812_v15  ;;  %v678_v15 = vadd.f32 %v2899_v22, %v2853_v7 }
 0x137   : > { %v799_v47 = vpack.c.bf16 %v569_v23, %v565_v54  ;;  %v2344_v58 = vpop.f32.mrf.mxu1  ;;  %v797_v23 = vpack.c.bf16 %v549_v25, %v545_v13  ;;  %v809_v17 = vpack.c.bf16 %v689_v4, %v686_v50  ;;  %v796_v33 = vpack.c.bf16 %v539_v1, %v535_v37 }
 0x138   : > { %v769_v55 = vadd.f32 %v2344_v58, %v2853_v7  ;;  %v3757_v22 = vpack.c.bf16 %v2797_v0, %v2792_v62  ;;  %v808_v19 = vpack.c.bf16 %v681_v10, %v678_v15  ;;  %v3758_v0 = vpack.c.bf16 %v2771_v45, %v2766_v41 }
 0x139   : > { %2157 = vmatprep.subr.bf16.mxu1 %v799_v47  ;;  %v760_v34 = vpop.f32.mrf.mxu1  ;;  %v810_v47 = vpack.c.bf16 %v697_v6, %v694_v35  ;;  %v3759_v53 = vpack.c.bf16 %v2888_v57, %v2880_v43  ;;  %v3761_v41 = vpack.c.bf16 %v2868_v26, %v2858_v12  ;;  %v3762_v45 = vpack.c.bf16 %v2873_v27, %v2865_v20  ;;  %v3770_v12 = vld [vmem:[#allocation4_spill] sm:$0xff]  ;;  %v3771_v20 = vld [vmem:[#allocation5_spill] sm:$0xff]  ;;  %v3772_v26 = vld [vmem:[#allocation6_spill] sm:$0xff] }
 0x13a   : > { %2158 = vmatpush3.bf16.xpose.msra.mxu1 %v3755_v30  ;;  %v819_v54 = vpack.c.bf16 %v769_v55, %v766_v60  ;;  %v761_v29 = vadd.f32 %v760_v34, %v2853_v7  ;;  %v745_v30 = vadd.f32 %v744_v5, %v2853_v7  ;;  %v737_v5 = vadd.f32 %v2962_v61, %v2853_v7 }
 0x13b   : > { %2159 = vmatprep.subr.bf16.mxu1 %v798_v24  ;;  %v750_v24 = vadd.f32 %v2339_v46, %v2853_v7  ;;  %v742_v46 = vadd.f32 %v741_v36, %v2853_v7  ;;  %v734_v36 = vadd.f32 %v2951_v42, %v2853_v7  ;;  %v729_v42 = vadd.f32 %v2968_v39, %v2853_v7 }
 0x13c   : > { %v818_v9 = vpack.c.bf16 %v761_v29, %v758_v32  ;;  %2197 = vmatprep.subr.bf16.mxu0 %v819_v54  ;;  %v721_v61 = vadd.f32 %v2943_v51, %v2853_v7  ;;  %v710_v39 = vadd.f32 %v2937_v49, %v2853_v7  ;;  %v3760_v51 = vpack.c.bf16 %v2893_v8, %v2885_v56  ;;  %v3764_v49 = vld [vmem:[#allocation8_spill] sm:$0xff]  ;;  %v3769_v7 = vld [vmem:[#allocation3_spill] sm:$0xff] }
 0x13d   : > { %2198 = vmatpush3.bf16.msra.mxu0 %v811_v40  ;;  %v817_v2 = vpack.c.bf16 %v753_v48, %v750_v24  ;;  %v816_v18 = vpack.c.bf16 %v745_v30, %v742_v46  ;;  %v815_v31 = vpack.c.bf16 %v737_v5, %v734_v36  ;;  %v814_v62 = vpack.c.bf16 %v729_v42, %v726_v11 }
 0x13e   : > { %2199 = vmatprep.subr.bf16.mxu0 %v818_v9  ;;  %v813_v60 = vpack.c.bf16 %v721_v61, %v718_v3  ;;  %v812_v58 = vpack.c.bf16 %v713_v14, %v710_v39 }
 0x141   : > { %2200 = vmatpush3.bf16.msra.mxu0 %v810_v47 }
 0x142   : > { %2160 = vmatpush3.bf16.xpose.msra.mxu1 %v3756_v21  ;;  %2201 = vmatprep.subr.bf16.mxu0 %v817_v2 }
 0x143   : > { %2161 = vmatprep.subr.bf16.mxu1 %v797_v23 }
 0x145   : > { %2202 = vmatpush3.bf16.msra.mxu0 %v809_v17 }
 0x146   : > { %2203 = vmatprep.subr.bf16.mxu0 %v816_v18 }
 0x149   : > { %2204 = vmatpush3.bf16.msra.mxu0 %v808_v19 }
 0x14a   : > { %2162 = vmatpush3.bf16.xpose.msra.mxu1 %v3757_v22  ;;  %2205 = vmatprep.subr.bf16.mxu0 %v815_v31 }
 0x14b   : > { %2163 = vmatprep.subr.bf16.mxu1 %v796_v33 }
 0x14d   : > { %2206 = vmatpush3.bf16.msra.mxu0 %v3759_v53 }
 0x14e   : > { %2207 = vmatprep.subr.bf16.mxu0 %v814_v62 }
 0x151   : > { %2208 = vmatpush3.bf16.msra.mxu0 %v3760_v51 }
 0x152   : > { %2164 = vmatpush3.bf16.xpose.msra.mxu1 %v3758_v0  ;;  %2209 = vmatprep.subr.bf16.mxu0 %v813_v60 }
 0x155   : > { %2210 = vmatpush3.bf16.msra.mxu0 %v3761_v41 }
 0x156   : > { %2211 = vmatprep.subr.bf16.mxu0 %v812_v58 }
 0x159   : > { %2166 = vmatmul.mubr.bf16.vlgmr.msra.gmra.mxu1 %v2768_v44  ;;  %2212 = vmatpush3.bf16.msra.mxu0 %v3762_v45  ;;  %v3763_v44 = vld [vmem:[#allocation7_spill] sm:$0xff] }
 0x15a   : > { %2167 = vmatprep.mubr.bf16.mxu1 %v2794_v63 }
 0x161   : > { %2168 = vmatmul.mubr.bf16.gmra.mxu1 %v2794_v63  ;;  %v3765_v63 = vld [vmem:[#allocation9_spill] sm:$0xff] }
 0x162   : > { %2169 = vmatprep.mubr.bf16.mxu1 %v2814_v16 }
 0x169   : > { %2170 = vmatmul.mubr.bf16.gmra.mxu1 %v2814_v16  ;;  %v3766_v16 = vld [vmem:[#allocation10_spill] sm:$0xff] }
 0x16a   : > { %2171 = vmatprep.mubr.bf16.mxu1 %v2831_v38 }
 0x171   : > { %2172 = vmatmul.mubr.bf16.gmra.mxu1 %v2831_v38  ;;  %v3767_v38 = vld [vmem:[#allocation11_spill] sm:$0xff] }
 0x172   : > { %2173 = vmatprep.mubr.bf16.mxu1 %v2847_v59 }
 0x179   : > { %2174 = vmatmul.mubr.bf16.gmra.mxu1 %v2847_v59  ;;  %v3768_v59 = vld [vmem:[#allocation12_spill] sm:$0xff] }
 0x17a   : > { %2175 = vmatprep.mubr.bf16.mxu1 %v3763_v44 }
 0x181   : > { %2176 = vmatmul.mubr.bf16.gmra.mxu1 %v3763_v44 }
 0x182   : > { %2177 = vmatprep.mubr.bf16.mxu1 %v3764_v49 }
 0x189   : > { %2178 = vmatmul.mubr.bf16.gmra.mxu1 %v3764_v49 }
 0x18a   : > { %2179 = vmatprep.mubr.bf16.mxu1 %v3765_v63 }
 0x191   : > { %2180 = vmatmul.mubr.bf16.gmra.mxu1 %v3765_v63 }
 0x192   : > { %2181 = vmatprep.mubr.bf16.mxu1 %v3766_v16 }
 0x199   : > { %2182 = vmatmul.mubr.bf16.gmra.mxu1 %v3766_v16 }
 0x19a   : > { %2183 = vmatprep.mubr.bf16.mxu1 %v3767_v38 }
 0x1a1   : > { %2184 = vmatmul.mubr.bf16.gmra.mxu1 %v3767_v38 }
 0x1a2   : > { %2185 = vmatprep.mubr.bf16.mxu1 %v3768_v59 }
 0x1a9   : > { %2186 = vmatmul.mubr.bf16.gmra.mxu1 %v3768_v59 }
 0x1aa   : > { %2187 = vmatprep.mubr.bf16.mxu1 %v2974_v28 }
 0x1b1   : > { %2188 = vmatmul.mubr.bf16.gmra.mxu1 %v2974_v28 }
 0x1b2   : > { %2189 = vmatprep.mubr.bf16.mxu1 %v3769_v7 }
 0x1b9   : > { %2190 = vmatmul.mubr.bf16.gmra.mxu1 %v3769_v7 }
 0x1ba   : > { %2191 = vmatprep.mubr.bf16.mxu1 %v3770_v12 }
 0x1c1   : > { %2192 = vmatmul.mubr.bf16.gmra.mxu1 %v3770_v12 }
 0x1c2   : > { %2193 = vmatprep.mubr.bf16.mxu1 %v3771_v20 }
 0x1c9   : > { %2194 = vmatmul.mubr.bf16.gmra.mxu1 %v3771_v20 }
 0x1ca   : > { %2195 = vmatprep.mubr.bf16.mxu1 %v3772_v26 }
 0x1d1   : > { %2196 = vmatmul.mubr.bf16.gmra.mxu1 %v3772_v26 }
 0x219   : > { %v3078_v27 = vpop.f32.mrf.mxu1 }
 0x21b   : > { %v3080_v43 = vpop.f32.mrf.mxu1 }
 0x21c   : > { %v1013_v56 = vmax.f32 %v3078_v27, %v3080_v43 }
 0x21d   : > { %v3084_v57 = vpop.f32.mrf.mxu1 }
 0x21e   : > { %1014 = vmax.xlane.f32.xlu0 %v1013_v56 }
 0x21f   : > { %v3086_v8 = vpop.f32.mrf.mxu1 }
 0x220   : > { %v1016_v52 = vmax.f32 %v3084_v57, %v3086_v8 }
 0x221   : > { %v3090_v28 = vpop.f32.mrf.mxu1 }
 0x222   : > { %1017 = vmax.xlane.f32.xlu0 %v1016_v52 }
 0x223   : > { %v3092_v25 = vpop.f32.mrf.mxu1 }
 0x224   : > { %v1019_v32 = vmax.f32 %v3090_v28, %v3092_v25 }
 0x225   : > { %v3096_v55 = vpop.f32.mrf.mxu1 }
 0x226   : > { %1020 = vmax.xlane.f32.xlu1 %v1019_v32 }
 0x227   : > { %v3098_v13 = vpop.f32.mrf.mxu1 }
 0x228   : > { %v1022_v35 = vmax.f32 %v3096_v55, %v3098_v13 }
 0x229   : > { %v3102_v40 = vpop.f32.mrf.mxu1 }
 0x22a   : > { %1023 = vmax.xlane.f32.xlu1 %v1022_v35 }
 0x22b   : > { %v3104_v6 = vpop.f32.mrf.mxu1 }
 0x22c   : > { %v1025_v34 = vmax.f32 %v3102_v40, %v3104_v6 }
 0x22d   : > { %v3108_v24 = vpop.f32.mrf.mxu1 }
 0x22e   : > { %1026 = vmax.xlane.f32.xlu0 %v1025_v34 }
 0x22f   : > { %v3110_v48 = vpop.f32.mrf.mxu1 }
 0x230   : > { %v1028_v54 = vmax.f32 %v3108_v24, %v3110_v48 }
 0x231   : > { %v3114_v29 = vpop.f32.mrf.mxu1 }
 0x232   : > { %1029 = vmax.xlane.f32.xlu1 %v1028_v54 }
 0x233   : > { %v3116_v23 = vpop.f32.mrf.mxu1 }
 0x234   : > { %v1031_v9 = vmax.f32 %v3114_v29, %v3116_v23 }
 0x235   : > { %v3120_v21 = vpop.f32.mrf.mxu1 }
 0x236   : > { %1032 = vmax.xlane.f32.xlu0 %v1031_v9 }
 0x237   : > { %v3122_v50 = vpop.f32.mrf.mxu1 }
 0x238   : > { %v1034_v4 = vmax.f32 %v3120_v21, %v3122_v50 }
 0x239   : > { %v3126_v47 = vpop.f32.mrf.mxu1 }
 0x23a   : > { %1035 = vmax.xlane.f32.xlu1 %v1034_v4 }
 0x23b   : > { %v3128_v46 = vpop.f32.mrf.mxu1 }
 0x23c   : > { %v1037_v2 = vmax.f32 %v3126_v47, %v3128_v46 }
 0x23d   : > { %v3132_v30 = vpop.f32.mrf.mxu1 }
 0x23e   : > { %1038 = vmax.xlane.f32.xlu0 %v1037_v2 }
 0x23f   : > { %v3134_v1 = vpop.f32.mrf.mxu1 }
 0x240   : > { %v1040_v15 = vmax.f32 %v3132_v30, %v3134_v1 }
 0x241   : > { %v3138_v17 = vpop.f32.mrf.mxu1 }
 0x242   : > { %1041 = vmax.xlane.f32.xlu1 %v1040_v15 }
 0x243   : > { %v3140_v10 = vpop.f32.mrf.mxu1 }
 0x244   : > { %v1043_v37 = vmax.f32 %v3138_v17, %v3140_v10 }
 0x245   : > { %v3144_v36 = vpop.f32.mrf.mxu1 }
 0x246   : > { %1044 = vmax.xlane.f32.xlu0 %v1043_v37 }
 0x247   : > { %v3146_v5 = vpop.f32.mrf.mxu1 }
 0x248   : > { %v1046_v18 = vmax.f32 %v3144_v36, %v3146_v5 }
 0x249   : > { %v3150_v33 = vpop.f32.mrf.mxu1 }
 0x24a   : > { %1047 = vmax.xlane.f32.xlu1 %v1046_v18 }
 0x24b   : > { %v3152_v22 = vpop.f32.mrf.mxu1 }
 0x24c   : > { %v1049_v19 = vmax.f32 %v3150_v33, %v3152_v22 }
 0x24d   : > { %v3156_v11 = vpop.f32.mrf.mxu1 }
 0x24e   : > { %1050 = vmax.xlane.f32.xlu0 %v1049_v19 }
 0x24f   : > { %v3158_v31 = vpop.f32.mrf.mxu1 }
 0x250   : > { %v1052_v42 = vmax.f32 %v3156_v11, %v3158_v31 }
 0x251   : > { %v3162_v3 = vpop.f32.mrf.mxu1 }
 0x252   : > { %1053 = vmax.xlane.f32.xlu1 %v1052_v42 }
 0x253   : > { %v3164_v61 = vpop.f32.mrf.mxu1 }
 0x254   : > { %v1055_v62 = vmax.f32 %v3162_v3, %v3164_v61 }
 0x255   : > { %v3168_v0 = vpop.f32.mrf.mxu1 }
 0x256   : > { %1056 = vmax.xlane.f32.xlu0 %v1055_v62 }
 0x257   : > { %v3170_v53 = vpop.f32.mrf.mxu1 }
 0x258   : > { %v1058_v39 = vmax.f32 %v3168_v0, %v3170_v53 }
 0x259   : > { %v3174_v60 = vpop.f32.mrf.mxu1 }
 0x25a   : > { %1059 = vmax.xlane.f32.xlu1 %v1058_v39 }
 0x25b   : > { %v3176_v14 = vpop.f32.mrf.mxu1 }
 0x25c   : > { %v1061_v51 = vmax.f32 %v3174_v60, %v3176_v14 }
 0x25d   : > { %v3180_v58 = vpop.f32.mrf.mxu1 }
 0x25e   : > { %1062 = vmax.xlane.f32.xlu0 %v1061_v51 }
 0x25f   : > { %v3182_v41 = vpop.f32.mrf.mxu1 }
 0x260   : > { %v1064_v45 = vmax.f32 %v3180_v58, %v3182_v41 }
 0x261   : > { %v3186_v44 = vpop.f32.mrf.mxu1 }
 0x262   : > { %1065 = vmax.xlane.f32.xlu1 %v1064_v45 }
 0x263   : > { %v3188_v49 = vpop.f32.mrf.mxu1 }
 0x264   : > { %v1067_v63 = vmax.f32 %v3186_v44, %v3188_v49 }
 0x265   : > { %v3192_v16 = vpop.f32.mrf.mxu1 }
 0x266   : > { %1068 = vmax.xlane.f32.xlu0 %v1067_v63 }
 0x267   : > { %v3194_v38 = vpop.f32.mrf.mxu1 }
 0x268   : > { %v1070_v59 = vmax.f32 %v3192_v16, %v3194_v38 }
 0x269   : > { %v3198_v7 = vpop.f32.mrf.mxu1 }
 0x26a   : > { %1071 = vmax.xlane.f32.xlu1 %v1070_v59 }
 0x26b   : > { %v3200_v12 = vpop.f32.mrf.mxu1 }
 0x26c   : > { %v1073_v20 = vmax.f32 %v3198_v7, %v3200_v12 }
 0x26d   : > { %v3204_v26 = vpop.f32.mrf.mxu1 }
 0x26e   : > { %1074 = vmax.xlane.f32.xlu0 %v1073_v20 }
 0x26f   : > { %v3206_v56 = vpop.f32.mrf.mxu1 }
 0x270   : > { %v1076_v52 = vmax.f32 %v3204_v26, %v3206_v56 }
 0x271   : > { %v3210_v32 = vpop.f32.mrf.mxu1 }
 0x272   : > { %1077 = vmax.xlane.f32.xlu1 %v1076_v52 }
 0x273   : > { %v3212_v35 = vpop.f32.mrf.mxu1 }
 0x274   : > { %v1079_v34 = vmax.f32 %v3210_v32, %v3212_v35 }
 0x275   : > { %v3216_v54 = vpop.f32.mrf.mxu1 }
 0x276   : > { %1080 = vmax.xlane.f32.xlu0 %v1079_v34 }
 0x277   : > { %v3218_v9 = vpop.f32.mrf.mxu1 }
 0x278   : > { %3773 = vst [vmem:[#allocation7_spill] sm:$0xff] %v3218_v9  ;;  %v1082_v4 = vmax.f32 %v3216_v54, %v3218_v9 }
 0x279   : > { %v3222_v2 = vpop.f32.mrf.mxu1 }
 0x27a   : > { %1083 = vmax.xlane.f32.xlu1 %v1082_v4 }
 0x27b   : > { %v3224_v15 = vpop.f32.mrf.mxu1 }
 0x27d   : > { %v3226_v37 = vpop.f32.mrf.mxu1 }
 0x27f   : > { %v3228_v19 = vpop.f32.mrf.mxu1 }
 0x281   : > { %v3232_v63 = vpop.f32.mrf.mxu1 }
 0x283   : > { %v3236_v9 = vpop.f32.mrf.mxu1 }
 0x2a7   : > { %v1015_v18 = vpop.xlane.xlu0 %1014 }
 0x2a8   : > { %v1109_v42 = vsub.f32 %v3078_v27, %v1015_v18  ;;  %v1110_v62 = vsub.f32 %v3080_v43, %v1015_v18 }
 0x2aa   : > { %v1173_v39 = vmul.f32 1.442695, %v1109_v42  ;;  %v1175_v51 = vmul.f32 1.442695, %v1110_v62 }
 0x2ab   : > { %v1018_v45 = vpop.xlane.xlu0 %1017 }
 0x2ac   : > { %2398 = vpow2.f32 %v1173_v39  ;;  %v1111_v59 = vsub.f32 %v3084_v57, %v1018_v45  ;;  %v1112_v20 = vsub.f32 %v3086_v8, %v1018_v45  ;;  %v3240_v39 = vpop.f32.mrf.mxu1 }
 0x2ad   : > { %2400 = vpow2.f32 %v1175_v51 }
 0x2ae   : > { %v1177_v52 = vmul.f32 1.442695, %v1111_v59  ;;  %v1179_v34 = vmul.f32 1.442695, %v1112_v20  ;;  %v3244_v20 = vpop.f32.mrf.mxu1 }
 0x2af   : > { %v1021_v4 = vpop.xlane.xlu1 %1020 }
 0x2b0   : > { %2402 = vpow2.f32 %v1177_v52  ;;  %v1113_v27 = vsub.f32 %v3090_v28, %v1021_v4  ;;  %v1114_v43 = vsub.f32 %v3092_v25, %v1021_v4 }
 0x2b1   : > { %2404 = vpow2.f32 %v1179_v34 }
 0x2b2   : > { %v1181_v18 = vmul.f32 1.442695, %v1113_v27  ;;  %v1183_v42 = vmul.f32 1.442695, %v1114_v43  ;;  %v3254_v43 = vpop.f32.mrf.mxu1 }
 0x2b3   : > { %v1024_v62 = vpop.xlane.xlu1 %1023 }
 0x2b4   : > { %2406 = vpow2.f32 %v1181_v18  ;;  %v1115_v57 = vsub.f32 %v3096_v55, %v1024_v62  ;;  %v1116_v8 = vsub.f32 %v3098_v13, %v1024_v62 }
 0x2b5   : > { %2408 = vpow2.f32 %v1183_v42 }
 0x2b6   : > { %v1185_v51 = vmul.f32 1.442695, %v1115_v57  ;;  %v1187_v45 = vmul.f32 1.442695, %v1116_v8 }
 0x2b7   : > { %v1027_v59 = vpop.xlane.xlu0 %1026 }
 0x2b8   : > { %2410 = vpow2.f32 %v1185_v51  ;;  %v1117_v28 = vsub.f32 %v3102_v40, %v1027_v59  ;;  %v1118_v25 = vsub.f32 %v3104_v6, %v1027_v59  ;;  %v3266_v59 = vpop.f32.mrf.mxu1 }
 0x2b9   : > { %v3248_v52 = vpop.eup %2398  ;;  %2412 = vpow2.f32 %v1187_v45  ;;  %v1085_v45 = vmax.f32 %v3222_v2, %v3224_v15 }
 0x2ba   : > { %v3250_v34 = vpop.eup %2400  ;;  %v1189_v4 = vmul.f32 1.442695, %v1117_v28  ;;  %v1191_v55 = vmul.f32 1.442695, %v1118_v25 }
 0x2bb   : > { %v1030_v27 = vpop.xlane.xlu1 %1029  ;;  %v1301_v13 = vadd.f32 %v3250_v34, %v3248_v52 }
 0x2bc   : > { %2414 = vpow2.f32 %v1189_v4  ;;  %v1119_v18 = vsub.f32 %v3108_v24, %v1030_v27  ;;  %v1120_v40 = vsub.f32 %v3110_v48, %v1030_v27 }
 0x2bd   : > { %v3258_v42 = vpop.eup %2402  ;;  %2416 = vpow2.f32 %v1191_v55  ;;  %1302 = vadd.xlane.f32.xlu0 %v1301_v13 }
 0x2be   : > { %v3260_v6 = vpop.eup %2404  ;;  %v1193_v62 = vmul.f32 1.442695, %v1119_v18  ;;  %v1195_v57 = vmul.f32 1.442695, %v1120_v40  ;;  %v1088_v18 = vmax.f32 %v3226_v37, %v3228_v19  ;;  %v3278_v40 = vpop.f32.mrf.mxu1 }
 0x2bf   : > { %v1033_v8 = vpop.xlane.xlu0 %1032  ;;  %v1304_v51 = vadd.f32 %v3260_v6, %v3258_v42 }
 0x2c0   : > { %2418 = vpow2.f32 %v1193_v62  ;;  %v1121_v24 = vsub.f32 %v3114_v29, %v1033_v8  ;;  %v1122_v48 = vsub.f32 %v3116_v23, %v1033_v8 }
 0x2c1   : > { %v3270_v28 = vpop.eup %2406  ;;  %2420 = vpow2.f32 %v1195_v57  ;;  %1305 = vadd.xlane.f32.xlu1 %v1304_v51  ;;  %1086 = vmax.xlane.f32.xlu0 %v1085_v45 }
 0x2c2   : > { %v3272_v25 = vpop.eup %2408  ;;  %v1197_v4 = vmul.f32 1.442695, %v1121_v24  ;;  %v1199_v55 = vmul.f32 1.442695, %v1122_v48  ;;  %v1091_v48 = vmax.f32 %v3232_v63, %v3236_v9 }
 0x2c3   : > { %v1036_v27 = vpop.xlane.xlu1 %1035  ;;  %v1307_v13 = vadd.f32 %v3272_v25, %v3270_v28 }
 0x2c4   : > { %2422 = vpow2.f32 %v1197_v4  ;;  %v1123_v29 = vsub.f32 %v3120_v21, %v1036_v27  ;;  %v1124_v23 = vsub.f32 %v3122_v50, %v1036_v27  ;;  %v3290_v4 = vpop.f32.mrf.mxu1 }
 0x2c5   : > { %v3282_v62 = vpop.eup %2410  ;;  %2424 = vpow2.f32 %v1199_v55  ;;  %1308 = vadd.xlane.f32.xlu0 %v1307_v13  ;;  %1089 = vmax.xlane.f32.xlu1 %v1088_v18 }
 0x2c6   : > { %3774 = vst [vmem:[#allocation8_spill] sm:$0xff] %v3282_v62  ;;  %v3284_v57 = vpop.eup %2412  ;;  %v1201_v8 = vmul.f32 1.442695, %v1123_v29  ;;  %v1203_v51 = vmul.f32 1.442695, %v1124_v23 }
 0x2c7   : > { %v1039_v45 = vpop.xlane.xlu0 %1038  ;;  %v1310_v24 = vadd.f32 %v3284_v57, %v3282_v62  ;;  %v3302_v62 = vpop.f32.mrf.mxu1 }
 0x2c8   : > { %2426 = vpow2.f32 %v1201_v8  ;;  %v1125_v21 = vsub.f32 %v3126_v47, %v1039_v45  ;;  %v1126_v50 = vsub.f32 %v3128_v46, %v1039_v45  ;;  %v1094_v8 = vmax.f32 %v3240_v39, %v3244_v20 }
 0x2c9   : > { %v3294_v55 = vpop.eup %2414  ;;  %2428 = vpow2.f32 %v1203_v51  ;;  %1311 = vadd.xlane.f32.xlu1 %v1310_v24  ;;  %1092 = vmax.xlane.f32.xlu0 %v1091_v48 }
 0x2ca   : > { %3775 = vst [vmem:[#allocation9_spill] sm:$0xff] %v3294_v55  ;;  %v3296_v27 = vpop.eup %2416  ;;  %v1205_v13 = vmul.f32 1.442695, %v1125_v21  ;;  %v1207_v18 = vmul.f32 1.442695, %v1126_v50 }
 0x2cb   : > { %v1042_v29 = vpop.xlane.xlu1 %1041  ;;  %v1313_v23 = vadd.f32 %v3296_v27, %v3294_v55  ;;  %v3314_v55 = vpop.f32.mrf.mxu1 }
 0x2cc   : > { %2430 = vpow2.f32 %v1205_v13  ;;  %v1127_v47 = vsub.f32 %v3132_v30, %v1042_v29  ;;  %v1128_v46 = vsub.f32 %v3134_v1, %v1042_v29  ;;  %v1097_v13 = vmax.f32 %v3254_v43, %v3266_v59 }
 0x2cd   : > { %v3306_v51 = vpop.eup %2418  ;;  %2432 = vpow2.f32 %v1207_v18  ;;  %1314 = vadd.xlane.f32.xlu0 %v1313_v23  ;;  %1095 = vmax.xlane.f32.xlu1 %v1094_v8 }
 0x2ce   : > { %3776 = vst [vmem:[#allocation10_spill] sm:$0xff] %v3306_v51  ;;  %v3308_v45 = vpop.eup %2420  ;;  %v1209_v24 = vmul.f32 1.442695, %v1127_v47  ;;  %v1211_v48 = vmul.f32 1.442695, %v1128_v46 }
 0x2cf   : > { %v1045_v21 = vpop.xlane.xlu0 %1044  ;;  %v1316_v50 = vadd.f32 %v3308_v45, %v3306_v51  ;;  %v3326_v51 = vpop.f32.mrf.mxu1 }
 0x2d0   : > { %2434 = vpow2.f32 %v1209_v24  ;;  %v1129_v30 = vsub.f32 %v3138_v17, %v1045_v21  ;;  %v1130_v1 = vsub.f32 %v3140_v10, %v1045_v21  ;;  %v1100_v24 = vmax.f32 %v3278_v40, %v3290_v4 }
 0x2d1   : > { %v3318_v18 = vpop.eup %2422  ;;  %2436 = vpow2.f32 %v1211_v48  ;;  %1317 = vadd.xlane.f32.xlu1 %v1316_v50  ;;  %1098 = vmax.xlane.f32.xlu0 %v1097_v13 }
 0x2d2   : > { %3777 = vst [vmem:[#allocation11_spill] sm:$0xff] %v3318_v18  ;;  %v3320_v29 = vpop.eup %2424  ;;  %v1213_v23 = vmul.f32 1.442695, %v1129_v30  ;;  %v1215_v8 = vmul.f32 1.442695, %v1130_v1 }
 0x2d3   : > { %v1048_v47 = vpop.xlane.xlu1 %1047  ;;  %v1319_v46 = vadd.f32 %v3320_v29, %v3318_v18  ;;  %v3338_v18 = vpop.f32.mrf.mxu1 }
 0x2d4   : > { %2438 = vpow2.f32 %v1213_v23  ;;  %v1131_v17 = vsub.f32 %v3144_v36, %v1048_v47  ;;  %v1132_v10 = vsub.f32 %v3146_v5, %v1048_v47  ;;  %v1103_v23 = vmax.f32 %v3302_v62, %v3314_v55 }
 0x2d5   : > { %v3330_v48 = vpop.eup %2426  ;;  %2440 = vpow2.f32 %v1215_v8  ;;  %1320 = vadd.xlane.f32.xlu0 %v1319_v46  ;;  %1101 = vmax.xlane.f32.xlu1 %v1100_v24 }
 0x2d6   : > { %v3332_v21 = vpop.eup %2428  ;;  %v1217_v50 = vmul.f32 1.442695, %v1131_v17  ;;  %v1219_v13 = vmul.f32 1.442695, %v1132_v10  ;;  %v1106_v17 = vmax.f32 %v3326_v51, %v3338_v18 }
 0x2d7   : > { %v1051_v30 = vpop.xlane.xlu0 %1050  ;;  %v1322_v1 = vadd.f32 %v3332_v21, %v3330_v48 }
 0x2d8   : > { %2442 = vpow2.f32 %v1217_v50  ;;  %v1133_v36 = vsub.f32 %v3150_v33, %v1051_v30  ;;  %v1134_v5 = vsub.f32 %v3152_v22, %v1051_v30 }
 0x2d9   : > { %v3342_v8 = vpop.eup %2430  ;;  %2444 = vpow2.f32 %v1219_v13  ;;  %1323 = vadd.xlane.f32.xlu1 %v1322_v1  ;;  %1104 = vmax.xlane.f32.xlu0 %v1103_v23 }
 0x2da   : > { %3778 = vst [vmem:[#allocation12_spill] sm:$0xff] %v3342_v8  ;;  %v3344_v47 = vpop.eup %2432  ;;  %v1221_v46 = vmul.f32 1.442695, %v1133_v36  ;;  %v1223_v24 = vmul.f32 1.442695, %v1134_v5 }
 0x2db   : > { %v1054_v10 = vpop.xlane.xlu1 %1053  ;;  %v1325_v50 = vadd.f32 %v3344_v47, %v3342_v8 }
 0x2dc   : > { %2446 = vpow2.f32 %v1221_v46  ;;  %v1135_v33 = vsub.f32 %v3156_v11, %v1054_v10  ;;  %v1136_v22 = vsub.f32 %v3158_v31, %v1054_v10 }
 0x2dd   : > { %v3352_v30 = vpop.eup %2434  ;;  %2448 = vpow2.f32 %v1223_v24  ;;  %1326 = vadd.xlane.f32.xlu0 %v1325_v50  ;;  %1107 = vmax.xlane.f32.xlu1 %v1106_v17 }
 0x2de   : > { %v3354_v13 = vpop.eup %2436  ;;  %v1225_v1 = vmul.f32 1.442695, %v1135_v33  ;;  %v1227_v23 = vmul.f32 1.442695, %v1136_v22 }
 0x2df   : > { %v1057_v36 = vpop.xlane.xlu0 %1056  ;;  %v1328_v5 = vadd.f32 %v3354_v13, %v3352_v30 }
 0x2e0   : > { %2450 = vpow2.f32 %v1225_v1  ;;  %v1137_v46 = vsub.f32 %v3162_v3, %v1057_v36  ;;  %v1138_v11 = vsub.f32 %v3164_v61, %v1057_v36 }
 0x2e1   : > { %v3360_v8 = vpop.eup %2438  ;;  %2452 = vpow2.f32 %v1227_v23  ;;  %1329 = vadd.xlane.f32.xlu1 %v1328_v5 }
 0x2e2   : > { %v3362_v31 = vpop.eup %2440  ;;  %v1229_v24 = vmul.f32 1.442695, %v1137_v46  ;;  %v1231_v17 = vmul.f32 1.442695, %v1138_v11 }
 0x2e3   : > { %v1060_v10 = vpop.xlane.xlu1 %1059  ;;  %v1331_v50 = vadd.f32 %v3362_v31, %v3360_v8 }
 0x2e4   : > { %2454 = vpow2.f32 %v1229_v24  ;;  %v1139_v33 = vsub.f32 %v3168_v0, %v1060_v10  ;;  %v1140_v22 = vsub.f32 %v3170_v53, %v1060_v10 }
 0x2e5   : > { %v3368_v3 = vpop.eup %2442  ;;  %2456 = vpow2.f32 %v1231_v17  ;;  %1332 = vadd.xlane.f32.xlu0 %v1331_v50 }
 0x2e6   : > { %v3370_v61 = vpop.eup %2444  ;;  %v1233_v1 = vmul.f32 1.442695, %v1139_v33  ;;  %v1235_v23 = vmul.f32 1.442695, %v1140_v22 }
 0x2e7   : > { %v1063_v36 = vpop.xlane.xlu0 %1062  ;;  %v1334_v5 = vadd.f32 %v3370_v61, %v3368_v3 }
 0x2e8   : > { %2458 = vpow2.f32 %v1233_v1  ;;  %v1141_v46 = vsub.f32 %v3174_v60, %v1063_v36  ;;  %v1142_v11 = vsub.f32 %v3176_v14, %v1063_v36 }
 0x2e9   : > { %v3376_v0 = vpop.eup %2446  ;;  %2460 = vpow2.f32 %v1235_v23  ;;  %1335 = vadd.xlane.f32.xlu1 %v1334_v5 }
 0x2ea   : > { %v3378_v53 = vpop.eup %2448  ;;  %v1237_v24 = vmul.f32 1.442695, %v1141_v46  ;;  %v1239_v17 = vmul.f32 1.442695, %v1142_v11 }
 0x2eb   : > { %v1066_v10 = vpop.xlane.xlu1 %1065  ;;  %v1337_v50 = vadd.f32 %v3378_v53, %v3376_v0 }
 0x2ec   : > { %2462 = vpow2.f32 %v1237_v24  ;;  %v1143_v33 = vsub.f32 %v3180_v58, %v1066_v10  ;;  %v1144_v22 = vsub.f32 %v3182_v41, %v1066_v10 }
 0x2ed   : > { %v3384_v60 = vpop.eup %2450  ;;  %2464 = vpow2.f32 %v1239_v17  ;;  %1338 = vadd.xlane.f32.xlu0 %v1337_v50 }
 0x2ee   : > { %v3386_v14 = vpop.eup %2452  ;;  %v1241_v1 = vmul.f32 1.442695, %v1143_v33  ;;  %v1243_v23 = vmul.f32 1.442695, %v1144_v22 }
 0x2ef   : > { %v1069_v36 = vpop.xlane.xlu0 %1068  ;;  %v1340_v5 = vadd.f32 %v3386_v14, %v3384_v60 }
 0x2f0   : > { %2466 = vpow2.f32 %v1241_v1  ;;  %v1145_v46 = vsub.f32 %v3186_v44, %v1069_v36  ;;  %v1146_v11 = vsub.f32 %v3188_v49, %v1069_v36 }
 0x2f1   : > { %v3392_v58 = vpop.eup %2454  ;;  %2468 = vpow2.f32 %v1243_v23  ;;  %1341 = vadd.xlane.f32.xlu1 %v1340_v5 }
 0x2f2   : > { %v3394_v41 = vpop.eup %2456  ;;  %v1245_v24 = vmul.f32 1.442695, %v1145_v46  ;;  %v1247_v17 = vmul.f32 1.442695, %v1146_v11 }
 0x2f3   : > { %v1072_v10 = vpop.xlane.xlu1 %1071  ;;  %v1343_v50 = vadd.f32 %v3394_v41, %v3392_v58 }
 0x2f4   : > { %2470 = vpow2.f32 %v1245_v24  ;;  %v1147_v33 = vsub.f32 %v3192_v16, %v1072_v10  ;;  %v1148_v22 = vsub.f32 %v3194_v38, %v1072_v10 }
 0x2f5   : > { %v3400_v44 = vpop.eup %2458  ;;  %2472 = vpow2.f32 %v1247_v17  ;;  %1344 = vadd.xlane.f32.xlu0 %v1343_v50 }
 0x2f6   : > { %v3402_v49 = vpop.eup %2460  ;;  %v1249_v1 = vmul.f32 1.442695, %v1147_v33  ;;  %v1251_v23 = vmul.f32 1.442695, %v1148_v22 }
 0x2f7   : > { %v1075_v36 = vpop.xlane.xlu0 %1074  ;;  %v1346_v5 = vadd.f32 %v3402_v49, %v3400_v44 }
 0x2f8   : > { %2474 = vpow2.f32 %v1249_v1  ;;  %v1149_v46 = vsub.f32 %v3198_v7, %v1075_v36  ;;  %v1150_v11 = vsub.f32 %v3200_v12, %v1075_v36 }
 0x2f9   : > { %v3408_v16 = vpop.eup %2462  ;;  %2476 = vpow2.f32 %v1251_v23  ;;  %1347 = vadd.xlane.f32.xlu1 %v1346_v5 }
 0x2fa   : > { %v3410_v38 = vpop.eup %2464  ;;  %v1253_v24 = vmul.f32 1.442695, %v1149_v46  ;;  %v1255_v17 = vmul.f32 1.442695, %v1150_v11 }
 0x2fb   : > { %v1078_v10 = vpop.xlane.xlu1 %1077  ;;  %v1349_v50 = vadd.f32 %v3410_v38, %v3408_v16 }
 0x2fc   : > { %2478 = vpow2.f32 %v1253_v24  ;;  %v1151_v33 = vsub.f32 %v3204_v26, %v1078_v10  ;;  %v1152_v22 = vsub.f32 %v3206_v56, %v1078_v10 }
 0x2fd   : > { %v3416_v7 = vpop.eup %2466  ;;  %2480 = vpow2.f32 %v1255_v17  ;;  %1350 = vadd.xlane.f32.xlu0 %v1349_v50 }
 0x2fe   : > { %v3418_v12 = vpop.eup %2468  ;;  %v1257_v1 = vmul.f32 1.442695, %v1151_v33  ;;  %v1259_v23 = vmul.f32 1.442695, %v1152_v22  ;;  %v3780_v22 = vld [vmem:[#allocation7_spill] sm:$0xff] }
 0x2ff   : > { %v1081_v36 = vpop.xlane.xlu0 %1080  ;;  %v1352_v5 = vadd.f32 %v3418_v12, %v3416_v7 }
 0x300   : > { %2482 = vpow2.f32 %v1257_v1  ;;  %v1153_v46 = vsub.f32 %v3210_v32, %v1081_v36  ;;  %v1154_v11 = vsub.f32 %v3212_v35, %v1081_v36 }
 0x301   : > { %v3424_v26 = vpop.eup %2470  ;;  %2484 = vpow2.f32 %v1259_v23  ;;  %1353 = vadd.xlane.f32.xlu1 %v1352_v5 }
 0x302   : > { %3779 = vst [vmem:[#allocation3_spill] sm:$0xff] %v3424_v26  ;;  %v3426_v56 = vpop.eup %2472  ;;  %v1261_v24 = vmul.f32 1.442695, %v1153_v46  ;;  %v1263_v17 = vmul.f32 1.442695, %v1154_v11 }
 0x303   : > { %v1084_v10 = vpop.xlane.xlu1 %1083  ;;  %v1355_v50 = vadd.f32 %v3426_v56, %v3424_v26 }
 0x304   : > { %2486 = vpow2.f32 %v1261_v24  ;;  %v1155_v33 = vsub.f32 %v3216_v54, %v1084_v10  ;;  %v1156_v1 = vsub.f32 %v3780_v22, %v1084_v10 }
 0x305   : > { %v3432_v32 = vpop.eup %2474  ;;  %2488 = vpow2.f32 %v1263_v17  ;;  %1356 = vadd.xlane.f32.xlu0 %v1355_v50 }
 0x306   : > { %v3434_v35 = vpop.eup %2476  ;;  %v1265_v23 = vmul.f32 1.442695, %v1155_v33  ;;  %v1267_v36 = vmul.f32 1.442695, %v1156_v1 }
 0x307   : > { %v1358_v5 = vadd.f32 %v3434_v35, %v3432_v32 }
 0x308   : > { %2490 = vpow2.f32 %v1265_v23 }
 0x309   : > { %v3438_v46 = vpop.eup %2478  ;;  %2492 = vpow2.f32 %v1267_v36  ;;  %1359 = vadd.xlane.f32.xlu1 %v1358_v5 }
 0x30a   : > { %3781 = vst [vmem:[#allocation4_spill] sm:$0xff] %v3438_v46  ;;  %v3440_v11 = vpop.eup %2480 }
 0x30b   : > { %3782 = vst [vmem:[#allocation5_spill] sm:$0xff] %v3440_v11  ;;  %v1361_v54 = vadd.f32 %v3440_v11, %v3438_v46 }
 0x30d   : > { %v3444_v24 = vpop.eup %2482  ;;  %1362 = vadd.xlane.f32.xlu0 %v1361_v54 }
 0x30e   : > { %3783 = vst [vmem:[#allocation6_spill] sm:$0xff] %v3444_v24  ;;  %v3446_v17 = vpop.eup %2484 }
 0x30f   : > { %3784 = vst [vmem:[#allocation7_spill] sm:$0xff] %v3446_v17  ;;  %v1364_v10 = vadd.f32 %v3446_v17, %v3444_v24 }
 0x311   : > { %v3450_v50 = vpop.eup %2486  ;;  %1365 = vadd.xlane.f32.xlu1 %v1364_v10 }
 0x312   : > { %3785 = vst [vmem:[#allocation13_spill] sm:$0xff] %v3450_v50  ;;  %v3452_v33 = vpop.eup %2488 }
 0x313   : > { %3786 = vst [vmem:[#allocation14_spill] sm:$0xff] %v3452_v33  ;;  %v1367_v22 = vadd.f32 %v3452_v33, %v3450_v50 }
 0x315   : > { %v3456_v1 = vpop.eup %2490  ;;  %1368 = vadd.xlane.f32.xlu0 %v1367_v22 }
 0x316   : > { %3787 = vst [vmem:[#allocation15_spill] sm:$0xff] %v3456_v1  ;;  %v3458_v23 = vpop.eup %2492 }
 0x317   : > { %3788 = vst [vmem:[#allocation16_spill] sm:$0xff] %v3458_v23  ;;  %v1370_v36 = vadd.f32 %v3458_v23, %v3456_v1 }
 0x319   : > { %1371 = vadd.xlane.f32.xlu1 %v1370_v36 }
 0x346   : > { %v1303_v5 = vpop.xlane.xlu0 %1302 }
 0x347   : > { %2494 = vrcp.f32 %v1303_v5 }
 0x34a   : > { %v1306_v54 = vpop.xlane.xlu1 %1305  ;;  %v1087_v46 = vpop.xlane.xlu0 %1086 }
 0x34b   : > { %2496 = vrcp.f32 %v1306_v54  ;;  %v1157_v10 = vsub.f32 %v3222_v2, %v1087_v46  ;;  %v1158_v24 = vsub.f32 %v3224_v15, %v1087_v46 }
 0x34d   : > { %v1269_v17 = vmul.f32 1.442695, %v1157_v10  ;;  %v1271_v50 = vmul.f32 1.442695, %v1158_v24 }
 0x34e   : > { %v1309_v33 = vpop.xlane.xlu0 %1308  ;;  %v1090_v11 = vpop.xlane.xlu1 %1089 }
 0x34f   : > { %2498 = vpow2.f32 %v1269_v17  ;;  %v1159_v22 = vsub.f32 %v3226_v37, %v1090_v11  ;;  %v1160_v26 = vsub.f32 %v3228_v19, %v1090_v11 }
 0x350   : > { %2500 = vpow2.f32 %v1271_v50 }
 0x351   : > { %v1273_v36 = vmul.f32 1.442695, %v1159_v22  ;;  %v1275_v1 = vmul.f32 1.442695, %v1160_v26  ;;  %2502 = vrcp.f32 %v1309_v33 }
 0x352   : > { %v1312_v5 = vpop.xlane.xlu1 %1311  ;;  %v1093_v23 = vpop.xlane.xlu0 %1092 }
 0x353   : > { %2504 = vpow2.f32 %v1273_v36  ;;  %v1161_v2 = vsub.f32 %v3232_v63, %v1093_v23  ;;  %v1162_v15 = vsub.f32 %v3236_v9, %v1093_v23 }
 0x354   : > { %2506 = vpow2.f32 %v1275_v1  ;;  %v2495_v17 = vpop.eup %2494 }
 0x355   : > { %2508 = vrcp.f32 %v1312_v5  ;;  %v1277_v46 = vmul.f32 1.442695, %v1161_v2  ;;  %v1279_v24 = vmul.f32 1.442695, %v1162_v15  ;;  %v1430_v63 = vmul.f32 %v2495_v17, %v3250_v34 }
 0x356   : > { %v1315_v54 = vpop.xlane.xlu0 %1314  ;;  %v1096_v37 = vpop.xlane.xlu1 %1095  ;;  %v1429_v10 = vmul.f32 %v2495_v17, %v3248_v52 }
 0x357   : > { %2510 = vpow2.f32 %v1277_v46  ;;  %v1163_v19 = vsub.f32 %v3240_v39, %v1096_v37  ;;  %v1164_v26 = vsub.f32 %v3244_v20, %v1096_v37 }
 0x358   : > { %v2497_v11 = vpop.eup %2496  ;;  %2512 = vpow2.f32 %v1279_v24 }
 0x359   : > { %v1281_v50 = vmul.f32 1.442695, %v1163_v19  ;;  %v1283_v33 = vmul.f32 1.442695, %v1164_v26  ;;  %v1432_v9 = vmul.f32 %v2497_v11, %v3260_v6  ;;  %2514 = vrcp.f32 %v1315_v54 }
 0x35a   : > { %v1318_v1 = vpop.xlane.xlu1 %1317  ;;  %v1099_v23 = vpop.xlane.xlu0 %1098  ;;  %v1431_v22 = vmul.f32 %v2497_v11, %v3258_v42 }
 0x35b   : > { %2516 = vpow2.f32 %v1281_v50  ;;  %v1165_v39 = vsub.f32 %v3254_v43, %v1099_v23  ;;  %v1166_v20 = vsub.f32 %v3266_v59, %v1099_v23  ;;  %v1494_v36 = vpack.c.bf16 %v1432_v9, %v1430_v63 }
 0x35c   : > { %v3476_v5 = vpop.eup %2498  ;;  %2518 = vpow2.f32 %v1283_v33  ;;  %v1493_v2 = vpack.c.bf16 %v1431_v22, %v1429_v10  ;;  %v3789_v10 = vld [vmem:[#allocation8_spill] sm:$0xff] }
 0x35d   : > { %v3478_v34 = vpop.eup %2500  ;;  %2520 = vrcp.f32 %v1318_v1  ;;  %v1285_v6 = vmul.f32 1.442695, %v1165_v39  ;;  %v1287_v15 = vmul.f32 1.442695, %v1166_v20  ;;  %1557 = vmatprep.mubr.bf16.mxu0 %v1494_v36 }
 0x35e   : > { %1558 = vmatmul.mubr.bf16.vlgmr.msra.gmra.mxu0 %v1493_v2  ;;  %v1321_v52 = vpop.xlane.xlu0 %1320  ;;  %v1102_v46 = vpop.xlane.xlu1 %1101  ;;  %v1373_v42 = vadd.f32 %v3478_v34, %v3476_v5 }
 0x35f   : > { %v2503_v43 = vpop.eup %2502  ;;  %2522 = vpow2.f32 %v1285_v6  ;;  %v1167_v59 = vsub.f32 %v3278_v40, %v1102_v46  ;;  %v1168_v24 = vsub.f32 %v3290_v4, %v1102_v46 }
 0x360   : > { %v3484_v17 = vpop.eup %2504  ;;  %2524 = vpow2.f32 %v1287_v15  ;;  %1374 = vadd.xlane.f32.xlu0 %v1373_v42  ;;  %v1434_v63 = vmul.f32 %v2503_v43, %v3272_v25  ;;  %v1433_v23 = vmul.f32 %v2503_v43, %v3270_v28 }
 0x361   : > { %v3486_v54 = vpop.eup %2506  ;;  %v1289_v37 = vmul.f32 1.442695, %v1167_v59  ;;  %v1291_v19 = vmul.f32 1.442695, %v1168_v24  ;;  %2526 = vrcp.f32 %v1321_v52 }
 0x362   : > { %v2509_v26 = vpop.eup %2508  ;;  %v1324_v11 = vpop.xlane.xlu1 %1323  ;;  %v1376_v33 = vadd.f32 %v3486_v54, %v3484_v17 }
 0x363   : > { %v1105_v50 = vpop.xlane.xlu0 %1104  ;;  %2528 = vpow2.f32 %v1289_v37  ;;  %v1436_v9 = vmul.f32 %v2509_v26, %v3284_v57  ;;  %v1435_v22 = vmul.f32 %v2509_v26, %v3789_v10 }
 0x364   : > { %v1169_v40 = vsub.f32 %v3302_v62, %v1105_v50  ;;  %v1170_v4 = vsub.f32 %v3314_v55, %v1105_v50  ;;  %v3494_v1 = vpop.eup %2510  ;;  %2530 = vpow2.f32 %v1291_v19  ;;  %1377 = vadd.xlane.f32.xlu1 %v1376_v33 }
 0x365   : > { %v3498_v39 = vpop.eup %2512  ;;  %2532 = vrcp.f32 %v1324_v11  ;;  %v1496_v36 = vpack.c.bf16 %v1436_v9, %v1434_v63  ;;  %v1495_v2 = vpack.c.bf16 %v1435_v22, %v1433_v23  ;;  %v3791_v11 = vld [vmem:[#allocation10_spill] sm:$0xff] }
 0x366   : > { %v1293_v20 = vmul.f32 1.442695, %v1169_v40  ;;  %v1295_v25 = vmul.f32 1.442695, %v1170_v4  ;;  %v1108_v62 = vpop.xlane.xlu1 %1107  ;;  %v1379_v55 = vadd.f32 %v3498_v39, %v3494_v1  ;;  %v2515_v57 = vpop.eup %2514 }
 0x367   : > { %1565 = vmatprep.mubr.bf16.mxu0 %v1496_v36  ;;  %v1327_v6 = vpop.xlane.xlu0 %1326  ;;  %v1171_v15 = vsub.f32 %v3326_v51, %v1108_v62  ;;  %v1172_v28 = vsub.f32 %v3338_v18, %v1108_v62  ;;  %v1438_v19 = vmul.f32 %v2515_v57, %v3296_v27  ;;  %v3790_v18 = vld [vmem:[#allocation9_spill] sm:$0xff]  ;;  %v3792_v62 = vld [vmem:[#allocation11_spill] sm:$0xff] }
 0x368   : > { %2534 = vpow2.f32 %v1293_v20  ;;  %v3504_v52 = vpop.eup %2516  ;;  %1566 = vmatmul.mubr.bf16.gmra.mxu0 %v1495_v2  ;;  %1380 = vadd.xlane.f32.xlu0 %v1379_v55  ;;  %v1437_v26 = vmul.f32 %v2515_v57, %v3790_v18 }
 0x369   : > { %2536 = vpow2.f32 %v1295_v25  ;;  %v3506_v46 = vpop.eup %2518  ;;  %v1297_v42 = vmul.f32 1.442695, %v1171_v15  ;;  %v1299_v43 = vmul.f32 1.442695, %v1172_v28 }
 0x36a   : > { %v2521_v59 = vpop.eup %2520  ;;  %2538 = vrcp.f32 %v1327_v6  ;;  %v1330_v24 = vpop.xlane.xlu1 %1329  ;;  %v1382_v37 = vadd.f32 %v3506_v46, %v3504_v52 }
 0x36b   : > { %2540 = vpow2.f32 %v1297_v42  ;;  %v1440_v51 = vmul.f32 %v2521_v59, %v3308_v45  ;;  %v1439_v50 = vmul.f32 %v2521_v59, %v3791_v11 }
 0x36c   : > { %v3514_v33 = vpop.eup %2522  ;;  %2542 = vpow2.f32 %v1299_v43  ;;  %1383 = vadd.xlane.f32.xlu1 %v1382_v37 }
 0x36d   : > { %v3516_v63 = vpop.eup %2524  ;;  %2544 = vrcp.f32 %v1330_v24  ;;  %v1498_v40 = vpack.c.bf16 %v1440_v51, %v1438_v19  ;;  %v1497_v4 = vpack.c.bf16 %v1439_v50, %v1437_v26  ;;  %v3793_v26 = vld [vmem:[#allocation12_spill] sm:$0xff] }
 0x36e   : > { %v1333_v9 = vpop.xlane.xlu0 %1332  ;;  %v1385_v27 = vadd.f32 %v3516_v63, %v3514_v33  ;;  %v2527_v23 = vpop.eup %2526 }
 0x36f   : > { %1573 = vmatprep.mubr.bf16.mxu0 %v1498_v40  ;;  %2546 = vrcp.f32 %v1333_v9  ;;  %v1442_v36 = vmul.f32 %v2527_v23, %v3320_v29  ;;  %v1441_v55 = vmul.f32 %v2527_v23, %v3792_v62 }
 0x370   : > { %v3520_v45 = vpop.eup %2528  ;;  %1574 = vmatmul.mubr.bf16.gmra.mxu0 %v1497_v4  ;;  %1386 = vadd.xlane.f32.xlu0 %v1385_v27 }
 0x371   : > { %v3522_v10 = vpop.eup %2530 }
 0x372   : > { %v2533_v22 = vpop.eup %2532  ;;  %v1336_v20 = vpop.xlane.xlu1 %1335  ;;  %v1388_v25 = vadd.f32 %v3522_v10, %v3520_v45 }
 0x373   : > { %2548 = vrcp.f32 %v1336_v20  ;;  %v1444_v2 = vmul.f32 %v2533_v22, %v3332_v21  ;;  %v1443_v57 = vmul.f32 %v2533_v22, %v3330_v48 }
 0x374   : > { %1389 = vadd.xlane.f32.xlu1 %v1388_v25 }
 0x375   : > { %v3530_v6 = vpop.eup %2534  ;;  %v1500_v28 = vpack.c.bf16 %v1444_v2, %v1442_v36  ;;  %v1499_v42 = vpack.c.bf16 %v1443_v57, %v1441_v55 }
 0x376   : > { %v3532_v15 = vpop.eup %2536  ;;  %v1339_v43 = vpop.xlane.xlu0 %1338 }
 0x377   : > { %v1391_v59 = vadd.f32 %v3532_v15, %v3530_v6  ;;  %v2539_v24 = vpop.eup %2538  ;;  %1581 = vmatprep.mubr.bf16.mxu0 %v1500_v28  ;;  %2550 = vrcp.f32 %v1339_v43 }
 0x378   : > { %v3536_v29 = vpop.eup %2540  ;;  %1582 = vmatmul.mubr.bf16.gmra.mxu0 %v1499_v42  ;;  %v1446_v51 = vmul.f32 %v2539_v24, %v3344_v47  ;;  %v1445_v11 = vmul.f32 %v2539_v24, %v3793_v26 }
 0x379   : > { %1392 = vadd.xlane.f32.xlu0 %v1391_v59  ;;  %v3538_v21 = vpop.eup %2542 }
 0x37a   : > { %v2545_v48 = vpop.eup %2544  ;;  %v1342_v37 = vpop.xlane.xlu1 %1341  ;;  %v1394_v19 = vadd.f32 %v3538_v21, %v3536_v29 }
 0x37b   : > { %2552 = vrcp.f32 %v1342_v37  ;;  %v1448_v18 = vmul.f32 %v2545_v48, %v3354_v13  ;;  %v1447_v50 = vmul.f32 %v2545_v48, %v3352_v30 }
 0x37c   : > { %1395 = vadd.xlane.f32.xlu1 %v1394_v19  ;;  %v2547_v9 = vpop.eup %2546 }
 0x37d   : > { %v1502_v40 = vpack.c.bf16 %v1448_v18, %v1446_v51  ;;  %v1501_v4 = vpack.c.bf16 %v1447_v50, %v1445_v11  ;;  %v1450_v22 = vmul.f32 %v2547_v9, %v3362_v31  ;;  %v1449_v25 = vmul.f32 %v2547_v9, %v3360_v8 }
 0x37e   : > { %v1345_v27 = vpop.xlane.xlu0 %1344 }
 0x37f   : > { %1589 = vmatprep.mubr.bf16.mxu0 %v1502_v40  ;;  %2554 = vrcp.f32 %v1345_v27 }
 0x380   : > { %v2549_v23 = vpop.eup %2548  ;;  %1590 = vmatmul.mubr.bf16.gmra.mxu0 %v1501_v4 }
 0x381   : > { %v1452_v47 = vmul.f32 %v2549_v23, %v3370_v61  ;;  %v1451_v20 = vmul.f32 %v2549_v23, %v3368_v3 }
 0x382   : > { %v1348_v13 = vpop.xlane.xlu1 %1347 }
 0x383   : > { %2556 = vrcp.f32 %v1348_v13  ;;  %v1504_v30 = vpack.c.bf16 %v1452_v47, %v1450_v22  ;;  %v1503_v36 = vpack.c.bf16 %v1451_v20, %v1449_v25 }
 0x384   : > { %v2551_v2 = vpop.eup %2550 }
 0x385   : > { %1597 = vmatprep.mubr.bf16.mxu0 %v1504_v30  ;;  %v1454_v57 = vmul.f32 %v2551_v2, %v3378_v53  ;;  %v1453_v3 = vmul.f32 %v2551_v2, %v3376_v0  ;;  %v3795_v30 = vld [vmem:[#allocation5_spill] sm:$0xff]  ;;  %v3796_v2 = vld [vmem:[#allocation7_spill] sm:$0xff] }
 0x386   : > { %v1351_v62 = vpop.xlane.xlu0 %1350 }
 0x387   : > { %2558 = vrcp.f32 %v1351_v62 }
 0x388   : > { %v2553_v55 = vpop.eup %2552  ;;  %1598 = vmatmul.mubr.bf16.gmra.mxu0 %v1503_v36 }
 0x389   : > { %v1456_v31 = vmul.f32 %v2553_v55, %v3386_v14  ;;  %v1455_v61 = vmul.f32 %v2553_v55, %v3384_v60  ;;  %v3797_v55 = vld [vmem:[#allocation6_spill] sm:$0xff] }
 0x38a   : > { %v1354_v28 = vpop.xlane.xlu1 %1353 }
 0x38b   : > { %2560 = vrcp.f32 %v1354_v28  ;;  %v1506_v8 = vpack.c.bf16 %v1456_v31, %v1454_v57  ;;  %v1505_v42 = vpack.c.bf16 %v1455_v61, %v1453_v3  ;;  %v3798_v57 = vld [vmem:[#allocation4_spill] sm:$0xff]  ;;  %v3799_v3 = vld [vmem:[#allocation14_spill] sm:$0xff] }
 0x38c   : > { %v2555_v43 = vpop.eup %2554 }
 0x38d   : > { %1605 = vmatprep.mubr.bf16.mxu0 %v1506_v8  ;;  %v1458_v48 = vmul.f32 %v2555_v43, %v3394_v41  ;;  %v1457_v60 = vmul.f32 %v2555_v43, %v3392_v58 }
 0x38e   : > { %v1357_v59 = vpop.xlane.xlu0 %1356 }
 0x38f   : > { %2562 = vrcp.f32 %v1357_v59  ;;  %v3801_v59 = vld [vmem:[#allocation15_spill] sm:$0xff] }
 0x390   : > { %v2557_v24 = vpop.eup %2556  ;;  %1606 = vmatmul.mubr.bf16.gmra.mxu0 %v1505_v42  ;;  %v3800_v42 = vld [vmem:[#allocation16_spill] sm:$0xff] }
 0x391   : > { %v1460_v53 = vmul.f32 %v2557_v24, %v3402_v49  ;;  %v1459_v14 = vmul.f32 %v2557_v24, %v3400_v44 }
 0x392   : > { %v1360_v37 = vpop.xlane.xlu1 %1359 }
 0x393   : > { %2564 = vrcp.f32 %v1360_v37  ;;  %v1508_v0 = vpack.c.bf16 %v1460_v53, %v1458_v48  ;;  %v1507_v19 = vpack.c.bf16 %v1459_v14, %v1457_v60  ;;  %v3802_v48 = vld [vmem:[#allocation13_spill] sm:$0xff] }
 0x394   : > { %v2559_v51 = vpop.eup %2558 }
 0x395   : > { %1613 = vmatprep.mubr.bf16.mxu0 %v1508_v0  ;;  %v1462_v11 = vmul.f32 %v2559_v51, %v3410_v38  ;;  %v1461_v44 = vmul.f32 %v2559_v51, %v3408_v16 }
 0x396   : > { %v1363_v18 = vpop.xlane.xlu0 %1362 }
 0x397   : > { %2566 = vrcp.f32 %v1363_v18 }
 0x398   : > { %v2561_v26 = vpop.eup %2560  ;;  %1614 = vmatmul.mubr.bf16.gmra.mxu0 %v1507_v19 }
 0x399   : > { %v1464_v41 = vmul.f32 %v2561_v26, %v3418_v12  ;;  %v1463_v49 = vmul.f32 %v2561_v26, %v3416_v7  ;;  %v3794_v7 = vld [vmem:[#allocation3_spill] sm:$0xff] }
 0x39a   : > { %v1366_v50 = vpop.xlane.xlu1 %1365 }
 0x39b   : > { %2568 = vrcp.f32 %v1366_v50  ;;  %v1510_v58 = vpack.c.bf16 %v1464_v41, %v1462_v11  ;;  %v1509_v40 = vpack.c.bf16 %v1463_v49, %v1461_v44 }
 0x39c   : > { %v2563_v4 = vpop.eup %2562 }
 0x39d   : > { %1621 = vmatprep.mubr.bf16.mxu0 %v1510_v58  ;;  %v1466_v23 = vmul.f32 %v2563_v4, %v3426_v56  ;;  %v1465_v47 = vmul.f32 %v2563_v4, %v3794_v7 }
 0x39e   : > { %v1369_v9 = vpop.xlane.xlu0 %1368 }
 0x39f   : > { %2570 = vrcp.f32 %v1369_v9 }
 0x3a0   : > { %v2565_v27 = vpop.eup %2564  ;;  %1622 = vmatmul.mubr.bf16.gmra.mxu0 %v1509_v40 }
 0x3a1   : > { %v1468_v38 = vmul.f32 %v2565_v27, %v3434_v35  ;;  %v1467_v12 = vmul.f32 %v2565_v27, %v3432_v32 }
 0x3a2   : > { %v1372_v22 = vpop.xlane.xlu1 %1371 }
 0x3a3   : > { %2572 = vrcp.f32 %v1372_v22  ;;  %v1512_v16 = vpack.c.bf16 %v1468_v38, %v1466_v23  ;;  %v1511_v20 = vpack.c.bf16 %v1467_v12, %v1465_v47 }
 0x3a4   : > { %v2567_v13 = vpop.eup %2566 }
 0x3a5   : > { %1629 = vmatprep.mubr.bf16.mxu0 %v1512_v16  ;;  %v1470_v36 = vmul.f32 %v2567_v13, %v3795_v30  ;;  %v1469_v35 = vmul.f32 %v2567_v13, %v3798_v57  ;;  %v2590_v57 = vld [vmem:[%s2676_s5] sm:$0xff]  }
 0x3a8   : > { %v2569_v25 = vpop.eup %2568  ;;  %1630 = vmatmul.mubr.bf16.gmra.mxu0 %v1511_v20 }
 0x3a9   : > { %v1472_v62 = vmul.f32 %v2569_v25, %v3796_v2  ;;  %v1471_v56 = vmul.f32 %v2569_v25, %v3797_v55  ;;  %v3590_v55 = vstv %s1686_s10 }
 0x3ab   : > { %v1514_v31 = vpack.c.bf16 %v1472_v62, %v1470_v36  ;;  %v1513_v32 = vpack.c.bf16 %v1471_v56, %v1469_v35  ;;  %v1720_v35 = vunpack.c.l.bf16 %v2590_v57 }
 0x3ac   : > { %v2571_v61 = vpop.eup %2570 }
 0x3ad   : > { %1637 = vmatprep.mubr.bf16.mxu0 %v1514_v31  ;;  %v1474_v8 = vmul.f32 %v2571_v61, %v3799_v3  ;;  %v1473_v53 = vmul.f32 %v2571_v61, %v3802_v48 }
 0x3b0   : > { %v2573_v28 = vpop.eup %2572  ;;  %1638 = vmatmul.mubr.bf16.gmra.mxu0 %v1513_v32  ;;  %v1721_v32 = vunpack.c.h.bf16 %v2590_v57 }
 0x3b1   : > { %v1476_v43 = vmul.f32 %v2573_v28, %v3800_v42  ;;  %v1475_v24 = vmul.f32 %v2573_v28, %v3801_v59 }
 0x3b3   : > { %v1516_v14 = vpack.c.bf16 %v1476_v43, %v1474_v8  ;;  %v1515_v37 = vpack.c.bf16 %v1475_v24, %v1473_v53  ;;  %v2591_v24 = vld [vmem:[%s2676_s5 + $0x8] sm:$0xff]  }
 0x3b4   : > { %v1722_v48 = vunpack.c.l.bf16 %v2591_v24 }
 0x3b5   : > { %1645 = vmatprep.mubr.bf16.mxu0 %v1516_v14 }
 0x3b8   : > { %1646 = vmatmul.mubr.bf16.gmra.mxu0 %v1515_v37 }
 0x3e9   : > { %v1375_v60 = vpop.xlane.xlu0 %1374 }
 0x3ea   : > { %2574 = vrcp.f32 %v1375_v60 }
 0x3ed   : > { %v1378_v0 = vpop.xlane.xlu1 %1377 }
 0x3ee   : > { %2576 = vrcp.f32 %v1378_v0 }
 0x3f1   : > { %v1381_v19 = vpop.xlane.xlu0 %1380 }
 0x3f2   : > { %2578 = vrcp.f32 %v1381_v19  ;;  %v1723_v19 = vunpack.c.h.bf16 %v2591_v24 }
 0x3f5   : > { %v1384_v51 = vpop.xlane.xlu1 %1383 }
 0x3f6   : > { %2580 = vrcp.f32 %v1384_v51 }
 0x3f7   : > { %v2575_v18 = vpop.eup %2574 }
 0x3f8   : > { %v1478_v41 = vmul.f32 %v2575_v18, %v3478_v34  ;;  %v1477_v50 = vmul.f32 %v2575_v18, %v3476_v5 }
 0x3f9   : > { %v1387_v26 = vpop.xlane.xlu0 %1386 }
 0x3fa   : > { %2582 = vrcp.f32 %v1387_v26 }
 0x3fb   : > { %v2577_v11 = vpop.eup %2576 }
 0x3fc   : > { %v1480_v49 = vmul.f32 %v2577_v11, %v3486_v54  ;;  %v1479_v44 = vmul.f32 %v2577_v11, %v3484_v17 }
 0x3fd   : > { %v1390_v58 = vpop.xlane.xlu1 %1389 }
 0x3fe   : > { %2584 = vrcp.f32 %v1390_v58  ;;  %v1518_v40 = vpack.c.bf16 %v1480_v49, %v1478_v41  ;;  %v1517_v4 = vpack.c.bf16 %v1479_v44, %v1477_v50  ;;  %v2592_v50 = vld [vmem:[%s2676_s5 + $0x10] sm:$0xff]  }
 0x3ff   : > { %v2579_v9 = vpop.eup %2578  ;;  %v1724_v44 = vunpack.c.l.bf16 %v2592_v50 }
 0x400   : > { %1653 = vmatprep.mubr.bf16.mxu0 %v1518_v40  ;;  %v1482_v38 = vmul.f32 %v2579_v9, %v3498_v39  ;;  %v1481_v54 = vmul.f32 %v2579_v9, %v3494_v1 }
 0x401   : > { %1654 = vmatmul.mubr.bf16.gmra.mxu0 %v1517_v4 }
 0x402   : > { %v1393_v27 = vpop.xlane.xlu0 %1392 }
 0x403   : > { %v2581_v23 = vpop.eup %2580  ;;  %2586 = vrcp.f32 %v1393_v27 }
 0x404   : > { %v1484_v34 = vmul.f32 %v2581_v23, %v3506_v46  ;;  %v1483_v5 = vmul.f32 %v2581_v23, %v3504_v52 }
 0x405   : > { %v1396_v12 = vpop.xlane.xlu1 %1395 }
 0x406   : > { %2588 = vrcp.f32 %v1396_v12  ;;  %v1520_v17 = vpack.c.bf16 %v1484_v34, %v1482_v38  ;;  %v1519_v22 = vpack.c.bf16 %v1483_v5, %v1481_v54  ;;  %v1725_v38 = vunpack.c.h.bf16 %v2592_v50 }
 0x407   : > { %v2583_v7 = vpop.eup %2582 }
 0x408   : > { %1661 = vmatprep.mubr.bf16.mxu0 %v1520_v17  ;;  %v1486_v16 = vmul.f32 %v2583_v7, %v3516_v63  ;;  %v1485_v39 = vmul.f32 %v2583_v7, %v3514_v33  ;;  %v2593_v7 = vld [vmem:[%s2676_s5 + $0x18] sm:$0xff]  }
 0x409   : > { %1662 = vmatmul.mubr.bf16.gmra.mxu0 %v1519_v22 }
 0x40b   : > { %v2585_v47 = vpop.eup %2584 }
 0x40c   : > { %v1488_v20 = vmul.f32 %v2585_v47, %v3522_v10  ;;  %v1487_v46 = vmul.f32 %v2585_v47, %v3520_v45  ;;  %v1726_v47 = vunpack.c.l.bf16 %v2593_v7 }
 0x40e   : > { %v1522_v13 = vpack.c.bf16 %v1488_v20, %v1486_v16  ;;  %v1521_v1 = vpack.c.bf16 %v1487_v46, %v1485_v39 }
 0x410   : > { %1669 = vmatprep.mubr.bf16.mxu0 %v1522_v13  ;;  %v2587_v52 = vpop.eup %2586 }
 0x411   : > { %1670 = vmatmul.mubr.bf16.gmra.mxu0 %v1521_v1  ;;  %v1490_v30 = vmul.f32 %v2587_v52, %v3532_v15  ;;  %v1489_v2 = vmul.f32 %v2587_v52, %v3530_v6  ;;  %v1727_v52 = vunpack.c.h.bf16 %v2593_v7 }
 0x413   : > { %v2589_v25 = vpop.eup %2588 }
 0x414   : > { %v1492_v36 = vmul.f32 %v2589_v25, %v3538_v21  ;;  %v1491_v63 = vmul.f32 %v2589_v25, %v3536_v29 }
 0x416   : > { %v1524_v10 = vpack.c.bf16 %v1492_v36, %v1490_v30  ;;  %v1523_v62 = vpack.c.bf16 %v1491_v63, %v1489_v2 }
 0x418   : > { %1677 = vmatprep.mubr.bf16.mxu0 %v1524_v10 }
 0x419   : > { %1678 = vmatmul.mubr.bf16.gmra.mxu0 %v1523_v62  ;;  %v2594_v62 = vld [vmem:[%s2676_s5 + $0x20] sm:$0xff]  }
 0x41e   : > { %v2213_v33 = vpop.f32.mrf.mxu0 }
 0x420   : > { %v2214_v45 = vpop.f32.mrf.mxu0 }
 0x421   : > { %v2215_v56 = vadd.f32 %v2214_v45, %v2213_v33  ;;  %v1728_v33 = vunpack.c.l.bf16 %v2594_v62 }
 0x422   : > { %v2216_v15 = vpop.f32.mrf.mxu0 }
 0x423   : > { %v1688_v21 = vmul.f32 %v2215_v56, %v3590_v55 }
 0x424   : > { %v2217_v6 = vpop.f32.mrf.mxu0 }
 0x425   : > { %v1752_v31 = vadd.f32 %v1720_v35, %v1688_v21  ;;  %v2218_v29 = vadd.f32 %v2217_v6, %v2216_v15  ;;  %v1729_v6 = vunpack.c.h.bf16 %v2594_v62 }
 0x427   : > { %v2099_v61 = vpack.c.bf16 %v1752_v31, %v1752_v31  ;;  %v1689_v28 = vmul.f32 %v2218_v29, %v3590_v55 }
 0x428   : > { %v2219_v3 = vpop.f32.mrf.mxu0 }
 0x429   : > { %1913 = vst.msk [vmem:[%s3599_s13] sm:$0xf] %vm1912_vm1, %v2099_v61  ;;  %v1753_v8 = vadd.f32 %v1721_v32, %v1689_v28 }
 0x42a   : > { %v2220_v42 = vpop.f32.mrf.mxu0 }
 0x42b   : > { %v2100_v43 = vpack.c.bf16 %v1753_v8, %v1753_v8  ;;  %v2221_v59 = vadd.f32 %v2220_v42, %v2219_v3  ;;  %v2595_v8 = vld [vmem:[%s2676_s5 + $0x28] sm:$0xff]  }
 0x42c   : > { %v2222_v53 = vpop.f32.mrf.mxu0  ;;  %v1730_v42 = vunpack.c.l.bf16 %v2595_v8 }
 0x42d   : > { %1914 = vst.msk [vmem:[%s3599_s13 + $0x4] sm:$0xf] %vm1912_vm1, %v2100_v43  ;;  %v1690_v14 = vmul.f32 %v2221_v59, %v3590_v55 }
 0x42e   : > { %v2223_v37 = vpop.f32.mrf.mxu0 }
 0x42f   : > { %v1754_v60 = vadd.f32 %v1722_v48, %v1690_v14  ;;  %v2224_v0 = vadd.f32 %v2223_v37, %v2222_v53  ;;  %v1731_v37 = vunpack.c.h.bf16 %v2595_v8 }
 0x430   : > { %v2225_v51 = vpop.f32.mrf.mxu0 }
 0x431   : > { %v2101_v18 = vpack.c.bf16 %v1754_v60, %v1754_v60  ;;  %v1691_v26 = vmul.f32 %v2224_v0, %v3590_v55 }
 0x432   : > { %v2226_v11 = vpop.f32.mrf.mxu0 }
 0x433   : > { %1915 = vst.msk [vmem:[%s3599_s13 + $0x8] sm:$0xf] %vm1912_vm1, %v2101_v18  ;;  %v1755_v41 = vadd.f32 %v1723_v19, %v1691_v26  ;;  %v2227_v49 = vadd.f32 %v2226_v11, %v2225_v51  ;;  %v2596_v11 = vld [vmem:[%s2676_s5 + $0x30] sm:$0xff]  }
 0x434   : > { %v2228_v58 = vpop.f32.mrf.mxu0 }
 0x435   : > { %v2102_v40 = vpack.c.bf16 %v1755_v41, %v1755_v41  ;;  %v1692_v4 = vmul.f32 %v2227_v49, %v3590_v55  ;;  %v1732_v41 = vunpack.c.l.bf16 %v2596_v11 }
 0x436   : > { %v2229_v9 = vpop.f32.mrf.mxu0 }
 0x437   : > { %1916 = vst.msk [vmem:[%s3599_s13 + $0xc] sm:$0xf] %vm1912_vm1, %v2102_v40  ;;  %v1756_v27 = vadd.f32 %v1724_v44, %v1692_v4  ;;  %v2230_v23 = vadd.f32 %v2229_v9, %v2228_v58  ;;  %v1733_v9 = vunpack.c.h.bf16 %v2596_v11 }
 0x438   : > { %v2231_v34 = vpop.f32.mrf.mxu0 }
 0x439   : > { %v2103_v54 = vpack.c.bf16 %v1756_v27, %v1756_v27  ;;  %v1693_v5 = vmul.f32 %v2230_v23, %v3590_v55 }
 0x43a   : > { %v2232_v12 = vpop.f32.mrf.mxu0 }
 0x43b   : > { %1917 = vst.msk [vmem:[%s3599_s13 + $0x10] sm:$0xf] %vm1912_vm1, %v2103_v54  ;;  %v1757_v17 = vadd.f32 %v1725_v38, %v1693_v5  ;;  %v2233_v22 = vadd.f32 %v2232_v12, %v2231_v34  ;;  %v2597_v12 = vld [vmem:[%s2676_s5 + $0x38] sm:$0xff]  }
 0x43c   : > { %v2234_v16 = vpop.f32.mrf.mxu0 }
 0x43d   : > { %v2104_v20 = vpack.c.bf16 %v1757_v17, %v1757_v17  ;;  %v1694_v39 = vmul.f32 %v2233_v22, %v3590_v55  ;;  %v1734_v17 = vunpack.c.l.bf16 %v2597_v12 }
 0x43e   : > { %v2235_v46 = vpop.f32.mrf.mxu0 }
 0x43f   : > { %1918 = vst.msk [vmem:[%s3599_s13 + $0x14] sm:$0xf] %vm1912_vm1, %v2104_v20  ;;  %v1758_v13 = vadd.f32 %v1726_v47, %v1694_v39  ;;  %v2236_v1 = vadd.f32 %v2235_v46, %v2234_v16  ;;  %v1735_v46 = vunpack.c.h.bf16 %v2597_v12 }
 0x440   : > { %v2237_v25 = vpop.f32.mrf.mxu0 }
 0x441   : > { %v2105_v30 = vpack.c.bf16 %v1758_v13, %v1758_v13  ;;  %v1695_v36 = vmul.f32 %v2236_v1, %v3590_v55 }
 0x442   : > { %v2238_v2 = vpop.f32.mrf.mxu0 }
 0x443   : > { %1919 = vst.msk [vmem:[%s3599_s13 + $0x18] sm:$0xf] %vm1912_vm1, %v2105_v30  ;;  %v1759_v63 = vadd.f32 %v1727_v52, %v1695_v36  ;;  %v2239_v10 = vadd.f32 %v2238_v2, %v2237_v25  ;;  %v2598_v2 = vld [vmem:[%s2676_s5 + $0x40] sm:$0xff]  }
 0x444   : > { %v2240_v45 = vpop.f32.mrf.mxu0 }
 0x445   : > { %v2106_v56 = vpack.c.bf16 %v1759_v63, %v1759_v63  ;;  %v1696_v57 = vmul.f32 %v2239_v10, %v3590_v55  ;;  %v1736_v63 = vunpack.c.l.bf16 %v2598_v2 }
 0x446   : > { %v2241_v35 = vpop.f32.mrf.mxu0 }
 0x447   : > { %1920 = vst.msk [vmem:[%s3599_s13 + $0x1c] sm:$0xf] %vm1912_vm1, %v2106_v56  ;;  %v1760_v15 = vadd.f32 %v1728_v33, %v1696_v57  ;;  %v2242_v21 = vadd.f32 %v2241_v35, %v2240_v45  ;;  %v1737_v35 = vunpack.c.h.bf16 %v2598_v2 }
 0x448   : > { %v2243_v31 = vpop.f32.mrf.mxu0 }
 0x449   : > { %v2107_v29 = vpack.c.bf16 %v1760_v15, %v1760_v15  ;;  %v1697_v32 = vmul.f32 %v2242_v21, %v3590_v55 }
 0x44a   : > { %v2244_v61 = vpop.f32.mrf.mxu0 }
 0x44b   : > { %1921 = vst.msk [vmem:[%s3599_s13 + $0x20] sm:$0xf] %vm1912_vm1, %v2107_v29  ;;  %v1761_v28 = vadd.f32 %v1729_v6, %v1697_v32  ;;  %v2245_v3 = vadd.f32 %v2244_v61, %v2243_v31  ;;  %v2599_v61 = vld [vmem:[%s2676_s5 + $0x48] sm:$0xff]  }
 0x44c   : > { %v2246_v43 = vpop.f32.mrf.mxu0 }
 0x44d   : > { %v2108_v59 = vpack.c.bf16 %v1761_v28, %v1761_v28  ;;  %v1698_v24 = vmul.f32 %v2245_v3, %v3590_v55  ;;  %v1738_v28 = vunpack.c.l.bf16 %v2599_v61 }
 0x44e   : > { %v2247_v48 = vpop.f32.mrf.mxu0 }
 0x44f   : > { %1922 = vst.msk [vmem:[%s3599_s13 + $0x24] sm:$0xf] %vm1912_vm1, %v2108_v59  ;;  %v1762_v53 = vadd.f32 %v1730_v42, %v1698_v24  ;;  %v2248_v14 = vadd.f32 %v2247_v48, %v2246_v43  ;;  %v1739_v48 = vunpack.c.h.bf16 %v2599_v61 }
 0x450   : > { %v2249_v60 = vpop.f32.mrf.mxu0 }
 0x451   : > { %v2109_v0 = vpack.c.bf16 %v1762_v53, %v1762_v53  ;;  %v1699_v19 = vmul.f32 %v2248_v14, %v3590_v55 }
 0x452   : > { %v2250_v51 = vpop.f32.mrf.mxu0 }
 0x453   : > { %1923 = vst.msk [vmem:[%s3599_s13 + $0x28] sm:$0xf] %vm1912_vm1, %v2109_v0  ;;  %v1763_v18 = vadd.f32 %v1731_v37, %v1699_v19  ;;  %v2251_v26 = vadd.f32 %v2250_v51, %v2249_v60  ;;  %v2600_v51 = vld [vmem:[%s2676_s5 + $0x50] sm:$0xff]  }
 0x454   : > { %v2252_v49 = vpop.f32.mrf.mxu0 }
 0x455   : > { %v2110_v50 = vpack.c.bf16 %v1763_v18, %v1763_v18  ;;  %v1700_v44 = vmul.f32 %v2251_v26, %v3590_v55  ;;  %v1740_v18 = vunpack.c.l.bf16 %v2600_v51 }
 0x456   : > { %v2253_v58 = vpop.f32.mrf.mxu0 }
 0x457   : > { %1924 = vst.msk [vmem:[%s3599_s13 + $0x2c] sm:$0xf] %vm1912_vm1, %v2110_v50  ;;  %v1764_v40 = vadd.f32 %v1732_v41, %v1700_v44  ;;  %v2254_v4 = vadd.f32 %v2253_v58, %v2252_v49  ;;  %v1741_v58 = vunpack.c.h.bf16 %v2600_v51 }
 0x458   : > { %v2255_v27 = vpop.f32.mrf.mxu0 }
 0x459   : > { %v2111_v23 = vpack.c.bf16 %v1764_v40, %v1764_v40  ;;  %v1701_v38 = vmul.f32 %v2254_v4, %v3590_v55 }
 0x45a   : > { %v2256_v34 = vpop.f32.mrf.mxu0 }
 0x45b   : > { %1925 = vst.msk [vmem:[%s3599_s13 + $0x30] sm:$0xf] %vm1912_vm1, %v2111_v23  ;;  %v1765_v54 = vadd.f32 %v1733_v9, %v1701_v38  ;;  %v2257_v5 = vadd.f32 %v2256_v34, %v2255_v27  ;;  %v2601_v34 = vld [vmem:[%s2676_s5 + $0x58] sm:$0xff]  }
 0x45c   : > { %v2258_v22 = vpop.f32.mrf.mxu0 }
 0x45d   : > { %v2112_v7 = vpack.c.bf16 %v1765_v54, %v1765_v54  ;;  %v1702_v47 = vmul.f32 %v2257_v5, %v3590_v55  ;;  %v1742_v54 = vunpack.c.l.bf16 %v2601_v34 }
 0x45e   : > { %v2259_v16 = vpop.f32.mrf.mxu0 }
 0x45f   : > { %1926 = vst.msk [vmem:[%s3599_s13 + $0x34] sm:$0xf] %vm1912_vm1, %v2112_v7  ;;  %v1766_v20 = vadd.f32 %v1734_v17, %v1702_v47  ;;  %v2260_v39 = vadd.f32 %v2259_v16, %v2258_v22  ;;  %v1743_v16 = vunpack.c.h.bf16 %v2601_v34 }
 0x460   : > { %v2261_v13 = vpop.f32.mrf.mxu0 }
 0x461   : > { %v2113_v1 = vpack.c.bf16 %v1766_v20, %v1766_v20  ;;  %v1703_v52 = vmul.f32 %v2260_v39, %v3590_v55 }
 0x462   : > { %v2262_v25 = vpop.f32.mrf.mxu0 }
 0x463   : > { %1927 = vst.msk [vmem:[%s3599_s13 + $0x38] sm:$0xf] %vm1912_vm1, %v2113_v1  ;;  %v1767_v30 = vadd.f32 %v1735_v46, %v1703_v52  ;;  %v2263_v36 = vadd.f32 %v2262_v25, %v2261_v13 }
 0x464   : > { %v2264_v10 = vpop.f32.mrf.mxu0 }
 0x465   : > { %v2114_v62 = vpack.c.bf16 %v1767_v30, %v1767_v30  ;;  %v1704_v33 = vmul.f32 %v2263_v36, %v3590_v55  ;;  %v2602_v30 = vld [vmem:[%s2676_s5 + $0x60] sm:$0xff]  }
 0x466   : > { %v2265_v45 = vpop.f32.mrf.mxu0  ;;  %v1744_v36 = vunpack.c.l.bf16 %v2602_v30 }
 0x467   : > { %1928 = vst.msk [vmem:[%s3599_s13 + $0x3c] sm:$0xf] %vm1912_vm1, %v2114_v62  ;;  %v1768_v56 = vadd.f32 %v1736_v63, %v1704_v33  ;;  %v2266_v57 = vadd.f32 %v2265_v45, %v2264_v10  ;;  %v1745_v45 = vunpack.c.h.bf16 %v2602_v30 }
 0x468   : > { %v2267_v15 = vpop.f32.mrf.mxu0 }
 0x469   : > { %v2115_v21 = vpack.c.bf16 %v1768_v56, %v1768_v56  ;;  %v1705_v6 = vmul.f32 %v2266_v57, %v3590_v55 }
 0x46a   : > { %v2268_v31 = vpop.f32.mrf.mxu0 }
 0x46b   : > { %1929 = vst.msk [vmem:[%s3599_s13 + $0x40] sm:$0xf] %vm1912_vm1, %v2115_v21  ;;  %v1769_v29 = vadd.f32 %v1737_v35, %v1705_v6  ;;  %v2269_v32 = vadd.f32 %v2268_v31, %v2267_v15  ;;  %v2603_v31 = vld [vmem:[%s2676_s5 + $0x68] sm:$0xff]  }
 0x46c   : > { %v2270_v3 = vpop.f32.mrf.mxu0 }
 0x46d   : > { %v2116_v8 = vpack.c.bf16 %v1769_v29, %v1769_v29  ;;  %v1706_v42 = vmul.f32 %v2269_v32, %v3590_v55  ;;  %v1746_v29 = vunpack.c.l.bf16 %v2603_v31 }
 0x46e   : > { %v2271_v43 = vpop.f32.mrf.mxu0 }
 0x46f   : > { %1930 = vst.msk [vmem:[%s3599_s13 + $0x44] sm:$0xf] %vm1912_vm1, %v2116_v8  ;;  %v1770_v59 = vadd.f32 %v1738_v28, %v1706_v42  ;;  %v2272_v24 = vadd.f32 %v2271_v43, %v2270_v3  ;;  %v1747_v43 = vunpack.c.h.bf16 %v2603_v31 }
 0x470   : > { %v2273_v53 = vpop.f32.mrf.mxu0 }
 0x471   : > { %v2117_v14 = vpack.c.bf16 %v1770_v59, %v1770_v59  ;;  %v1707_v37 = vmul.f32 %v2272_v24, %v3590_v55 }
 0x472   : > { %v2274_v60 = vpop.f32.mrf.mxu0 }
 0x473   : > { %1931 = vst.msk [vmem:[%s3599_s13 + $0x48] sm:$0xf] %vm1912_vm1, %v2117_v14  ;;  %v1771_v0 = vadd.f32 %v1739_v48, %v1707_v37  ;;  %v2275_v19 = vadd.f32 %v2274_v60, %v2273_v53  ;;  %v2604_v60 = vld [vmem:[%s2676_s5 + $0x70] sm:$0xff]  }
 0x474   : > { %v2276_v26 = vpop.f32.mrf.mxu0 }
 0x475   : > { %v2118_v11 = vpack.c.bf16 %v1771_v0, %v1771_v0  ;;  %v1708_v41 = vmul.f32 %v2275_v19, %v3590_v55  ;;  %v1748_v0 = vunpack.c.l.bf16 %v2604_v60 }
 0x476   : > { %v2277_v49 = vpop.f32.mrf.mxu0 }
 0x477   : > { %1932 = vst.msk [vmem:[%s3599_s13 + $0x4c] sm:$0xf] %vm1912_vm1, %v2118_v11  ;;  %v1772_v50 = vadd.f32 %v1740_v18, %v1708_v41  ;;  %v2278_v44 = vadd.f32 %v2277_v49, %v2276_v26  ;;  %v1749_v49 = vunpack.c.h.bf16 %v2604_v60 }
 0x478   : > { %v2279_v40 = vpop.f32.mrf.mxu0 }
 0x479   : > { %v2119_v4 = vpack.c.bf16 %v1772_v50, %v1772_v50  ;;  %v1709_v9 = vmul.f32 %v2278_v44, %v3590_v55 }
 0x47a   : > { %v2280_v27 = vpop.f32.mrf.mxu0 }
 0x47b   : > { %1933 = vst.msk [vmem:[%s3599_s13 + $0x50] sm:$0xf] %vm1912_vm1, %v2119_v4  ;;  %v1773_v23 = vadd.f32 %v1741_v58, %v1709_v9  ;;  %v2281_v38 = vadd.f32 %v2280_v27, %v2279_v40  ;;  %v2605_v27 = vld [vmem:[%s2676_s5 + $0x78] sm:$0xff]  }
 0x47c   : > { %v2282_v5 = vpop.f32.mrf.mxu0 }
 0x47d   : > { %v2120_v12 = vpack.c.bf16 %v1773_v23, %v1773_v23  ;;  %v1710_v17 = vmul.f32 %v2281_v38, %v3590_v55  ;;  %v1750_v23 = vunpack.c.l.bf16 %v2605_v27 }
 0x47e   : > { %v2283_v22 = vpop.f32.mrf.mxu0 }
 0x47f   : > { %1934 = vst.msk [vmem:[%s3599_s13 + $0x54] sm:$0xf] %vm1912_vm1, %v2120_v12  ;;  %v1774_v7 = vadd.f32 %v1742_v54, %v1710_v17  ;;  %v2284_v47 = vadd.f32 %v2283_v22, %v2282_v5  ;;  %v1751_v22 = vunpack.c.h.bf16 %v2605_v27 }
 0x481   : > { %v2121_v20 = vpack.c.bf16 %v1774_v7, %v1774_v7  ;;  %v1711_v39 = vmul.f32 %v2284_v47, %v3590_v55 }
 0x483   : > { %1935 = vst.msk [vmem:[%s3599_s13 + $0x58] sm:$0xf] %vm1912_vm1, %v2121_v20  ;;  %v1775_v46 = vadd.f32 %v1743_v16, %v1711_v39 }
 0x485   : > { %v2122_v13 = vpack.c.bf16 %v1775_v46, %v1775_v46 }
 0x487   : > { %1936 = vst.msk [vmem:[%s3599_s13 + $0x5c] sm:$0xf] %vm1912_vm1, %v2122_v13 }
 0x4c1   : > { %v2285_v1 = vpop.f32.mrf.mxu0 }
 0x4c3   : > { %v2286_v52 = vpop.f32.mrf.mxu0 }
 0x4c4   : > { %v2287_v25 = vadd.f32 %v2286_v52, %v2285_v1 }
 0x4c5   : > { %v2288_v2 = vpop.f32.mrf.mxu0 }
 0x4c6   : > { %v1712_v63 = vmul.f32 %v2287_v25, %v3590_v55 }
 0x4c7   : > { %v2289_v10 = vpop.f32.mrf.mxu0 }
 0x4c8   : > { %v1776_v62 = vadd.f32 %v1744_v36, %v1712_v63  ;;  %v2290_v33 = vadd.f32 %v2289_v10, %v2288_v2 }
 0x4c9   : > { %v2291_v56 = vpop.f32.mrf.mxu0 }
 0x4ca   : > { %v2123_v57 = vpack.c.bf16 %v1776_v62, %v1776_v62  ;;  %v1713_v35 = vmul.f32 %v2290_v33, %v3590_v55 }
 0x4cb   : > { %v2292_v15 = vpop.f32.mrf.mxu0 }
 0x4cc   : > { %1937 = vst.msk [vmem:[%s3599_s13 + $0x60] sm:$0xf] %vm1912_vm1, %v2123_v57  ;;  %v1777_v21 = vadd.f32 %v1745_v45, %v1713_v35  ;;  %v2293_v6 = vadd.f32 %v2292_v15, %v2291_v56 }
 0x4cd   : > { %v2294_v32 = vpop.f32.mrf.mxu0 }
 0x4ce   : > { %v2124_v61 = vpack.c.bf16 %v1777_v21, %v1777_v21  ;;  %v1714_v28 = vmul.f32 %v2293_v6, %v3590_v55 }
 0x4cf   : > { %v2295_v3 = vpop.f32.mrf.mxu0 }
 0x4d0   : > { %1938 = vst.msk [vmem:[%s3599_s13 + $0x64] sm:$0xf] %vm1912_vm1, %v2124_v61  ;;  %v1778_v8 = vadd.f32 %v1746_v29, %v1714_v28  ;;  %v2296_v42 = vadd.f32 %v2295_v3, %v2294_v32 }
 0x4d1   : > { %v2297_v59 = vpop.f32.mrf.mxu0 }
 0x4d2   : > { %v2125_v24 = vpack.c.bf16 %v1778_v8, %v1778_v8  ;;  %v1715_v48 = vmul.f32 %v2296_v42, %v3590_v55 }
 0x4d3   : > { %v2298_v53 = vpop.f32.mrf.mxu0 }
 0x4d4   : > { %1939 = vst.msk [vmem:[%s3599_s13 + $0x68] sm:$0xf] %vm1912_vm1, %v2125_v24  ;;  %v1779_v14 = vadd.f32 %v1747_v43, %v1715_v48  ;;  %v2299_v37 = vadd.f32 %v2298_v53, %v2297_v59 }
 0x4d5   : > { %v2300_v19 = vpop.f32.mrf.mxu0 }
 0x4d6   : > { %v2126_v51 = vpack.c.bf16 %v1779_v14, %v1779_v14  ;;  %v1716_v18 = vmul.f32 %v2299_v37, %v3590_v55 }
 0x4d7   : > { %v2301_v26 = vpop.f32.mrf.mxu0 }
 0x4d8   : > { %1940 = vst.msk [vmem:[%s3599_s13 + $0x6c] sm:$0xf] %vm1912_vm1, %v2126_v51  ;;  %v1780_v11 = vadd.f32 %v1748_v0, %v1716_v18  ;;  %v2302_v41 = vadd.f32 %v2301_v26, %v2300_v19 }
 0x4d9   : > { %v2303_v50 = vpop.f32.mrf.mxu0 }
 0x4da   : > { %v2127_v44 = vpack.c.bf16 %v1780_v11, %v1780_v11  ;;  %v1717_v58 = vmul.f32 %v2302_v41, %v3590_v55 }
 0x4db   : > { %v2304_v40 = vpop.f32.mrf.mxu0 }
 0x4dc   : > { %1941 = vst.msk [vmem:[%s3599_s13 + $0x70] sm:$0xf] %vm1912_vm1, %v2127_v44  ;;  %v1781_v4 = vadd.f32 %v1749_v49, %v1717_v58  ;;  %v2305_v9 = vadd.f32 %v2304_v40, %v2303_v50 }
 0x4dd   : > { %v2306_v38 = vpop.f32.mrf.mxu0 }
 0x4de   : > { %v2128_v34 = vpack.c.bf16 %v1781_v4, %v1781_v4  ;;  %v1718_v54 = vmul.f32 %v2305_v9, %v3590_v55 }
 0x4df   : > { %v2307_v5 = vpop.f32.mrf.mxu0 }
 0x4e0   : > { %1942 = vst.msk [vmem:[%s3599_s13 + $0x74] sm:$0xf] %vm1912_vm1, %v2128_v34  ;;  %v1782_v12 = vadd.f32 %v1750_v23, %v1718_v54  ;;  %v2308_v17 = vadd.f32 %v2307_v5, %v2306_v38 }
 0x4e2   : > { %v2129_v7 = vpack.c.bf16 %v1782_v12, %v1782_v12  ;;  %v1719_v47 = vmul.f32 %v2308_v17, %v3590_v55 }
 0x4e4   : > { %1943 = vst.msk [vmem:[%s3599_s13 + $0x78] sm:$0xf] %vm1912_vm1, %v2129_v7  ;;  %v1783_v16 = vadd.f32 %v1751_v22, %v1719_v47 }
 0x4e6   : > { %v2130_v20 = vpack.c.bf16 %v1783_v16, %v1783_v16 }
 0x4e8   : > { %1944 = vst.msk [vmem:[%s3599_s13 + $0x7c] sm:$0xf] %vm1912_vm1, %v2130_v20 }
 0x4e9 PF: > { %s15_s17 = sadd.s32 1, %s2612_s17  }
 0x4ea   : > { %p12_p4 = scmp.ge.s32.totalorder %s15_s17, 4  }
 0x4ec   :  { %14 = sbr.rel (!%p12_p4) target bundleno = 2 (0x2), region = 66 }

// kernel: netg_fwd.16
= control target key start
LH: loop header
LB: loop body
LE: loop exit
PB: predicated region body
PF: predicated region fallthrough
CT: control target
= control target key end

     0   :  { %s61_s0 = inlined_call_operand.vmem [shape: bf16[16,128], index: 0, kind: input, shape index: {}]   ;;  %s62_s1 = inlined_call_operand.vmem [shape: bf16[16,128], index: 1, kind: output, shape index: {}]  }
   0x1   :  { %v33_v0 = vld [vmem:[%s61_s0] sm:$0xff]  }
   0x2   :  { %v34_v1 = vunpack.c.l.bf16 %v33_v0  ;;  %v35_v2 = vunpack.c.h.bf16 %v33_v0 }
   0x4   :  { %41 = vtanh.f32 %v34_v1 }
   0x5   :  { %43 = vtanh.f32 %v35_v2 }
  0x11   :  { %v42_v3 = vpop.eup %41 }
  0x12   :  { %v44_v4 = vpop.eup %43 }
  0x13   :  { %v39_v5 = vpack.c.bf16 %v44_v4, %v42_v3 }
  0x15   :  { %40 = vst [vmem:[%s62_s1] sm:$0xff] %v39_v5  }

</bundles_post_ra>
